<compile_context>
chip_gen: v7x
topology: tpu7x:2x2x1
jax: 0.10.0
libtpu: 0.0.40
codegen_flags: <defaults>
</compile_context>

<pallas_src>
import functools

import jax
import jax.numpy as jnp
from jax.experimental import pallas as pl
from jax.experimental.pallas import tpu as pltpu

EPS = 1e-5            # PyTorch BatchNorm default eps
NUM_CLASSES = 18
NC_PAD = 128          # class axis padded to 128 lanes for unmasked stores
VMEM_LIMIT = 32 * 1024 * 1024


def _round_up(x, m):
    return (x + m - 1) // m * m


# ---------------------------------------------------------------------------
# Pallas kernel bodies
# ---------------------------------------------------------------------------
def _point_mlp_max_kernel(x_ref, w1_ref, b1_ref, w2_ref, b2_ref, w3_ref,
                          b3_ref, g_ref, *, n_valid, tn, last_relu):
    """Fused 3->64->128->1024 per-point MLP + running per-batch max over points.

    Shared body for the STN chain (last_relu=True, shared W1) and the feat
    chain (last_relu=False, per-batch W1 with the STN transform folded in).
    """
    i = pl.program_id(1)
    h = jnp.dot(x_ref[...], w1_ref[...], preferred_element_type=jnp.float32)
    h = jnp.maximum(h + b1_ref[...], 0.0)                   # (tn, 64)
    h = jnp.dot(h, w2_ref[...], preferred_element_type=jnp.float32)
    h = jnp.maximum(h + b2_ref[...], 0.0)                   # (tn, 128)
    h = jnp.dot(h, w3_ref[...], preferred_element_type=jnp.float32)
    h = h + b3_ref[...]                                     # (tn, 1024)
    if last_relu:
        h = jnp.maximum(h, 0.0)
    if n_valid % tn != 0:
        # only the last tile contains padded rows; mask them out of the max
        row = jax.lax.broadcasted_iota(jnp.int32, (tn, 1), 0) + i * tn
        h = jnp.where(row < n_valid, h, -jnp.inf)
    tile_max = jnp.max(h, axis=0, keepdims=True)            # (1, 1024)

    @pl.when(i == 0)
    def _():
        g_ref[...] = jnp.full(g_ref.shape, -jnp.inf, jnp.float32)

    g_ref[...] = jnp.maximum(g_ref[...], tile_max)


def _head_kernel(x_ref, w1_ref, b1_ref, gb_ref, wa_ref, w2_ref, b2_ref,
                 we_ref, be_ref, o_ref):
    """Fused head: recompute pointfeat (3->64) from x, then
    64->512 (+per-batch global bias, ReLU), 512->256 (ReLU),
    256->128 (folded 18-class classifier, zero-padded lanes)."""
    pf = jnp.dot(x_ref[...], w1_ref[...], preferred_element_type=jnp.float32)
    pf = jnp.maximum(pf + b1_ref[...], 0.0)                  # (tn, 64)
    h = jnp.dot(pf, wa_ref[...], preferred_element_type=jnp.float32)
    h = jnp.maximum(h + gb_ref[...], 0.0)   # gb = g @ W1[:1024] + b1 per batch
    h = jnp.dot(h, w2_ref[...], preferred_element_type=jnp.float32)
    h = jnp.maximum(h + b2_ref[...], 0.0)                    # (tn, 256)
    s = jnp.dot(h, we_ref[...], preferred_element_type=jnp.float32) + be_ref[...]
    o_ref[...] = s.astype(o_ref.dtype)


# ---------------------------------------------------------------------------
# pallas_call wrappers
# ---------------------------------------------------------------------------
def point_mlp_max(x_p, w1, b1, w2, b2, w3, b3, *, n_valid, tn, last_relu):
    """x_p: (B, Np, 3) padded points; w1 either (3,64) shared or (B,3,64)."""
    B, Np, _ = x_p.shape
    nt = Np // tn
    if w1.ndim == 3:
        w1_spec = pl.BlockSpec((None, 3, 64), lambda b, i: (b, 0, 0))
    else:
        w1_spec = pl.BlockSpec((3, 64), lambda b, i: (0, 0))
    kern = functools.partial(_point_mlp_max_kernel, n_valid=n_valid, tn=tn,
                             last_relu=last_relu)
    g = pl.pallas_call(
        kern,
        out_shape=jax.ShapeDtypeStruct((B, 1, 1024), jnp.float32),
        grid=(B, nt),
        in_specs=[
            pl.BlockSpec((None, tn, 3), lambda b, i: (b, i, 0)),
            w1_spec,
            pl.BlockSpec((1, 64), lambda b, i: (0, 0)),
            pl.BlockSpec((64, 128), lambda b, i: (0, 0)),
            pl.BlockSpec((1, 128), lambda b, i: (0, 0)),
            pl.BlockSpec((128, 1024), lambda b, i: (0, 0)),
            pl.BlockSpec((1, 1024), lambda b, i: (0, 0)),
        ],
        out_specs=pl.BlockSpec((None, 1, 1024), lambda b, i: (b, 0, 0)),
        compiler_params=pltpu.CompilerParams(
            dimension_semantics=("parallel", "arbitrary"),
            vmem_limit_bytes=VMEM_LIMIT),
    )(x_p, w1, b1.reshape(1, -1), w2, b2.reshape(1, -1), w3, b3.reshape(1, -1))
    return g[:, 0, :]                                        # (B, 1024)


def head_mlp(x_p, w1_eff, b1, gbias, w1a, w2, b2, w_eff, b_eff, *, tn):
    B, Np, _ = x_p.shape
    nt = Np // tn
    return pl.pallas_call(
        _head_kernel,
        out_shape=jax.ShapeDtypeStruct((B, Np, NC_PAD), jnp.float32),
        grid=(B, nt),
        in_specs=[
            pl.BlockSpec((None, tn, 3), lambda b, i: (b, i, 0)),
            pl.BlockSpec((None, 3, 64), lambda b, i: (b, 0, 0)),   # per-batch W1
            pl.BlockSpec((1, 64), lambda b, i: (0, 0)),
            pl.BlockSpec((None, 1, 512), lambda b, i: (b, 0, 0)),  # per-batch bias
            pl.BlockSpec((64, 512), lambda b, i: (0, 0)),
            pl.BlockSpec((512, 256), lambda b, i: (0, 0)),
            pl.BlockSpec((1, 256), lambda b, i: (0, 0)),
            pl.BlockSpec((256, NC_PAD), lambda b, i: (0, 0)),
            pl.BlockSpec((1, NC_PAD), lambda b, i: (0, 0)),
        ],
        out_specs=pl.BlockSpec((None, tn, NC_PAD), lambda b, i: (b, i, 0)),
        compiler_params=pltpu.CompilerParams(
            dimension_semantics=("parallel", "parallel"),
            vmem_limit_bytes=VMEM_LIMIT),
    )(x_p, w1_eff, b1.reshape(1, -1), gbias.reshape(B, 1, 512), w1a, w2,
      b2.reshape(1, -1), w_eff, b_eff.reshape(1, -1))


# ---------------------------------------------------------------------------
# Parameters (deterministic synthetic init) + BN folding
# ---------------------------------------------------------------------------
def fold_bn(w, b, bn):
    """Fold eval-mode BatchNorm into a (Cin, Cout) weight + (Cout,) bias."""
    s = bn["gamma"] / jnp.sqrt(bn["var"] + EPS)
    return w * s[None, :], b * s + (bn["beta"] - bn["mean"] * s)


def init_params(key):
    keys = iter(jax.random.split(key, 256))

    def w(shape, scale=0.1):
        return scale * jax.random.normal(next(keys), shape, jnp.float32)

    def bn(shape):
        if isinstance(shape, int):
            shape = (shape,)
        return dict(
            gamma=1.0 + 0.1 * jax.random.normal(next(keys), shape, jnp.float32),
            beta=0.1 * jax.random.normal(next(keys), shape, jnp.float32),
            mean=0.1 * jax.random.normal(next(keys), shape, jnp.float32),
            var=0.5 + 0.1 * jnp.abs(jax.random.normal(next(keys), shape, jnp.float32)),
        )

    p = {}
    p["stn"] = dict(
        c1w=w((3, 64)), c1b=w((64,), 0.01), bn1=bn(64),
        c2w=w((64, 128)), c2b=w((128,), 0.01), bn2=bn(128),
        c3w=w((128, 1024)), c3b=w((1024,), 0.01), bn3=bn(1024),
        f1w=w((1024, 512)), f1b=w((512,), 0.01), bn4=bn(512),
        f2w=w((512, 256)), f2b=w((256,), 0.01), bn5=bn(256),
        f3w=w((256, 9)), f3b=w((9,), 0.01),
    )
    p["feat"] = dict(
        c1w=w((3, 64)), c1b=w((64,), 0.01), bn1=bn(64),
        c2w=w((64, 128)), c2b=w((128,), 0.01), bn2=bn(128),
        c3w=w((128, 1024)), c3b=w((1024,), 0.01), bn3=bn(1024),
    )
    # Point_Estimation trunk (conv3/bn3 of the module are unused in forward)
    p["head"] = dict(
        c1w=w((1088, 512)), c1b=w((512,), 0.01), bn1=bn(512),
        c2w=w((512, 256)), c2b=w((256,), 0.01), bn2=bn(256),
    )
    # 18 per-class classifiers: Conv1d(256,128) + BN(128) + Conv1d(128,1)
    p["clf"] = dict(
        w1=w((NUM_CLASSES, 256, 128)), b1=w((NUM_CLASSES, 128), 0.01),
        bn=bn((NUM_CLASSES, 128)),
        w2=w((NUM_CLASSES, 128)), b2=w((NUM_CLASSES,), 0.01),
    )
    return p


# ---------------------------------------------------------------------------
# Forward pass (mirrors Point_Estimation.forward, eval-mode BN)
# ---------------------------------------------------------------------------
def point_estimation_forward(x, params):
    # x: (B, 3, N)  -- PyTorch Conv1d NCW layout
    B, _, N = x.shape
    x_pts = jnp.transpose(x, (0, 2, 1))                    # (B, N, 3)

    tn = min(512, _round_up(N, 8))
    Np = _round_up(N, tn)
    if Np != N:
        x_pts = jnp.pad(x_pts, ((0, 0), (0, Np - N), (0, 0)))

    # --- STN3d: fused point MLP + max (Pallas), tiny FC stack in XLA ---
    sp = params["stn"]
    w1, b1 = fold_bn(sp["c1w"], sp["c1b"], sp["bn1"])
    w2, b2 = fold_bn(sp["c2w"], sp["c2b"], sp["bn2"])
    w3, b3 = fold_bn(sp["c3w"], sp["c3b"], sp["bn3"])
    g = point_mlp_max(x_pts, w1, b1, w2, b2, w3, b3,
                      n_valid=N, tn=tn, last_relu=True)
    f1w, f1b = fold_bn(sp["f1w"], sp["f1b"], sp["bn4"])
    f2w, f2b = fold_bn(sp["f2w"], sp["f2b"], sp["bn5"])
    g = jnp.maximum(g @ f1w + f1b, 0.0)
    g = jnp.maximum(g @ f2w + f2b, 0.0)
    t9 = g @ sp["f3w"] + sp["f3b"] + jnp.eye(3, dtype=jnp.float32).reshape(1, 9)
    trans = t9.reshape(B, 3, 3)

    # --- PointNetfeat: fold trans into conv1 weight per batch, fused chain ---
    fp = params["feat"]
    fw1, fb1 = fold_bn(fp["c1w"], fp["c1b"], fp["bn1"])
    fw2, fb2 = fold_bn(fp["c2w"], fp["c2b"], fp["bn2"])
    fw3, fb3 = fold_bn(fp["c3w"], fp["c3b"], fp["bn3"])
    w1_eff = jnp.einsum("bij,jk->bik", trans, fw1)         # (B, 3, 64)
    gfeat = point_mlp_max(x_pts, w1_eff, fb1, fw2, fb2, fw3, fb3,
                          n_valid=N, tn=tn, last_relu=False)   # (B, 1024)

    # --- head conv1(1088->512): split into per-batch + per-point halves ---
    hp = params["head"]
    hw1, hb1 = fold_bn(hp["c1w"], hp["c1b"], hp["bn1"])    # (1088, 512)
    hw2, hb2 = fold_bn(hp["c2w"], hp["c2b"], hp["bn2"])    # (512, 256)
    gbias = gfeat @ hw1[:1024] + hb1                       # (B, 512) per-batch term
    w1a = hw1[1024:]                                       # (64, 512) per-point term

    # --- 18 classifiers collapsed into one 256->18 matmul (lane-padded) ---
    cp = params["clf"]
    s = cp["bn"]["gamma"] / jnp.sqrt(cp["bn"]["var"] + EPS)   # (NC, 128)
    w1f = cp["w1"] * s[:, None, :]                            # (NC, 256, 128)
    b1f = cp["b1"] * s + (cp["bn"]["beta"] - cp["bn"]["mean"] * s)
    w_eff = jnp.einsum("ckd,cd->kc", w1f, cp["w2"])           # (256, NC)
    b_eff = jnp.einsum("cd,cd->c", b1f, cp["w2"]) + cp["b2"]  # (NC,)
    w_eff = jnp.pad(w_eff, ((0, 0), (0, NC_PAD - NUM_CLASSES)))
    b_eff = jnp.pad(b_eff, ((0, NC_PAD - NUM_CLASSES),))

    # head kernel recomputes pointfeat from x (no (B,N,64) HBM round trip)
    score = head_mlp(x_pts, w1_eff, fb1, gbias, w1a, hw2, hb2,
                     w_eff, b_eff, tn=tn)
    return jnp.transpose(score[:, :N, :NUM_CLASSES], (0, 2, 1))   # (B, NC, N)


# ---------------------------------------------------------------------------
# Pure-jnp reference (unfused, mirrors the PyTorch layer sequence, eval BN)
# ---------------------------------------------------------------------------
def reference_forward(x, params):
    B, _, N = x.shape
    x_pts = jnp.transpose(x, (0, 2, 1))

    def dense(h, w, b, relu):
        y = h @ w + b
        return jnp.maximum(y, 0.0) if relu else y

    sp = params["stn"]
    h = dense(x_pts.reshape(B * N, 3), *fold_bn(sp["c1w"], sp["c1b"], sp["bn1"]), True)
    h = dense(h, *fold_bn(sp["c2w"], sp["c2b"], sp["bn2"]), True)
    h = dense(h, *fold_bn(sp["c3w"], sp["c3b"], sp["bn3"]), True)
    g = jnp.max(h.reshape(B, N, 1024), axis=1)
    g = dense(g, *fold_bn(sp["f1w"], sp["f1b"], sp["bn4"]), True)
    g = dense(g, *fold_bn(sp["f2w"], sp["f2b"], sp["bn5"]), True)
    trans = (g @ sp["f3w"] + sp["f3b"]
             + jnp.eye(3, dtype=jnp.float32).reshape(1, 9)).reshape(B, 3, 3)

    xt = jnp.einsum("bnk,bkj->bnj", x_pts, trans).reshape(B * N, 3)
    fp = params["feat"]
    pointfeat = dense(xt, *fold_bn(fp["c1w"], fp["c1b"], fp["bn1"]), True)
    h = dense(pointfeat, *fold_bn(fp["c2w"], fp["c2b"], fp["bn2"]), True)
    h = dense(h, *fold_bn(fp["c3w"], fp["c3b"], fp["bn3"]), False)
    g = jnp.max(h.reshape(B, N, 1024), axis=1)
    gb = jnp.broadcast_to(g[:, None, :], (B, N, 1024))
    feat = jnp.concatenate([gb, pointfeat.reshape(B, N, 64)], axis=-1)

    hp = params["head"]
    h = dense(feat.reshape(B * N, 1088), *fold_bn(hp["c1w"], hp["c1b"], hp["bn1"]), True)
    h = dense(h, *fold_bn(hp["c2w"], hp["c2b"], hp["bn2"]), True)   # (B*N, 256)

    cp = params["clf"]
    s = cp["bn"]["gamma"] / jnp.sqrt(cp["bn"]["var"] + EPS)
    w1f = cp["w1"] * s[:, None, :]
    b1f = cp["b1"] * s + (cp["bn"]["beta"] - cp["bn"]["mean"] * s)
    hc = jnp.einsum("mk,ckd->mcd", h, w1f) + b1f[None]              # (B*N, NC, 128)
    score = jnp.einsum("mcd,cd->mc", hc, cp["w2"]) + cp["b2"]       # (B*N, NC)
    return jnp.transpose(score.reshape(B, N, NUM_CLASSES), (0, 2, 1))


# ---------------------------------------------------------------------------
if __name__ == "__main__":
    key = jax.random.PRNGKey(0)
    kx, kp = jax.random.split(key)
    B, N = 2, 64
    x = jax.random.normal(kx, (B, 3, N), jnp.float32)   # PyTorch layout (B, 3, n_pts)
    params = init_params(kp)

    fwd = jax.jit(point_estimation_forward)
    out = fwd(x, params)
    jax.block_until_ready(out)

    assert out.shape == (B, NUM_CLASSES, N) and out.dtype == jnp.float32
    assert bool(jnp.all(jnp.isfinite(out)))
    ref = reference_forward(x, params)
    max_diff = float(jnp.max(jnp.abs(out - ref)))
    assert bool(jnp.allclose(out, ref, rtol=5e-2, atol=5e-2)), max_diff

    print("KERNEL_OK")
</pallas_src>

<mosaic_0001>
module attributes {stable_mosaic.version = 11 : i64} {
  func.func @_point_mlp_max_kernel(%arg0: i32, %arg1: i32, %arg2: memref<1x64x3xf32, #tpu.memory_space<vmem>>, %arg3: memref<3x64xf32, #tpu.memory_space<vmem>>, %arg4: memref<1x64xf32, #tpu.memory_space<vmem>>, %arg5: memref<64x128xf32, #tpu.memory_space<vmem>>, %arg6: memref<1x128xf32, #tpu.memory_space<vmem>>, %arg7: memref<128x1024xf32, #tpu.memory_space<vmem>>, %arg8: memref<1x1024xf32, #tpu.memory_space<vmem>>, %arg9: memref<1x1x1024xf32, #tpu.memory_space<vmem>>) attributes {dimension_semantics = [#tpu.dimension_semantics<parallel>, #tpu.dimension_semantics<arbitrary>], iteration_bounds = array<i64: 2, 1>, scalar_prefetch = 0 : i64, scratch_operands = 0 : i64, tpu.core_type = #tpu.core_type<tc>, window_params = [{transform_indices = @transform_0, window_bounds = array<i64: 1, 64, 3>}, {pipeline_mode = #tpu.pipeline_mode<synchronous>, transform_indices = @transform_1, window_bounds = array<i64: 3, 64>}, {pipeline_mode = #tpu.pipeline_mode<synchronous>, transform_indices = @transform_2, window_bounds = array<i64: 1, 64>}, {pipeline_mode = #tpu.pipeline_mode<synchronous>, transform_indices = @transform_3, window_bounds = array<i64: 64, 128>}, {pipeline_mode = #tpu.pipeline_mode<synchronous>, transform_indices = @transform_4, window_bounds = array<i64: 1, 128>}, {pipeline_mode = #tpu.pipeline_mode<synchronous>, transform_indices = @transform_5, window_bounds = array<i64: 128, 1024>}, {pipeline_mode = #tpu.pipeline_mode<synchronous>, transform_indices = @transform_6, window_bounds = array<i64: 1, 1024>}, {transform_indices = @transform_7, window_bounds = array<i64: 1, 1, 1024>}]} {
    %c0 = arith.constant 0 : index
    %c0_0 = arith.constant 0 : index
    %c0_1 = arith.constant 0 : index
    %0 = vector.load %arg2[%c0, %c0_0, %c0_1] : memref<1x64x3xf32, #tpu.memory_space<vmem>>, vector<1x64x3xf32>
    %1 = vector.shape_cast %0 : vector<1x64x3xf32> to vector<64x3xf32>
    %c0_2 = arith.constant 0 : index
    %c0_3 = arith.constant 0 : index
    %2 = vector.load %arg3[%c0_2, %c0_3] : memref<3x64xf32, #tpu.memory_space<vmem>>, vector<3x64xf32>
    %cst = arith.constant dense<0.000000e+00> : vector<64x64xf32>
    %3 = tpu.matmul %1, %2, %cst {dimension_numbers = #tpu.dot_dimension_numbers<[1], [0], [0], [1], [0, 0, 1, 1], [], []>} : vector<64x3xf32>, vector<3x64xf32>, vector<64x64xf32> -> vector<64x64xf32>
    %c0_4 = arith.constant 0 : index
    %c0_5 = arith.constant 0 : index
    %4 = vector.load %arg4[%c0_4, %c0_5] : memref<1x64xf32, #tpu.memory_space<vmem>>, vector<1x64xf32>
    %5 = vector.broadcast %4 : vector<1x64xf32> to vector<64x64xf32>
    %6 = arith.addf %3, %5 : vector<64x64xf32>
    %cst_6 = arith.constant 0.000000e+00 : f32
    %7 = vector.broadcast %cst_6 : f32 to vector<64x64xf32>
    %8 = arith.maximumf %6, %7 : vector<64x64xf32>
    %c0_7 = arith.constant 0 : index
    %c0_8 = arith.constant 0 : index
    %9 = vector.load %arg5[%c0_7, %c0_8] : memref<64x128xf32, #tpu.memory_space<vmem>>, vector<64x128xf32>
    %cst_9 = arith.constant dense<0.000000e+00> : vector<64x128xf32>
    %10 = tpu.matmul %8, %9, %cst_9 {dimension_numbers = #tpu.dot_dimension_numbers<[1], [0], [0], [1], [0, 0, 1, 1], [], []>} : vector<64x64xf32>, vector<64x128xf32>, vector<64x128xf32> -> vector<64x128xf32>
    %c0_10 = arith.constant 0 : index
    %c0_11 = arith.constant 0 : index
    %11 = vector.load %arg6[%c0_10, %c0_11] : memref<1x128xf32, #tpu.memory_space<vmem>>, vector<1x128xf32>
    %12 = vector.broadcast %11 : vector<1x128xf32> to vector<64x128xf32>
    %13 = arith.addf %10, %12 : vector<64x128xf32>
    %cst_12 = arith.constant 0.000000e+00 : f32
    %14 = vector.broadcast %cst_12 : f32 to vector<64x128xf32>
    %15 = arith.maximumf %13, %14 : vector<64x128xf32>
    %c0_13 = arith.constant 0 : index
    %c0_14 = arith.constant 0 : index
    %16 = vector.load %arg7[%c0_13, %c0_14] : memref<128x1024xf32, #tpu.memory_space<vmem>>, vector<128x1024xf32>
    %cst_15 = arith.constant dense<0.000000e+00> : vector<64x1024xf32>
    %17 = tpu.matmul %15, %16, %cst_15 {dimension_numbers = #tpu.dot_dimension_numbers<[1], [0], [0], [1], [0, 0, 1, 1], [], []>} : vector<64x128xf32>, vector<128x1024xf32>, vector<64x1024xf32> -> vector<64x1024xf32>
    %c0_16 = arith.constant 0 : index
    %c0_17 = arith.constant 0 : index
    %18 = vector.load %arg8[%c0_16, %c0_17] : memref<1x1024xf32, #tpu.memory_space<vmem>>, vector<1x1024xf32>
    %19 = vector.broadcast %18 : vector<1x1024xf32> to vector<64x1024xf32>
    %20 = arith.addf %17, %19 : vector<64x1024xf32>
    %cst_18 = arith.constant 0.000000e+00 : f32
    %21 = vector.broadcast %cst_18 : f32 to vector<64x1024xf32>
    %22 = arith.maximumf %20, %21 : vector<64x1024xf32>
    %cst_19 = arith.constant dense<0xFF800000> : vector<1024xf32>
    %23 = vector.multi_reduction <maximumf>, %22, %cst_19 [0] : vector<64x1024xf32> to vector<1024xf32>
    %24 = vector.shape_cast %23 : vector<1024xf32> to vector<1x1024xf32>
    %c0_i32 = arith.constant 0 : i32
    %25 = arith.cmpi eq, %arg1, %c0_i32 : i32
    %26 = arith.extui %25 : i1 to i32
    %c0_i32_20 = arith.constant 0 : i32
    %27 = arith.cmpi ne, %26, %c0_i32_20 : i32
    scf.if %27 {
      %cst_27 = arith.constant 0xFF800000 : f32
      %34 = vector.broadcast %cst_27 : f32 to vector<1x1024xf32>
      %c0_28 = arith.constant 0 : index
      %c0_29 = arith.constant 0 : index
      %c0_30 = arith.constant 0 : index
      %35 = vector.load %arg9[%c0_28, %c0_29, %c0_30] : memref<1x1x1024xf32, #tpu.memory_space<vmem>>, vector<1x1x1024xf32>
      %36 = vector.shape_cast %35 : vector<1x1x1024xf32> to vector<1x1024xf32>
      %37 = vector.shape_cast %34 : vector<1x1024xf32> to vector<1x1x1024xf32>
      tpu.vector_store %arg9[%c0_28, %c0_29, %c0_30], %37 {strides = array<i32>} : memref<1x1x1024xf32, #tpu.memory_space<vmem>>, vector<1x1x1024xf32>,
    } else {
    }
    %c0_21 = arith.constant 0 : index
    %c0_22 = arith.constant 0 : index
    %c0_23 = arith.constant 0 : index
    %28 = vector.load %arg9[%c0_21, %c0_22, %c0_23] : memref<1x1x1024xf32, #tpu.memory_space<vmem>>, vector<1x1x1024xf32>
    %29 = vector.shape_cast %28 : vector<1x1x1024xf32> to vector<1x1024xf32>
    %30 = arith.maximumf %29, %24 : vector<1x1024xf32>
    %c0_24 = arith.constant 0 : index
    %c0_25 = arith.constant 0 : index
    %c0_26 = arith.constant 0 : index
    %31 = vector.load %arg9[%c0_24, %c0_25, %c0_26] : memref<1x1x1024xf32, #tpu.memory_space<vmem>>, vector<1x1x1024xf32>
    %32 = vector.shape_cast %31 : vector<1x1x1024xf32> to vector<1x1024xf32>
    %33 = vector.shape_cast %30 : vector<1x1024xf32> to vector<1x1x1024xf32>
    tpu.vector_store %arg9[%c0_24, %c0_25, %c0_26], %33 {strides = array<i32>} : memref<1x1x1024xf32, #tpu.memory_space<vmem>>, vector<1x1x1024xf32>,
    return
  }
  func.func @transform_0(%arg0: i32, %arg1: i32) -> (i32, i32, i32) {
    %c0_i32 = arith.constant 0 : i32
    %c0_i32_0 = arith.constant 0 : i32
    return %arg0, %arg1, %c0_i32 : i32, i32, i32
  }
  func.func @transform_1(%arg0: i32, %arg1: i32) -> (i32, i32) {
    %c0_i32 = arith.constant 0 : i32
    %c0_i32_0 = arith.constant 0 : i32
    %c0_i32_1 = arith.constant 0 : i32
    return %c0_i32, %c0_i32_0 : i32, i32
  }
  func.func @transform_2(%arg0: i32, %arg1: i32) -> (i32, i32) {
    %c0_i32 = arith.constant 0 : i32
    %c0_i32_0 = arith.constant 0 : i32
    %c0_i32_1 = arith.constant 0 : i32
    return %c0_i32, %c0_i32_0 : i32, i32
  }
  func.func @transform_3(%arg0: i32, %arg1: i32) -> (i32, i32) {
    %c0_i32 = arith.constant 0 : i32
    %c0_i32_0 = arith.constant 0 : i32
    %c0_i32_1 = arith.constant 0 : i32
    return %c0_i32, %c0_i32_0 : i32, i32
  }
  func.func @transform_4(%arg0: i32, %arg1: i32) -> (i32, i32) {
    %c0_i32 = arith.constant 0 : i32
    %c0_i32_0 = arith.constant 0 : i32
    %c0_i32_1 = arith.constant 0 : i32
    return %c0_i32, %c0_i32_0 : i32, i32
  }
  func.func @transform_5(%arg0: i32, %arg1: i32) -> (i32, i32) {
    %c0_i32 = arith.constant 0 : i32
    %c0_i32_0 = arith.constant 0 : i32
    %c0_i32_1 = arith.constant 0 : i32
    return %c0_i32, %c0_i32_0 : i32, i32
  }
  func.func @transform_6(%arg0: i32, %arg1: i32) -> (i32, i32) {
    %c0_i32 = arith.constant 0 : i32
    %c0_i32_0 = arith.constant 0 : i32
    %c0_i32_1 = arith.constant 0 : i32
    return %c0_i32, %c0_i32_0 : i32, i32
  }
  func.func @transform_7(%arg0: i32, %arg1: i32) -> (i32, i32, i32) {
    %c0_i32 = arith.constant 0 : i32
    %c0_i32_0 = arith.constant 0 : i32
    %c0_i32_1 = arith.constant 0 : i32
    return %arg0, %c0_i32, %c0_i32_0 : i32, i32, i32
  }
}

module attributes {stable_mosaic.version = 11 : i64} {
  func.func @_point_mlp_max_kernel(%arg0: i32, %arg1: i32, %arg2: memref<1x64x3xf32, #tpu.memory_space<vmem>>, %arg3: memref<1x3x64xf32, #tpu.memory_space<vmem>>, %arg4: memref<1x64xf32, #tpu.memory_space<vmem>>, %arg5: memref<64x128xf32, #tpu.memory_space<vmem>>, %arg6: memref<1x128xf32, #tpu.memory_space<vmem>>, %arg7: memref<128x1024xf32, #tpu.memory_space<vmem>>, %arg8: memref<1x1024xf32, #tpu.memory_space<vmem>>, %arg9: memref<1x1x1024xf32, #tpu.memory_space<vmem>>) attributes {dimension_semantics = [#tpu.dimension_semantics<parallel>, #tpu.dimension_semantics<arbitrary>], iteration_bounds = array<i64: 2, 1>, scalar_prefetch = 0 : i64, scratch_operands = 0 : i64, tpu.core_type = #tpu.core_type<tc>, window_params = [{transform_indices = @transform_0, window_bounds = array<i64: 1, 64, 3>}, {transform_indices = @transform_1, window_bounds = array<i64: 1, 3, 64>}, {pipeline_mode = #tpu.pipeline_mode<synchronous>, transform_indices = @transform_2, window_bounds = array<i64: 1, 64>}, {pipeline_mode = #tpu.pipeline_mode<synchronous>, transform_indices = @transform_3, window_bounds = array<i64: 64, 128>}, {pipeline_mode = #tpu.pipeline_mode<synchronous>, transform_indices = @transform_4, window_bounds = array<i64: 1, 128>}, {pipeline_mode = #tpu.pipeline_mode<synchronous>, transform_indices = @transform_5, window_bounds = array<i64: 128, 1024>}, {pipeline_mode = #tpu.pipeline_mode<synchronous>, transform_indices = @transform_6, window_bounds = array<i64: 1, 1024>}, {transform_indices = @transform_7, window_bounds = array<i64: 1, 1, 1024>}]} {
    %c0 = arith.constant 0 : index
    %c0_0 = arith.constant 0 : index
    %c0_1 = arith.constant 0 : index
    %0 = vector.load %arg2[%c0, %c0_0, %c0_1] : memref<1x64x3xf32, #tpu.memory_space<vmem>>, vector<1x64x3xf32>
    %1 = vector.shape_cast %0 : vector<1x64x3xf32> to vector<64x3xf32>
    %c0_2 = arith.constant 0 : index
    %c0_3 = arith.constant 0 : index
    %c0_4 = arith.constant 0 : index
    %2 = vector.load %arg3[%c0_2, %c0_3, %c0_4] : memref<1x3x64xf32, #tpu.memory_space<vmem>>, vector<1x3x64xf32>
    %3 = vector.shape_cast %2 : vector<1x3x64xf32> to vector<3x64xf32>
    %cst = arith.constant dense<0.000000e+00> : vector<64x64xf32>
    %4 = tpu.matmul %1, %3, %cst {dimension_numbers = #tpu.dot_dimension_numbers<[1], [0], [0], [1], [0, 0, 1, 1], [], []>} : vector<64x3xf32>, vector<3x64xf32>, vector<64x64xf32> -> vector<64x64xf32>
    %c0_5 = arith.constant 0 : index
    %c0_6 = arith.constant 0 : index
    %5 = vector.load %arg4[%c0_5, %c0_6] : memref<1x64xf32, #tpu.memory_space<vmem>>, vector<1x64xf32>
    %6 = vector.broadcast %5 : vector<1x64xf32> to vector<64x64xf32>
    %7 = arith.addf %4, %6 : vector<64x64xf32>
    %cst_7 = arith.constant 0.000000e+00 : f32
    %8 = vector.broadcast %cst_7 : f32 to vector<64x64xf32>
    %9 = arith.maximumf %7, %8 : vector<64x64xf32>
    %c0_8 = arith.constant 0 : index
    %c0_9 = arith.constant 0 : index
    %10 = vector.load %arg5[%c0_8, %c0_9] : memref<64x128xf32, #tpu.memory_space<vmem>>, vector<64x128xf32>
    %cst_10 = arith.constant dense<0.000000e+00> : vector<64x128xf32>
    %11 = tpu.matmul %9, %10, %cst_10 {dimension_numbers = #tpu.dot_dimension_numbers<[1], [0], [0], [1], [0, 0, 1, 1], [], []>} : vector<64x64xf32>, vector<64x128xf32>, vector<64x128xf32> -> vector<64x128xf32>
    %c0_11 = arith.constant 0 : index
    %c0_12 = arith.constant 0 : index
    %12 = vector.load %arg6[%c0_11, %c0_12] : memref<1x128xf32, #tpu.memory_space<vmem>>, vector<1x128xf32>
    %13 = vector.broadcast %12 : vector<1x128xf32> to vector<64x128xf32>
    %14 = arith.addf %11, %13 : vector<64x128xf32>
    %cst_13 = arith.constant 0.000000e+00 : f32
    %15 = vector.broadcast %cst_13 : f32 to vector<64x128xf32>
    %16 = arith.maximumf %14, %15 : vector<64x128xf32>
    %c0_14 = arith.constant 0 : index
    %c0_15 = arith.constant 0 : index
    %17 = vector.load %arg7[%c0_14, %c0_15] : memref<128x1024xf32, #tpu.memory_space<vmem>>, vector<128x1024xf32>
    %cst_16 = arith.constant dense<0.000000e+00> : vector<64x1024xf32>
    %18 = tpu.matmul %16, %17, %cst_16 {dimension_numbers = #tpu.dot_dimension_numbers<[1], [0], [0], [1], [0, 0, 1, 1], [], []>} : vector<64x128xf32>, vector<128x1024xf32>, vector<64x1024xf32> -> vector<64x1024xf32>
    %c0_17 = arith.constant 0 : index
    %c0_18 = arith.constant 0 : index
    %19 = vector.load %arg8[%c0_17, %c0_18] : memref<1x1024xf32, #tpu.memory_space<vmem>>, vector<1x1024xf32>
    %20 = vector.broadcast %19 : vector<1x1024xf32> to vector<64x1024xf32>
    %21 = arith.addf %18, %20 : vector<64x1024xf32>
    %cst_19 = arith.constant dense<0xFF800000> : vector<1024xf32>
    %22 = vector.multi_reduction <maximumf>, %21, %cst_19 [0] : vector<64x1024xf32> to vector<1024xf32>
    %23 = vector.shape_cast %22 : vector<1024xf32> to vector<1x1024xf32>
    %c0_i32 = arith.constant 0 : i32
    %24 = arith.cmpi eq, %arg1, %c0_i32 : i32
    %25 = arith.extui %24 : i1 to i32
    %c0_i32_20 = arith.constant 0 : i32
    %26 = arith.cmpi ne, %25, %c0_i32_20 : i32
    scf.if %26 {
      %cst_27 = arith.constant 0xFF800000 : f32
      %33 = vector.broadcast %cst_27 : f32 to vector<1x1024xf32>
      %c0_28 = arith.constant 0 : index
      %c0_29 = arith.constant 0 : index
      %c0_30 = arith.constant 0 : index
      %34 = vector.load %arg9[%c0_28, %c0_29, %c0_30] : memref<1x1x1024xf32, #tpu.memory_space<vmem>>, vector<1x1x1024xf32>
      %35 = vector.shape_cast %34 : vector<1x1x1024xf32> to vector<1x1024xf32>
      %36 = vector.shape_cast %33 : vector<1x1024xf32> to vector<1x1x1024xf32>
      tpu.vector_store %arg9[%c0_28, %c0_29, %c0_30], %36 {strides = array<i32>} : memref<1x1x1024xf32, #tpu.memory_space<vmem>>, vector<1x1x1024xf32>,
    } else {
    }
    %c0_21 = arith.constant 0 : index
    %c0_22 = arith.constant 0 : index
    %c0_23 = arith.constant 0 : index
    %27 = vector.load %arg9[%c0_21, %c0_22, %c0_23] : memref<1x1x1024xf32, #tpu.memory_space<vmem>>, vector<1x1x1024xf32>
    %28 = vector.shape_cast %27 : vector<1x1x1024xf32> to vector<1x1024xf32>
    %29 = arith.maximumf %28, %23 : vector<1x1024xf32>
    %c0_24 = arith.constant 0 : index
    %c0_25 = arith.constant 0 : index
    %c0_26 = arith.constant 0 : index
    %30 = vector.load %arg9[%c0_24, %c0_25, %c0_26] : memref<1x1x1024xf32, #tpu.memory_space<vmem>>, vector<1x1x1024xf32>
    %31 = vector.shape_cast %30 : vector<1x1x1024xf32> to vector<1x1024xf32>
    %32 = vector.shape_cast %29 : vector<1x1024xf32> to vector<1x1x1024xf32>
    tpu.vector_store %arg9[%c0_24, %c0_25, %c0_26], %32 {strides = array<i32>} : memref<1x1x1024xf32, #tpu.memory_space<vmem>>, vector<1x1x1024xf32>,
    return
  }
  func.func @transform_0(%arg0: i32, %arg1: i32) -> (i32, i32, i32) {
    %c0_i32 = arith.constant 0 : i32
    %c0_i32_0 = arith.constant 0 : i32
    return %arg0, %arg1, %c0_i32 : i32, i32, i32
  }
  func.func @transform_1(%arg0: i32, %arg1: i32) -> (i32, i32, i32) {
    %c0_i32 = arith.constant 0 : i32
    %c0_i32_0 = arith.constant 0 : i32
    %c0_i32_1 = arith.constant 0 : i32
    return %arg0, %c0_i32, %c0_i32_0 : i32, i32, i32
  }
  func.func @transform_2(%arg0: i32, %arg1: i32) -> (i32, i32) {
    %c0_i32 = arith.constant 0 : i32
    %c0_i32_0 = arith.constant 0 : i32
    %c0_i32_1 = arith.constant 0 : i32
    return %c0_i32, %c0_i32_0 : i32, i32
  }
  func.func @transform_3(%arg0: i32, %arg1: i32) -> (i32, i32) {
    %c0_i32 = arith.constant 0 : i32
    %c0_i32_0 = arith.constant 0 : i32
    %c0_i32_1 = arith.constant 0 : i32
    return %c0_i32, %c0_i32_0 : i32, i32
  }
  func.func @transform_4(%arg0: i32, %arg1: i32) -> (i32, i32) {
    %c0_i32 = arith.constant 0 : i32
    %c0_i32_0 = arith.constant 0 : i32
    %c0_i32_1 = arith.constant 0 : i32
    return %c0_i32, %c0_i32_0 : i32, i32
  }
  func.func @transform_5(%arg0: i32, %arg1: i32) -> (i32, i32) {
    %c0_i32 = arith.constant 0 : i32
    %c0_i32_0 = arith.constant 0 : i32
    %c0_i32_1 = arith.constant 0 : i32
    return %c0_i32, %c0_i32_0 : i32, i32
  }
  func.func @transform_6(%arg0: i32, %arg1: i32) -> (i32, i32) {
    %c0_i32 = arith.constant 0 : i32
    %c0_i32_0 = arith.constant 0 : i32
    %c0_i32_1 = arith.constant 0 : i32
    return %c0_i32, %c0_i32_0 : i32, i32
  }
  func.func @transform_7(%arg0: i32, %arg1: i32) -> (i32, i32, i32) {
    %c0_i32 = arith.constant 0 : i32
    %c0_i32_0 = arith.constant 0 : i32
    %c0_i32_1 = arith.constant 0 : i32
    return %arg0, %c0_i32, %c0_i32_0 : i32, i32, i32
  }
}

module attributes {stable_mosaic.version = 11 : i64} {
  func.func @_head_kernel(%arg0: i32, %arg1: i32, %arg2: memref<1x64x3xf32, #tpu.memory_space<vmem>>, %arg3: memref<1x3x64xf32, #tpu.memory_space<vmem>>, %arg4: memref<1x64xf32, #tpu.memory_space<vmem>>, %arg5: memref<1x1x512xf32, #tpu.memory_space<vmem>>, %arg6: memref<64x512xf32, #tpu.memory_space<vmem>>, %arg7: memref<512x256xf32, #tpu.memory_space<vmem>>, %arg8: memref<1x256xf32, #tpu.memory_space<vmem>>, %arg9: memref<256x128xf32, #tpu.memory_space<vmem>>, %arg10: memref<1x128xf32, #tpu.memory_space<vmem>>, %arg11: memref<1x64x128xf32, #tpu.memory_space<vmem>>) attributes {dimension_semantics = [#tpu.dimension_semantics<parallel>, #tpu.dimension_semantics<parallel>], iteration_bounds = array<i64: 2, 1>, scalar_prefetch = 0 : i64, scratch_operands = 0 : i64, tpu.core_type = #tpu.core_type<tc>, window_params = [{transform_indices = @transform_0, window_bounds = array<i64: 1, 64, 3>}, {transform_indices = @transform_1, window_bounds = array<i64: 1, 3, 64>}, {pipeline_mode = #tpu.pipeline_mode<synchronous>, transform_indices = @transform_2, window_bounds = array<i64: 1, 64>}, {transform_indices = @transform_3, window_bounds = array<i64: 1, 1, 512>}, {pipeline_mode = #tpu.pipeline_mode<synchronous>, transform_indices = @transform_4, window_bounds = array<i64: 64, 512>}, {pipeline_mode = #tpu.pipeline_mode<synchronous>, transform_indices = @transform_5, window_bounds = array<i64: 512, 256>}, {pipeline_mode = #tpu.pipeline_mode<synchronous>, transform_indices = @transform_6, window_bounds = array<i64: 1, 256>}, {pipeline_mode = #tpu.pipeline_mode<synchronous>, transform_indices = @transform_7, window_bounds = array<i64: 256, 128>}, {pipeline_mode = #tpu.pipeline_mode<synchronous>, transform_indices = @transform_8, window_bounds = array<i64: 1, 128>}, {transform_indices = @transform_9, window_bounds = array<i64: 1, 64, 128>}]} {
    %c0 = arith.constant 0 : index
    %c0_0 = arith.constant 0 : index
    %c0_1 = arith.constant 0 : index
    %0 = vector.load %arg2[%c0, %c0_0, %c0_1] : memref<1x64x3xf32, #tpu.memory_space<vmem>>, vector<1x64x3xf32>
    %1 = vector.shape_cast %0 : vector<1x64x3xf32> to vector<64x3xf32>
    %c0_2 = arith.constant 0 : index
    %c0_3 = arith.constant 0 : index
    %c0_4 = arith.constant 0 : index
    %2 = vector.load %arg3[%c0_2, %c0_3, %c0_4] : memref<1x3x64xf32, #tpu.memory_space<vmem>>, vector<1x3x64xf32>
    %3 = vector.shape_cast %2 : vector<1x3x64xf32> to vector<3x64xf32>
    %cst = arith.constant dense<0.000000e+00> : vector<64x64xf32>
    %4 = tpu.matmul %1, %3, %cst {dimension_numbers = #tpu.dot_dimension_numbers<[1], [0], [0], [1], [0, 0, 1, 1], [], []>} : vector<64x3xf32>, vector<3x64xf32>, vector<64x64xf32> -> vector<64x64xf32>
    %c0_5 = arith.constant 0 : index
    %c0_6 = arith.constant 0 : index
    %5 = vector.load %arg4[%c0_5, %c0_6] : memref<1x64xf32, #tpu.memory_space<vmem>>, vector<1x64xf32>
    %6 = vector.broadcast %5 : vector<1x64xf32> to vector<64x64xf32>
    %7 = arith.addf %4, %6 : vector<64x64xf32>
    %cst_7 = arith.constant 0.000000e+00 : f32
    %8 = vector.broadcast %cst_7 : f32 to vector<64x64xf32>
    %9 = arith.maximumf %7, %8 : vector<64x64xf32>
    %c0_8 = arith.constant 0 : index
    %c0_9 = arith.constant 0 : index
    %10 = vector.load %arg6[%c0_8, %c0_9] : memref<64x512xf32, #tpu.memory_space<vmem>>, vector<64x512xf32>
    %cst_10 = arith.constant dense<0.000000e+00> : vector<64x512xf32>
    %11 = tpu.matmul %9, %10, %cst_10 {dimension_numbers = #tpu.dot_dimension_numbers<[1], [0], [0], [1], [0, 0, 1, 1], [], []>} : vector<64x64xf32>, vector<64x512xf32>, vector<64x512xf32> -> vector<64x512xf32>
    %c0_11 = arith.constant 0 : index
    %c0_12 = arith.constant 0 : index
    %c0_13 = arith.constant 0 : index
    %12 = vector.load %arg5[%c0_11, %c0_12, %c0_13] : memref<1x1x512xf32, #tpu.memory_space<vmem>>, vector<1x1x512xf32>
    %13 = vector.shape_cast %12 : vector<1x1x512xf32> to vector<1x512xf32>
    %14 = vector.broadcast %13 : vector<1x512xf32> to vector<64x512xf32>
    %15 = arith.addf %11, %14 : vector<64x512xf32>
    %cst_14 = arith.constant 0.000000e+00 : f32
    %16 = vector.broadcast %cst_14 : f32 to vector<64x512xf32>
    %17 = arith.maximumf %15, %16 : vector<64x512xf32>
    %c0_15 = arith.constant 0 : index
    %c0_16 = arith.constant 0 : index
    %18 = vector.load %arg7[%c0_15, %c0_16] : memref<512x256xf32, #tpu.memory_space<vmem>>, vector<512x256xf32>
    %cst_17 = arith.constant dense<0.000000e+00> : vector<64x256xf32>
    %19 = tpu.matmul %17, %18, %cst_17 {dimension_numbers = #tpu.dot_dimension_numbers<[1], [0], [0], [1], [0, 0, 1, 1], [], []>} : vector<64x512xf32>, vector<512x256xf32>, vector<64x256xf32> -> vector<64x256xf32>
    %c0_18 = arith.constant 0 : index
    %c0_19 = arith.constant 0 : index
    %20 = vector.load %arg8[%c0_18, %c0_19] : memref<1x256xf32, #tpu.memory_space<vmem>>, vector<1x256xf32>
    %21 = vector.broadcast %20 : vector<1x256xf32> to vector<64x256xf32>
    %22 = arith.addf %19, %21 : vector<64x256xf32>
    %cst_20 = arith.constant 0.000000e+00 : f32
    %23 = vector.broadcast %cst_20 : f32 to vector<64x256xf32>
    %24 = arith.maximumf %22, %23 : vector<64x256xf32>
    %c0_21 = arith.constant 0 : index
    %c0_22 = arith.constant 0 : index
    %25 = vector.load %arg9[%c0_21, %c0_22] : memref<256x128xf32, #tpu.memory_space<vmem>>, vector<256x128xf32>
    %cst_23 = arith.constant dense<0.000000e+00> : vector<64x128xf32>
    %26 = tpu.matmul %24, %25, %cst_23 {dimension_numbers = #tpu.dot_dimension_numbers<[1], [0], [0], [1], [0, 0, 1, 1], [], []>} : vector<64x256xf32>, vector<256x128xf32>, vector<64x128xf32> -> vector<64x128xf32>
    %c0_24 = arith.constant 0 : index
    %c0_25 = arith.constant 0 : index
    %27 = vector.load %arg10[%c0_24, %c0_25] : memref<1x128xf32, #tpu.memory_space<vmem>>, vector<1x128xf32>
    %28 = vector.broadcast %27 : vector<1x128xf32> to vector<64x128xf32>
    %29 = arith.addf %26, %28 : vector<64x128xf32>
    %c0_26 = arith.constant 0 : index
    %c0_27 = arith.constant 0 : index
    %c0_28 = arith.constant 0 : index
    %30 = vector.load %arg11[%c0_26, %c0_27, %c0_28] : memref<1x64x128xf32, #tpu.memory_space<vmem>>, vector<1x64x128xf32>
    %31 = vector.shape_cast %30 : vector<1x64x128xf32> to vector<64x128xf32>
    %32 = vector.shape_cast %29 : vector<64x128xf32> to vector<1x64x128xf32>
    tpu.vector_store %arg11[%c0_26, %c0_27, %c0_28], %32 {strides = array<i32>} : memref<1x64x128xf32, #tpu.memory_space<vmem>>, vector<1x64x128xf32>,
    return
  }
  func.func @transform_0(%arg0: i32, %arg1: i32) -> (i32, i32, i32) {
    %c0_i32 = arith.constant 0 : i32
    %c0_i32_0 = arith.constant 0 : i32
    return %arg0, %arg1, %c0_i32 : i32, i32, i32
  }
  func.func @transform_1(%arg0: i32, %arg1: i32) -> (i32, i32, i32) {
    %c0_i32 = arith.constant 0 : i32
    %c0_i32_0 = arith.constant 0 : i32
    %c0_i32_1 = arith.constant 0 : i32
    return %arg0, %c0_i32, %c0_i32_0 : i32, i32, i32
  }
  func.func @transform_2(%arg0: i32, %arg1: i32) -> (i32, i32) {
    %c0_i32 = arith.constant 0 : i32
    %c0_i32_0 = arith.constant 0 : i32
    %c0_i32_1 = arith.constant 0 : i32
    return %c0_i32, %c0_i32_0 : i32, i32
  }
  func.func @transform_3(%arg0: i32, %arg1: i32) -> (i32, i32, i32) {
    %c0_i32 = arith.constant 0 : i32
    %c0_i32_0 = arith.constant 0 : i32
    %c0_i32_1 = arith.constant 0 : i32
    return %arg0, %c0_i32, %c0_i32_0 : i32, i32, i32
  }
  func.func @transform_4(%arg0: i32, %arg1: i32) -> (i32, i32) {
    %c0_i32 = arith.constant 0 : i32
    %c0_i32_0 = arith.constant 0 : i32
    %c0_i32_1 = arith.constant 0 : i32
    return %c0_i32, %c0_i32_0 : i32, i32
  }
  func.func @transform_5(%arg0: i32, %arg1: i32) -> (i32, i32) {
    %c0_i32 = arith.constant 0 : i32
    %c0_i32_0 = arith.constant 0 : i32
    %c0_i32_1 = arith.constant 0 : i32
    return %c0_i32, %c0_i32_0 : i32, i32
  }
  func.func @transform_6(%arg0: i32, %arg1: i32) -> (i32, i32) {
    %c0_i32 = arith.constant 0 : i32
    %c0_i32_0 = arith.constant 0 : i32
    %c0_i32_1 = arith.constant 0 : i32
    return %c0_i32, %c0_i32_0 : i32, i32
  }
  func.func @transform_7(%arg0: i32, %arg1: i32) -> (i32, i32) {
    %c0_i32 = arith.constant 0 : i32
    %c0_i32_0 = arith.constant 0 : i32
    %c0_i32_1 = arith.constant 0 : i32
    return %c0_i32, %c0_i32_0 : i32, i32
  }
  func.func @transform_8(%arg0: i32, %arg1: i32) -> (i32, i32) {
    %c0_i32 = arith.constant 0 : i32
    %c0_i32_0 = arith.constant 0 : i32
    %c0_i32_1 = arith.constant 0 : i32
    return %c0_i32, %c0_i32_0 : i32, i32
  }
  func.func @transform_9(%arg0: i32, %arg1: i32) -> (i32, i32, i32) {
    %c0_i32 = arith.constant 0 : i32
    %c0_i32_0 = arith.constant 0 : i32
    return %arg0, %arg1, %c0_i32 : i32, i32, i32
  }
}

</mosaic_0001>

<bundles_post_ra>
// kernel: point_estimation_forward.3
= control target key start
LH: loop header
LB: loop body
LE: loop exit
PB: predicated region body
PF: predicated region fallthrough
CT: control target
= control target key end

     0   :  { %s1889_s24 = smov 0   ;;  %s1891_s25 = smov 0   ;;  %s2642_s0 = inlined_call_operand.vmem [shape: f32[2,64,3], index: 0, kind: input, shape index: {}]   ;;  %s2643_s1 = inlined_call_operand.vmem [shape: f32[3,64], index: 1, kind: input, shape index: {}]   ;;  %s2644_s2 = inlined_call_operand.vmem [shape: f32[1,64], index: 2, kind: input, shape index: {}]   ;;  %s2645_s3 = inlined_call_operand.vmem [shape: f32[64,128], index: 3, kind: input, shape index: {}]   ;;  %s2646_s4 = inlined_call_operand.vmem [shape: f32[1,128], index: 4, kind: input, shape index: {}]   ;;  %s2647_s5 = inlined_call_operand.vmem [shape: f32[128,1024], index: 5, kind: input, shape index: {}]   ;;  %s2648_s6 = inlined_call_operand.vmem [shape: f32[1,1024], index: 6, kind: input, shape index: {}]   ;;  %s2649_s7 = inlined_call_operand.vmem [shape: f32[2,1,1024], index: 7, kind: output, shape index: {}]  }
   0x1   :  { %s1893_s26 = smov 0  }
   0x2 LB: > { %s29_s27 = sadd.s32 1, %s1841_s25  ;;  %p1543_p0 = scmp.ge.s32.totalorder %s1845_s26, 1  ;;  %s1845_s26 = sphi %s1893_s26, %s17_s26   ;;  %s1841_s25 = sphi %s1891_s25, %s2651_s25   ;;  %s1837_s24 = sphi %s1889_s24, %s2650_s24  }
   0x3   : > { %p31_p1 = scmp.ge.s32.totalorder %s29_s27, 2  ;;  %p256_p2 = scmp.lt.s32.totalorder %s1845_s26, 3 }
   0x5   : > { %s2653_s27 = smov (%p31_p1, %s29_s27), 0  ;;  %p257_p3 = pnand %p1543_p0, %p256_p2 }
   0x6   : > { %v313_v0 = vld [vmem:[%s2643_s1] sm:$0x7] (!%p257_p3)  ;;  %vm346_vm0 = vcmask (!%p257_p3), 1042432   ;;  %p292_p4 = scmp.lt.s32.totalorder (!%p257_p3), %s1837_s24, 1  ;;  %v464_v2 = vld [vmem:[%s2645_s3 + $0x8] sm:$0xff] (!%p257_p3)  ;;  %v465_v3 = vld [vmem:[%s2645_s3 + $0x10] sm:$0xff] (!%p257_p3) }
   0x7   : > { %260 = sbr.rel (%p257_p3) target bundleno = 772 (0x304), region = 48  ;;  %1594 = vmatprep.subr.msk.mxu0 (!%p257_p3), %vm346_vm0, %v313_v0  ;;  %v463_v1 = vld [vmem:[%s2645_s3] sm:$0xff] (!%p257_p3)  ;;  %v466_v5 = vld [vmem:[%s2645_s3 + $0x18] sm:$0xff] (!%p257_p3)  ;;  %v468_v8 = vld [vmem:[%s2645_s3 + $0x28] sm:$0xff] (!%p257_p3)  ;;  %vm321_vm1 = vcmask (!%p257_p3), 23552   ;;  %vm478_vm2 = vcmask (!%p257_p3), 523264  }
   0x8   : > { %1595 = vmatpush3.msk.msra.mxu0 (!%p257_p3), %vm346_vm0, %v313_v0  ;;  %v1636_v4 = vpack.c.bf16 (!%p257_p3), %v464_v2, %v463_v1  ;;  %v1640_v6 = vpack.c.bf16 (!%p257_p3), %v466_v5, %v465_v3  ;;  %v467_v7 = vld [vmem:[%s2645_s3 + $0x20] sm:$0xff] (!%p257_p3)  ;;  %v469_v18 = vld [vmem:[%s2645_s3 + $0x30] sm:$0xff] (!%p257_p3)  ;;  %v470_v19 = vld [vmem:[%s2645_s3 + $0x38] sm:$0xff] (!%p257_p3) }
   0x9   : > { %v1644_v12 = vpack.c.bf16 (!%p257_p3), %v468_v8, %v467_v7  ;;  %v1648_v20 = vpack.c.bf16 (!%p257_p3), %v470_v19, %v469_v18  ;;  %v617_v21 = vld [vmem:[%s2647_s5 + $0x8] sm:$0xff] (!%p257_p3)  ;;  %v616_v23 = vld [vmem:[%s2647_s5] sm:$0xff] (!%p257_p3)  ;;  %v619_v26 = vld [vmem:[%s2647_s5 + $0x18] sm:$0xff] (!%p257_p3) }
   0xa   : > { %1637 = vmatprep.subr.bf16.mxu1 (!%p257_p3), %v1636_v4  ;;  %v625_v22 = vld [vmem:[%s2647_s5 + $0x48] sm:$0xff] (!%p257_p3)  ;;  %v624_v25 = vld [vmem:[%s2647_s5 + $0x40] sm:$0xff] (!%p257_p3)  ;;  %v627_v27 = vld [vmem:[%s2647_s5 + $0x58] sm:$0xff] (!%p257_p3) }
   0xb   : > { %1639 = vmatpush3.bf16.msra.mxu1 (!%p257_p3), %v1636_v4  ;;  %v1652_v24 = vpack.c.bf16 (!%p257_p3), %v625_v22, %v617_v21  ;;  %v1654_v28 = vpack.c.bf16 (!%p257_p3), %v624_v25, %v616_v23  ;;  %v1684_v29 = vpack.c.bf16 (!%p257_p3), %v627_v27, %v619_v26  ;;  %v633_v30 = vld [vmem:[%s2647_s5 + $0x88] sm:$0xff] (!%p257_p3)  ;;  %v632_v32 = vld [vmem:[%s2647_s5 + $0x80] sm:$0xff] (!%p257_p3)  ;;  %v626_v7 = vld [vmem:[%s2647_s5 + $0x50] sm:$0xff] (!%p257_p3) }
   0xc   : > { %1641 = vmatprep.subr.bf16.mxu1 (!%p257_p3), %v1640_v6  ;;  %v641_v31 = vld [vmem:[%s2647_s5 + $0xc8] sm:$0xff] (!%p257_p3)  ;;  %v640_v33 = vld [vmem:[%s2647_s5 + $0xc0] sm:$0xff] (!%p257_p3)  ;;  %v634_v18 = vld [vmem:[%s2647_s5 + $0x90] sm:$0xff] (!%p257_p3) }
   0xd   : > { %1653 = vmatprep.subr.bf16.mxu0 (!%p257_p3), %v1652_v24  ;;  %v1656_v34 = vpack.c.bf16 (!%p257_p3), %v641_v31, %v633_v30  ;;  %v1658_v35 = vpack.c.bf16 (!%p257_p3), %v640_v33, %v632_v32  ;;  %v649_v36 = vld [vmem:[%s2647_s5 + $0x108] sm:$0xff] (!%p257_p3)  ;;  %v648_v39 = vld [vmem:[%s2647_s5 + $0x100] sm:$0xff] (!%p257_p3)  ;;  %v642_v19 = vld [vmem:[%s2647_s5 + $0xd0] sm:$0xff] (!%p257_p3) }
   0xe   : > { %s2655_s24 = smov (!%p292_p4, %s1837_s24), 1  ;;  %v657_v37 = vld [vmem:[%s2647_s5 + $0x148] sm:$0xff]  ;;  %v656_v40 = vld [vmem:[%s2647_s5 + $0x140] sm:$0xff]  ;;  %v651_v21 = vld [vmem:[%s2647_s5 + $0x118] sm:$0xff]  ;;  %v1690_v26 = vpack.c.bf16 %v642_v19, %v634_v18  ;;  %v1847_v19 = vmov 0.0  }
   0xf   : > { %s1568_s19 = sshll.u32 %s2655_s24, 6  ;;  %1643 = vmatpush3.bf16.msra.mxu1 %v1640_v6  ;;  %v1660_v38 = vpack.c.bf16 %v657_v37, %v649_v36  ;;  %v1662_v41 = vpack.c.bf16 %v656_v40, %v648_v39  ;;  %v665_v42 = vld [vmem:[%s2647_s5 + $0x188] sm:$0xff]  ;;  %v664_v45 = vld [vmem:[%s2647_s5 + $0x180] sm:$0xff]  ;;  %v618_v6 = vld [vmem:[%s2647_s5 + $0x10] sm:$0xff]  ;;  %s1546_s23 = sshll.u32 %s2655_s24, 3 }
  0x10   : > { %s299_s22 = scalar_lea.vmem %s2642_s0, %s1568_s19  ;;  %1645 = vmatprep.subr.bf16.mxu1 %v1644_v12  ;;  %v673_v43 = vld [vmem:[%s2647_s5 + $0x1c8] sm:$0xff]  ;;  %v672_v46 = vld [vmem:[%s2647_s5 + $0x1c0] sm:$0xff]  ;;  %v659_v22 = vld [vmem:[%s2647_s5 + $0x158] sm:$0xff]  ;;  %s304_s30 = scalar_lea.vmem %s2649_s7, %s1546_s23 }
  0x11   : > { %v305_v9 = vld [vmem:[%s299_s22] sm:$0xff]  ;;  %v306_v10 = vld [vmem:[%s299_s22 + $0x8] sm:$0xff]  ;;  %v307_v11 = vld [vmem:[%s299_s22 + $0x10] sm:$0xff]  ;;  %v1664_v44 = vpack.c.bf16 %v673_v43, %v665_v42  ;;  %v1666_v49 = vpack.c.bf16 %v672_v46, %v664_v45 }
  0x12   : > { %1596 = vmatprep.mubr.msk.f32.mxu0 %vm321_vm1, %v305_v9  ;;  %v308_v13 = vld [vmem:[%s299_s22 + $0x18] sm:$0xff]  ;;  %v309_v14 = vld [vmem:[%s299_s22 + $0x20] sm:$0xff]  ;;  %v310_v15 = vld [vmem:[%s299_s22 + $0x28] sm:$0xff] }
  0x13   : > { %1597 = vmatmul.mubr.msk.f32.vlgmr.msra.gmra.mrb[0].mxu0 %vm321_vm1, %v306_v10  ;;  %1647 = vmatpush3.bf16.msra.mxu1 %v1644_v12  ;;  %v311_v16 = vld [vmem:[%s299_s22 + $0x30] sm:$0xff]  ;;  %v312_v17 = vld [vmem:[%s299_s22 + $0x38] sm:$0xff]  ;;  %v681_v47 = vld [vmem:[%s2647_s5 + $0x208] sm:$0xff] }
  0x14   : > { %1599 = vmatprep.mubr.msk.f32.mxu0 %vm321_vm1, %v307_v11  ;;  %1649 = vmatprep.subr.bf16.mxu1 %v1648_v20  ;;  %v689_v48 = vld [vmem:[%s2647_s5 + $0x248] sm:$0xff]  ;;  %v680_v51 = vld [vmem:[%s2647_s5 + $0x200] sm:$0xff]  ;;  %v635_v9 = vld [vmem:[%s2647_s5 + $0x98] sm:$0xff] }
  0x15   : > { %1655 = vmatpush1.bf16.msra.mxu0 %v1654_v28  ;;  %v1668_v50 = vpack.c.bf16 %v689_v48, %v681_v47  ;;  %v688_v52 = vld [vmem:[%s2647_s5 + $0x240] sm:$0xff]  ;;  %v697_v53 = vld [vmem:[%s2647_s5 + $0x288] sm:$0xff]  ;;  %v643_v10 = vld [vmem:[%s2647_s5 + $0xd8] sm:$0xff] }
  0x16   : > { %1657 = vmatprep.subr.bf16.mxu0 %v1656_v34  ;;  %v705_v54 = vld [vmem:[%s2647_s5 + $0x2c8] sm:$0xff]  ;;  %v1670_v55 = vpack.c.bf16 %v688_v52, %v680_v51  ;;  %v696_v57 = vld [vmem:[%s2647_s5 + $0x280] sm:$0xff]  ;;  %v650_v30 = vld [vmem:[%s2647_s5 + $0x110] sm:$0xff] }
  0x17   : > { %1600 = vmatmul.mubr.msk.f32.gmra.mrb[2].mxu0 %vm321_vm1, %v308_v13  ;;  %1651 = vmatpush3.bf16.msra.mxu1 %v1648_v20  ;;  %v1672_v56 = vpack.c.bf16 %v705_v54, %v697_v53  ;;  %v704_v58 = vld [vmem:[%s2647_s5 + $0x2c0] sm:$0xff]  ;;  %v713_v59 = vld [vmem:[%s2647_s5 + $0x308] sm:$0xff]  ;;  %v1686_v13 = vpack.c.bf16 %v626_v7, %v618_v6  ;;  %v658_v31 = vld [vmem:[%s2647_s5 + $0x150] sm:$0xff] }
  0x18   : > { %1602 = vmatprep.mubr.msk.f32.mxu0 %vm321_vm1, %v309_v14  ;;  %1685 = vmatprep.subr.bf16.mxu1 %v1684_v29  ;;  %v721_v60 = vld [vmem:[%s2647_s5 + $0x348] sm:$0xff]  ;;  %v1674_v61 = vpack.c.bf16 %v704_v58, %v696_v57  ;;  %v712_v63 = vld [vmem:[%s2647_s5 + $0x300] sm:$0xff]  ;;  %v1692_v29 = vpack.c.bf16 %v659_v22, %v651_v21  ;;  %v667_v33 = vld [vmem:[%s2647_s5 + $0x198] sm:$0xff] }
  0x19   : > { %1659 = vmatpush1.bf16.msra.mxu0 %v1658_v35  ;;  %v1676_v62 = vpack.c.bf16 %v721_v60, %v713_v59  ;;  %v720_v0 = vld [vmem:[%s2647_s5 + $0x340] sm:$0xff]  ;;  %v675_v34 = vld [vmem:[%s2647_s5 + $0x1d8] sm:$0xff]  ;;  %v666_v42 = vld [vmem:[%s2647_s5 + $0x190] sm:$0xff] }
  0x1a   : > { %1661 = vmatprep.subr.bf16.mxu0 %v1660_v38  ;;  %v1678_v1 = vpack.c.bf16 %v720_v0, %v712_v63  ;;  %v1547_v2 = vld [vmem:[%s2644_s2] ss:$0 sm:$0xff]  ;;  %v1694_v38 = vpack.c.bf16 %v658_v31, %v650_v30  ;;  %v674_v43 = vld [vmem:[%s2647_s5 + $0x1d0] sm:$0xff]  ;;  %v683_v45 = vld [vmem:[%s2647_s5 + $0x218] sm:$0xff] }
  0x1b   : > { %1603 = vmatmul.mubr.msk.f32.gmra.mrb[4].mxu0 %vm321_vm1, %v310_v15  ;;  %v691_v46 = vld [vmem:[%s2647_s5 + $0x258] sm:$0xff]  ;;  %v682_v51 = vld [vmem:[%s2647_s5 + $0x210] sm:$0xff]  ;;  %v728_v6 = vld [vmem:[%s2647_s5 + $0x380] sm:$0xff] }
  0x1c   : > { %1605 = vmatprep.mubr.msk.f32.mxu0 %vm321_vm1, %v311_v16  ;;  %v690_v52 = vld [vmem:[%s2647_s5 + $0x250] sm:$0xff]  ;;  %v699_v53 = vld [vmem:[%s2647_s5 + $0x298] sm:$0xff]  ;;  %v736_v7 = vld [vmem:[%s2647_s5 + $0x3c0] sm:$0xff] }
  0x1d   : > { %1663 = vmatpush1.bf16.msra.mxu0 %v1662_v41  ;;  %v1696_v41 = vpack.c.bf16 %v675_v34, %v667_v33  ;;  %v707_v54 = vld [vmem:[%s2647_s5 + $0x2d8] sm:$0xff]  ;;  %v698_v57 = vld [vmem:[%s2647_s5 + $0x290] sm:$0xff]  ;;  %v2171_v21 = vld [vmem:[%s2646_s4] ss:$0 sm:$0xff] }
  0x1e   : > { %1665 = vmatprep.subr.bf16.mxu0 %v1664_v44  ;;  %v706_v58 = vld [vmem:[%s2647_s5 + $0x2d0] sm:$0xff]  ;;  %v715_v59 = vld [vmem:[%s2647_s5 + $0x318] sm:$0xff]  ;;  %v620_v22 = vld [vmem:[%s2647_s5 + $0x20] sm:$0xff] }
  0x1f   : > { %1606 = vmatmul.mubr.msk.f32.gmra.mrb[6].mxu0 %vm321_vm1, %v312_v17  ;;  %v1688_v17 = vpack.c.bf16 %v643_v10, %v635_v9  ;;  %v723_v60 = vld [vmem:[%s2647_s5 + $0x358] sm:$0xff]  ;;  %v714_v63 = vld [vmem:[%s2647_s5 + $0x310] sm:$0xff]  ;;  %v645_v30 = vld [vmem:[%s2647_s5 + $0xe8] sm:$0xff] }
  0x20   : > { %v722_v0 = vld [vmem:[%s2647_s5 + $0x350] sm:$0xff]  ;;  %v739_v9 = vld [vmem:[%s2647_s5 + $0x3d8] sm:$0xff]  ;;  %850 = vmatprep.mubr.f32.mxu0 %v1847_v19 }
  0x21   : > { %1667 = vmatpush1.bf16.msra.mxu0 %v1666_v49  ;;  %v1698_v49 = vpack.c.bf16 %v674_v43, %v666_v42  ;;  %v730_v10 = vld [vmem:[%s2647_s5 + $0x390] sm:$0xff]  ;;  %v631_v18 = vld [vmem:[%s2647_s5 + $0x78] sm:$0xff] }
  0x22   : > { %1669 = vmatprep.subr.bf16.mxu0 %v1668_v50  ;;  %v1700_v50 = vpack.c.bf16 %v691_v46, %v683_v45  ;;  %v639_v31 = vld [vmem:[%s2647_s5 + $0xb8] sm:$0xff]  ;;  %v653_v45 = vld [vmem:[%s2647_s5 + $0x128] sm:$0xff] }
  0x23   : > { %v661_v46 = vld [vmem:[%s2647_s5 + $0x168] sm:$0xff] }
  0x25   : > { %1671 = vmatpush1.bf16.msra.mxu0 %v1670_v55  ;;  %v1702_v55 = vpack.c.bf16 %v690_v52, %v682_v51  ;;  %v652_v51 = vld [vmem:[%s2647_s5 + $0x120] sm:$0xff] }
  0x26   : > { %1673 = vmatprep.subr.bf16.mxu0 %v1672_v56  ;;  %v1704_v56 = vpack.c.bf16 %v707_v54, %v699_v53 }
  0x29   : > { %1675 = vmatpush1.bf16.msra.mxu0 %v1674_v61  ;;  %v1706_v61 = vpack.c.bf16 %v706_v58, %v698_v57  ;;  %v662_v57 = vld [vmem:[%s2647_s5 + $0x170] sm:$0xff]  ;;  %v1724_v58 = vpack.c.bf16 %v661_v46, %v653_v45 }
  0x2a   : > { %1677 = vmatprep.subr.bf16.mxu0 %v1676_v62  ;;  %v1708_v62 = vpack.c.bf16 %v723_v60, %v715_v59 }
  0x2d   : > { %1679 = vmatpush1.bf16.msra.mxu0 %v1678_v1  ;;  %v1710_v1 = vpack.c.bf16 %v722_v0, %v714_v63  ;;  %v671_v63 = vld [vmem:[%s2647_s5 + $0x1b8] sm:$0xff] }
  0x2e   : > { %v679_v0 = vld [vmem:[%s2647_s5 + $0x1f8] sm:$0xff] }
  0xe6   : > { %v1598_v3 = vpop.f32.mrb[0].mxu0 }
  0xe7   : > { %v422_v4 = vadd.f32 %v1598_v3, %v1547_v2  ;;  %v416_v5 = vpop.f32.mrb[1].mxu0  ;;  %v737_v3 = vld [vmem:[%s2647_s5 + $0x3c8] sm:$0xff] }
  0xe8   : > { %v417_v8 = vadd.f32 %v1547_v2, %v416_v5 }
  0xe9   : > { %v456_v14 = vmax.f32 %v422_v4, 0.0  ;;  %v731_v4 = vld [vmem:[%s2647_s5 + $0x398] sm:$0xff] }
  0xea   : > { %v455_v11 = vmax.f32 %v417_v8, 0.0  ;;  %v1601_v12 = vpop.f32.mrb[2].mxu0  ;;  %v1682_v8 = vpack.c.bf16 %v736_v7, %v728_v6  ;;  %v676_v6 = vld [vmem:[%s2647_s5 + $0x1e0] sm:$0xff]  ;;  %v670_v7 = vld [vmem:[%s2647_s5 + $0x1b0] sm:$0xff] }
  0xeb   : > { %v432_v15 = vadd.f32 %v1601_v12, %v1547_v2  ;;  %v426_v16 = vpop.f32.mrb[3].mxu0  ;;  %v1712_v12 = vpack.c.bf16 %v739_v9, %v731_v4 }
  0xec   : > { %v427_v20 = vadd.f32 %v1547_v2, %v426_v16  ;;  %1624 = vmatprep.mubr.msk.f32.mxu1 %vm478_vm2, %v455_v11  ;;  %v738_v11 = vld [vmem:[%s2647_s5 + $0x3d0] sm:$0xff]  ;;  %v623_v16 = vld [vmem:[%s2647_s5 + $0x38] sm:$0xff] }
  0xed   : > { %v458_v23 = vmax.f32 %v432_v15, 0.0  ;;  %1625 = vmatmul.mubr.msk.f32.vlgmr.msra.gmra.mrb[0].mxu1 %vm478_vm2, %v456_v14  ;;  %v621_v14 = vld [vmem:[%s2647_s5 + $0x28] sm:$0xff] }
  0xee   : > { %v457_v24 = vmax.f32 %v427_v20, 0.0  ;;  %v1604_v25 = vpop.f32.mrb[4].mxu0  ;;  %1687 = vmatpush1.bf16.msra.mxu1 %v1686_v13  ;;  %v1714_v13 = vpack.c.bf16 %v738_v11, %v730_v10  ;;  %v629_v15 = vld [vmem:[%s2647_s5 + $0x68] sm:$0xff]  ;;  %v2164_v20 = vpack.c.bf16 %v631_v18, %v623_v16  ;;  %v2293_v11 = vpack.c.bf16 %v679_v0, %v671_v63  ;;  %v695_v16 = vld [vmem:[%s2647_s5 + $0x278] sm:$0xff] }
  0xef   : > { %v442_v27 = vadd.f32 %v1604_v25, %v1547_v2  ;;  %v436_v28 = vpop.f32.mrb[5].mxu0  ;;  %1689 = vmatprep.subr.bf16.mxu1 %v1688_v17  ;;  %v1716_v17 = vpack.c.bf16 %v629_v15, %v621_v14  ;;  %v622_v25 = vld [vmem:[%s2647_s5 + $0x30] sm:$0xff]  ;;  %v693_v14 = vld [vmem:[%s2647_s5 + $0x268] sm:$0xff]  ;;  %v687_v15 = vld [vmem:[%s2647_s5 + $0x238] sm:$0xff] }
  0xf0   : > { %1627 = vmatprep.mubr.msk.f32.mxu1 %vm478_vm2, %v457_v24  ;;  %v437_v32 = vadd.f32 %v1547_v2, %v436_v28  ;;  %v628_v24 = vld [vmem:[%s2647_s5 + $0x60] sm:$0xff]  ;;  %v637_v28 = vld [vmem:[%s2647_s5 + $0xa8] sm:$0xff] }
  0xf1   : > { %1628 = vmatmul.mubr.msk.f32.gmra.mrb[2].mxu1 %vm478_vm2, %v458_v23  ;;  %v460_v35 = vmax.f32 %v442_v27, 0.0  ;;  %v1718_v33 = vpack.c.bf16 %v628_v24, %v620_v22  ;;  %v1720_v43 = vpack.c.bf16 %v645_v30, %v637_v28  ;;  %v684_v22 = vld [vmem:[%s2647_s5 + $0x220] sm:$0xff]  ;;  %v701_v30 = vld [vmem:[%s2647_s5 + $0x2a8] sm:$0xff] }
  0xf2   : > { %v459_v36 = vmax.f32 %v437_v32, 0.0  ;;  %v1607_v37 = vpop.f32.mrb[6].mxu0  ;;  %1691 = vmatpush1.bf16.msra.mxu1 %v1690_v26  ;;  %v630_v26 = vld [vmem:[%s2647_s5 + $0x70] sm:$0xff]  ;;  %v647_v32 = vld [vmem:[%s2647_s5 + $0xf8] sm:$0xff]  ;;  %v733_v0 = vld [vmem:[%s2647_s5 + $0x3a8] sm:$0xff] }
  0xf3   : > { %v452_v39 = vadd.f32 %v1607_v37, %v1547_v2  ;;  %v446_v40 = vpop.f32.mrb[7].mxu0  ;;  %1693 = vmatprep.subr.bf16.mxu1 %v1692_v29  ;;  %v2198_v34 = vpack.c.bf16 %v630_v26, %v622_v25  ;;  %v692_v25 = vld [vmem:[%s2647_s5 + $0x260] sm:$0xff]  ;;  %v686_v26 = vld [vmem:[%s2647_s5 + $0x230] sm:$0xff] }
  0xf4   : > { %1630 = vmatprep.mubr.msk.f32.mxu1 %vm478_vm2, %v459_v36  ;;  %v447_v44 = vadd.f32 %v1547_v2, %v446_v40  ;;  %v729_v2 = vld [vmem:[%s2647_s5 + $0x388] sm:$0xff]  ;;  %v638_v40 = vld [vmem:[%s2647_s5 + $0xb0] sm:$0xff] }
  0xf5   : > { %1631 = vmatmul.mubr.msk.f32.gmra.mrb[4].mxu1 %vm478_vm2, %v460_v35  ;;  %v462_v47 = vmax.f32 %v452_v39, 0.0  ;;  %v1680_v5 = vpack.c.bf16 %v737_v3, %v729_v2  ;;  %v636_v35 = vld [vmem:[%s2647_s5 + $0xa0] sm:$0xff] }
  0xf6   : > { %v461_v48 = vmax.f32 %v447_v44, 0.0  ;;  %1695 = vmatpush1.bf16.msra.mxu1 %v1694_v38  ;;  %v644_v39 = vld [vmem:[%s2647_s5 + $0xe0] sm:$0xff]  ;;  %v2215_v44 = vpack.c.bf16 %v647_v32, %v639_v31  ;;  %v709_v31 = vld [vmem:[%s2647_s5 + $0x2e8] sm:$0xff]  ;;  %v703_v32 = vld [vmem:[%s2647_s5 + $0x2b8] sm:$0xff] }
  0xf7   : > { %1697 = vmatprep.subr.bf16.mxu1 %v1696_v41  ;;  %1681 = vmatprep.subr.bf16.mxu0 %v1680_v5  ;;  %v646_v41 = vld [vmem:[%s2647_s5 + $0xf0] sm:$0xff]  ;;  %v668_v3 = vld [vmem:[%s2647_s5 + $0x1a0] sm:$0xff]  ;;  %v1736_v45 = vpack.c.bf16 %v709_v31, %v701_v30 }
  0xf8   : > { %1633 = vmatprep.mubr.msk.f32.mxu1 %vm478_vm2, %v461_v48  ;;  %1683 = vmatpush1.bf16.msra.mxu0 %v1682_v8  ;;  %v663_v48 = vld [vmem:[%s2647_s5 + $0x178] sm:$0xff]  ;;  %v678_v8 = vld [vmem:[%s2647_s5 + $0x1f0] sm:$0xff] }
  0xf9   : > { %1634 = vmatmul.mubr.msk.f32.gmra.mrb[6].mxu1 %vm478_vm2, %v462_v47  ;;  %1717 = vmatprep.subr.bf16.mxu0 %v1716_v17  ;;  %v655_v47 = vld [vmem:[%s2647_s5 + $0x138] sm:$0xff]  ;;  %v1730_v17 = vpack.c.bf16 %v676_v6, %v668_v3  ;;  %v2310_v18 = vpack.c.bf16 %v678_v8, %v670_v7  ;;  %v732_v8 = vld [vmem:[%s2647_s5 + $0x3a0] sm:$0xff] }
  0xfa   : > { %1699 = vmatpush1.bf16.msra.mxu1 %v1698_v49  ;;  %963 = vmatprep.mubr.f32.mxu1 %v1847_v19  ;;  %v1722_v49 = vpack.c.bf16 %v644_v39, %v636_v35  ;;  %v2254_v60 = vpack.c.bf16 %v663_v48, %v655_v47  ;;  %v1734_v35 = vpack.c.bf16 %v692_v25, %v684_v22  ;;  %v717_v47 = vld [vmem:[%s2647_s5 + $0x328] sm:$0xff]  ;;  %v735_v3 = vld [vmem:[%s2647_s5 + $0x3b8] sm:$0xff] }
  0xfb   : > { %1701 = vmatprep.subr.bf16.mxu1 %v1700_v50  ;;  %v2232_v50 = vpack.c.bf16 %v646_v41, %v638_v40  ;;  %v708_v41 = vld [vmem:[%s2647_s5 + $0x2e0] sm:$0xff]  ;;  %v725_v48 = vld [vmem:[%s2647_s5 + $0x368] sm:$0xff] }
  0xfe   : > { %1703 = vmatpush1.bf16.msra.mxu1 %v1702_v55  ;;  %v660_v55 = vld [vmem:[%s2647_s5 + $0x160] sm:$0xff] }
  0xff   : > { %1705 = vmatprep.subr.bf16.mxu1 %v1704_v56  ;;  %v654_v56 = vld [vmem:[%s2647_s5 + $0x130] sm:$0xff] }
 0x100   : > { %v2271_v2 = vpack.c.bf16 %v662_v57, %v654_v56 }
 0x102   : > { %1707 = vmatpush1.bf16.msra.mxu1 %v1706_v61  ;;  %v669_v61 = vld [vmem:[%s2647_s5 + $0x1a8] sm:$0xff] }
 0x103   : > { %1709 = vmatprep.subr.bf16.mxu1 %v1708_v62  ;;  %v677_v62 = vld [vmem:[%s2647_s5 + $0x1e8] sm:$0xff] }
 0x104   : > { %v1728_v10 = vpack.c.bf16 %v677_v62, %v669_v61  ;;  %v726_v61 = vld [vmem:[%s2647_s5 + $0x370] sm:$0xff]  ;;  %v1740_v62 = vpack.c.bf16 %v725_v48, %v717_v47 }
 0x106   : > { %1711 = vmatpush1.bf16.msra.mxu1 %v1710_v1  ;;  %v1726_v1 = vpack.c.bf16 %v660_v55, %v652_v51  ;;  %v727_v51 = vld [vmem:[%s2647_s5 + $0x378] sm:$0xff]  ;;  %v716_v55 = vld [vmem:[%s2647_s5 + $0x320] sm:$0xff] }
 0x107   : > { %1713 = vmatprep.subr.bf16.mxu1 %v1712_v12  ;;  %v685_v12 = vld [vmem:[%s2647_s5 + $0x228] sm:$0xff] }
 0x108   : > { %v1732_v28 = vpack.c.bf16 %v693_v14, %v685_v12  ;;  %v734_v14 = vld [vmem:[%s2647_s5 + $0x3b0] sm:$0xff] }
 0x10a   : > { %1715 = vmatpush1.bf16.msra.mxu1 %v1714_v13 }
 0x10b   : > { %1780 = vmatprep.subr.bf16.mxu1 %v2164_v20 }
 0x1c0   : > { %v1626_v23 = vpop.f32.mrb[0].mxu1 }
 0x1c1   : > { %v569_v27 = vpop.f32.mrb[1].mxu1  ;;  %v575_v36 = vadd.f32 %v1626_v23, %v2171_v21 }
 0x1c2   : > { %v570_v29 = vadd.f32 %v2171_v21, %v569_v27  ;;  %v694_v27 = vld [vmem:[%s2647_s5 + $0x270] sm:$0xff] }
 0x1c3   : > { %v2237_v52 = vmax.f32 %v575_v36, 0.0  ;;  %v2347_v36 = vpack.c.bf16 %v694_v27, %v686_v26 }
 0x1c4   : > { %v2204_v37 = vmax.f32 %v570_v29, 0.0  ;;  %v1629_v38 = vpop.f32.mrb[2].mxu1  ;;  %v2330_v29 = vpack.c.bf16 %v695_v16, %v687_v15  ;;  %v742_v15 = vld [vmem:[%s2647_s5 + $0x3f0] sm:$0xff] }
 0x1c5   : > { %v579_v42 = vpop.f32.mrb[3].mxu1  ;;  %v585_v4 = vadd.f32 %v1629_v38, %v2171_v21  ;;  %v700_v38 = vld [vmem:[%s2647_s5 + $0x2a0] sm:$0xff] }
 0x1c6   : > { %851 = vmatmul.mubr.f32.vlgmr.msra.gmra.mrb[8].mxu0 %v2204_v37  ;;  %964 = vmatmul.mubr.f32.vlgmr.msra.gmra.mrb[8].mxu1 %v2204_v37  ;;  %v580_v53 = vadd.f32 %v2171_v21, %v579_v42  ;;  %v702_v42 = vld [vmem:[%s2647_s5 + $0x2b0] sm:$0xff] }
 0x1c7   : > { %1719 = vmatpush1.bf16.msra.mxu0 %v1718_v33  ;;  %1788 = vmatpush1.bf16.msra.mxu1 %v2198_v34  ;;  %v2315_v23 = vmax.f32 %v585_v4, 0.0  ;;  %v711_v33 = vld [vmem:[%s2647_s5 + $0x2f8] sm:$0xff] }
 0x1c8   : > { %856 = vmatprep.mubr.f32.mxu0 %v1847_v19  ;;  %969 = vmatprep.mubr.f32.mxu1 %v1847_v19  ;;  %v2242_v54 = vpop.f32.mrb[4].mxu1  ;;  %v2277_v5 = vmax.f32 %v580_v53, 0.0  ;;  %v2368_v46 = vpack.c.bf16 %v711_v33, %v703_v32  ;;  %v1738_v53 = vpack.c.bf16 %v708_v41, %v700_v38  ;;  %v743_v4 = vld [vmem:[%s2647_s5 + $0x3f8] sm:$0xff] }
 0x1c9   : > { %1721 = vmatprep.subr.bf16.mxu0 %v1720_v43  ;;  %1781 = vmatprep.subr.bf16.mxu1 %v2215_v44  ;;  %v589_v59 = vpop.f32.mrb[5].mxu1  ;;  %v595_v39 = vadd.f32 %v2242_v54, %v2171_v21  ;;  %v710_v43 = vld [vmem:[%s2647_s5 + $0x2f0] sm:$0xff] }
 0x1ca   : > { %857 = vmatmul.mubr.f32.gmra.mrb[10].mxu0 %v2237_v52  ;;  %970 = vmatmul.mubr.f32.gmra.mrb[10].mxu1 %v2237_v52  ;;  %v590_v24 = vadd.f32 %v2171_v21, %v589_v59  ;;  %v2385_v54 = vpack.c.bf16 %v710_v43, %v702_v42  ;;  %v718_v59 = vld [vmem:[%s2647_s5 + $0x330] sm:$0xff] }
 0x1cb   : > { %1723 = vmatpush1.bf16.msra.mxu0 %v1722_v49  ;;  %1789 = vmatpush1.bf16.msra.mxu1 %v2232_v50  ;;  %v719_v49 = vld [vmem:[%s2647_s5 + $0x338] sm:$0xff]  ;;  %v2390_v56 = vmax.f32 %v595_v39, 0.0  ;;  %v2422_v7 = vpack.c.bf16 %v726_v61, %v718_v59 }
 0x1cc   : > { %862 = vmatprep.mubr.f32.mxu0 %v1847_v19  ;;  %975 = vmatprep.mubr.f32.mxu1 %v1847_v19  ;;  %v2290_v9 = vpop.f32.mrb[6].mxu1  ;;  %v2354_v40 = vmax.f32 %v590_v24, 0.0  ;;  %v2405_v63 = vpack.c.bf16 %v727_v51, %v719_v49 }
 0x1cd   : > { %1725 = vmatprep.subr.bf16.mxu0 %v1724_v58  ;;  %1782 = vmatprep.subr.bf16.mxu1 %v2254_v60  ;;  %v599_v13 = vpop.f32.mrb[7].mxu1  ;;  %v724_v58 = vld [vmem:[%s2647_s5 + $0x360] sm:$0xff] }
 0x1ce   : > { %863 = vmatmul.mubr.f32.gmra.mrb[12].mxu0 %v2277_v5  ;;  %976 = vmatmul.mubr.f32.gmra.mrb[12].mxu1 %v2277_v5  ;;  %v600_v57 = vadd.f32 %v2171_v21, %v599_v13  ;;  %v1742_v6 = vpack.c.bf16 %v724_v58, %v716_v55  ;;  %v740_v13 = vld [vmem:[%s2647_s5 + $0x3e0] sm:$0xff] }
 0x1cf   : > { %1727 = vmatpush1.bf16.msra.mxu0 %v1726_v1  ;;  %1790 = vmatpush1.bf16.msra.mxu1 %v2271_v2  ;;  %v741_v1 = vld [vmem:[%s2647_s5 + $0x3e8] sm:$0xff]  ;;  %v1746_v16 = vpack.c.bf16 %v740_v13, %v732_v8 }
 0x1d0   : > { %868 = vmatprep.mubr.f32.mxu0 %v1847_v19  ;;  %981 = vmatprep.mubr.f32.mxu1 %v1847_v19  ;;  %v2429_v12 = vmax.f32 %v600_v57, 0.0 }
 0x1d1   : > { %1729 = vmatprep.subr.bf16.mxu0 %v1728_v10  ;;  %1783 = vmatprep.subr.bf16.mxu1 %v2293_v11  ;;  %v605_v10 = vadd.f32 %v2290_v9, %v2171_v21  ;;  %v1744_v21 = vpack.c.bf16 %v741_v1, %v733_v0  ;;  %v1776_v9 = vpack.c.bf16 %v743_v4, %v735_v3 }
 0x1d2   : > { %869 = vmatmul.mubr.f32.gmra.mrb[14].mxu0 %v2315_v23  ;;  %982 = vmatmul.mubr.f32.gmra.mrb[14].mxu1 %v2315_v23 }
 0x1d3   : > { %1731 = vmatpush1.bf16.msra.mxu0 %v1730_v17  ;;  %1791 = vmatpush1.bf16.msra.mxu1 %v2310_v18  ;;  %v1778_v17 = vpack.c.bf16 %v742_v15, %v734_v14  ;;  %v615_v22 = vmax.f32 %v605_v10, 0.0 }
 0x1d4   : > { %874 = vmatprep.mubr.f32.mxu0 %v1847_v19  ;;  %987 = vmatprep.mubr.f32.mxu1 %v1847_v19 }
 0x1d5   : > { %1733 = vmatprep.subr.bf16.mxu0 %v1732_v28  ;;  %1784 = vmatprep.subr.bf16.mxu1 %v2330_v29 }
 0x1d6   : > { %875 = vmatmul.mubr.f32.gmra.mrb[16].mxu0 %v2354_v40  ;;  %988 = vmatmul.mubr.f32.gmra.mrb[16].mxu1 %v2354_v40 }
 0x1d7   : > { %1735 = vmatpush1.bf16.msra.mxu0 %v1734_v35  ;;  %1792 = vmatpush1.bf16.msra.mxu1 %v2347_v36 }
 0x1d8   : > { %880 = vmatprep.mubr.f32.mxu0 %v1847_v19  ;;  %993 = vmatprep.mubr.f32.mxu1 %v1847_v19 }
 0x1d9   : > { %1737 = vmatprep.subr.bf16.mxu0 %v1736_v45  ;;  %1785 = vmatprep.subr.bf16.mxu1 %v2368_v46 }
 0x1da   : > { %881 = vmatmul.mubr.f32.gmra.mrb[18].mxu0 %v2390_v56  ;;  %994 = vmatmul.mubr.f32.gmra.mrb[18].mxu1 %v2390_v56 }
 0x1db   : > { %1739 = vmatpush1.bf16.msra.mxu0 %v1738_v53  ;;  %1793 = vmatpush1.bf16.msra.mxu1 %v2385_v54 }
 0x1dc   : > { %886 = vmatprep.mubr.f32.mxu0 %v1847_v19  ;;  %999 = vmatprep.mubr.f32.mxu1 %v1847_v19 }
 0x1dd   : > { %1741 = vmatprep.subr.bf16.mxu0 %v1740_v62  ;;  %1786 = vmatprep.subr.bf16.mxu1 %v2405_v63 }
 0x1de   : > { %887 = vmatmul.mubr.f32.gmra.mrb[20].mxu0 %v2429_v12  ;;  %1000 = vmatmul.mubr.f32.gmra.mrb[20].mxu1 %v2429_v12 }
 0x1df   : > { %1743 = vmatpush1.bf16.msra.mxu0 %v1742_v6  ;;  %1794 = vmatpush1.bf16.msra.mxu1 %v2422_v7 }
 0x1e0   : > { %892 = vmatprep.mubr.f32.mxu0 %v1847_v19  ;;  %1005 = vmatprep.mubr.f32.mxu1 %v1847_v19 }
 0x1e1   : > { %1745 = vmatprep.subr.bf16.mxu0 %v1744_v21  ;;  %1787 = vmatprep.subr.bf16.mxu1 %v1776_v9 }
 0x1e2   : > { %893 = vmatmul.mubr.f32.gmra.mrb[22].mxu0 %v615_v22  ;;  %1006 = vmatmul.mubr.f32.gmra.mrb[22].mxu1 %v615_v22 }
 0x1e3   : > { %1747 = vmatpush1.bf16.msra.mxu0 %v1746_v16  ;;  %1795 = vmatpush1.bf16.msra.mxu1 %v1778_v17 }
 0x1e4   : > { %1076 = vmatprep.mubr.f32.mxu0 %v1847_v19  ;;  %1749 = vmatprep.subr.bf16.mxu0 %v2164_v20  ;;  %v746_v20 = vlaneseq }
 0x1e5   : > { %1195 = vmatprep.mubr.f32.mxu1 %v1847_v19 }
 0x1e6   : > { %1077 = vmatmul.mubr.f32.vlgmr.msra.gmra.mrb[24].mxu0 %v2204_v37  ;;  %1196 = vmatmul.mubr.f32.vlgmr.msra.gmra.mrb[24].mxu1 %v2237_v52 }
 0x1e7   : > { %1751 = vmatpush1.bf16.msra.mxu0 %v2198_v34  ;;  %1082 = vmatprep.mubr.f32.mxu0 %v1847_v19  ;;  %v2492_v34 = vshrl.u32 %v746_v20, 7 }
 0x1e8   : > { %1753 = vmatprep.subr.bf16.mxu0 %v2215_v44  ;;  %1201 = vmatprep.mubr.f32.mxu1 %v1847_v19 }
 0x1e9   : > { %v748_v44 = vsub.s32 0, %v2492_v34 }
 0x1ea   : > { %1083 = vmatmul.mubr.f32.gmra.mrb[26].mxu0 %v2237_v52  ;;  %1202 = vmatmul.mubr.f32.gmra.mrb[26].mxu1 %v2277_v5  ;;  %v2499_v52 = vld [vmem:[%s2648_s6] sm:$0xff] }
 0x1eb   : > { %1755 = vmatpush1.bf16.msra.mxu0 %v2232_v50  ;;  %1088 = vmatprep.mubr.f32.mxu0 %v1847_v19  ;;  %v756_v50 = vsub.s32 2, %v2492_v34 }
 0x1ec   : > { %1757 = vmatprep.subr.bf16.mxu0 %v2254_v60  ;;  %1207 = vmatprep.mubr.f32.mxu1 %v1847_v19  ;;  %v752_v60 = vsub.s32 1, %v2492_v34 }
 0x1ee   : > { %1089 = vmatmul.mubr.f32.gmra.mrb[28].mxu0 %v2277_v5  ;;  %1208 = vmatmul.mubr.f32.gmra.mrb[28].mxu1 %v2315_v23 }
 0x1ef   : > { %1759 = vmatpush1.bf16.msra.mxu0 %v2271_v2  ;;  %1094 = vmatprep.mubr.f32.mxu0 %v1847_v19  ;;  %v760_v2 = vsub.s32 3, %v2492_v34 }
 0x1f0   : > { %1761 = vmatprep.subr.bf16.mxu0 %v2293_v11  ;;  %1213 = vmatprep.mubr.f32.mxu1 %v1847_v19 }
 0x1f2   : > { %1095 = vmatmul.mubr.f32.gmra.mrb[30].mxu0 %v2315_v23  ;;  %1214 = vmatmul.mubr.f32.gmra.mrb[30].mxu1 %v2354_v40  ;;  %v2513_v23 = vrot.slane %v2499_v52, %v760_v2 }
 0x1f3   : > { %1763 = vmatpush1.bf16.msra.mxu0 %v2310_v18  ;;  %1100 = vmatprep.mubr.f32.mxu0 %v1847_v19  ;;  %v2510_v18 = vrot.slane %v2499_v52, %v752_v60 }
 0x1f4   : > { %1765 = vmatprep.subr.bf16.mxu0 %v2330_v29  ;;  %1219 = vmatprep.mubr.f32.mxu1 %v1847_v19 }
 0x1f6   : > { %1101 = vmatmul.mubr.f32.gmra.mrb[32].mxu0 %v2354_v40  ;;  %1220 = vmatmul.mubr.f32.gmra.mrb[32].mxu1 %v2390_v56 }
 0x1f7   : > { %1767 = vmatpush1.bf16.msra.mxu0 %v2347_v36  ;;  %1106 = vmatprep.mubr.f32.mxu0 %v1847_v19 }
 0x1f8   : > { %1769 = vmatprep.subr.bf16.mxu0 %v2368_v46  ;;  %1225 = vmatprep.mubr.f32.mxu1 %v1847_v19 }
 0x1fa   : > { %1107 = vmatmul.mubr.f32.gmra.mrb[34].mxu0 %v2390_v56  ;;  %1226 = vmatmul.mubr.f32.gmra.mrb[34].mxu1 %v2429_v12 }
 0x1fb   : > { %1771 = vmatpush1.bf16.msra.mxu0 %v2385_v54  ;;  %1112 = vmatprep.mubr.f32.mxu0 %v1847_v19 }
 0x1fc   : > { %1773 = vmatprep.subr.bf16.mxu0 %v2405_v63  ;;  %1231 = vmatprep.mubr.f32.mxu1 %v1847_v19 }
 0x1fe   : > { %1113 = vmatmul.mubr.f32.gmra.mrb[36].mxu0 %v2429_v12  ;;  %1232 = vmatmul.mubr.f32.gmra.mrb[36].mxu1 %v615_v22 }
 0x1ff   : > { %1775 = vmatpush1.bf16.msra.mxu0 %v2422_v7  ;;  %1118 = vmatprep.mubr.f32.mxu0 %v1847_v19 }
 0x200   : > { %1777 = vmatprep.subr.bf16.mxu0 %v1776_v9 }
 0x202   : > { %1119 = vmatmul.mubr.f32.gmra.mrb[38].mxu0 %v615_v22 }
 0x203   : > { %1779 = vmatpush1.bf16.msra.mxu0 %v1778_v17  ;;  %1189 = vmatprep.mubr.f32.mxu0 %v1847_v19  ;;  %v2504_v19 = vrot.slane %v2499_v52, %v748_v44 }
 0x206   : > { %1190 = vmatmul.mubr.f32.vlgmr.msra.gmra.mrb[40].mxu0 %v2204_v37  ;;  %v2507_v37 = vrot.slane %v2499_v52, %v756_v50 }
 0x299   : > { %v852_v5 = vpop.f32.mrb[8].mxu0  ;;  %v965_v11 = vpop.f32.mrb[8].mxu1 }
 0x29a   : > { %v854_v24 = vpop.f32.mrb[9].mxu0  ;;  %v967_v25 = vpop.f32.mrb[9].mxu1  ;;  %v853_v26 = vadd.f32 %v852_v5, %v2504_v19  ;;  %v966_v27 = vadd.f32 %v965_v11, %v2507_v37 }
 0x29b   : > { %v855_v28 = vadd.f32 %v854_v24, %v2510_v18  ;;  %v968_v29 = vadd.f32 %v967_v25, %v2513_v23 }
 0x29c   : > { %v1238_v40 = vmax.f32 %v853_v26, 0.0  ;;  %v1240_v41 = vmax.f32 %v966_v27, 0.0 }
 0x29d   : > { %v858_v30 = vpop.f32.mrb[10].mxu0  ;;  %v971_v31 = vpop.f32.mrb[10].mxu1  ;;  %v1239_v45 = vmax.f32 %v855_v28, 0.0  ;;  %v1241_v46 = vmax.f32 %v968_v29, 0.0 }
 0x29e   : > { %v859_v32 = vadd.f32 %v858_v30, %v2504_v19  ;;  %v972_v33 = vadd.f32 %v971_v31, %v2507_v37  ;;  %v860_v35 = vpop.f32.mrb[11].mxu0  ;;  %v973_v36 = vpop.f32.mrb[11].mxu1 }
 0x29f   : > { %v861_v38 = vadd.f32 %v860_v35, %v2510_v18  ;;  %v974_v39 = vadd.f32 %v973_v36, %v2513_v23 }
 0x2a0   : > { %v1246_v42 = vmax.f32 %v859_v32, 0.0  ;;  %v1248_v43 = vmax.f32 %v972_v33, 0.0 }
 0x2a1   : > { %v1247_v47 = vmax.f32 %v861_v38, 0.0  ;;  %v1249_v48 = vmax.f32 %v974_v39, 0.0  ;;  %v864_v49 = vpop.f32.mrb[12].mxu0  ;;  %v977_v51 = vpop.f32.mrb[12].mxu1 }
 0x2a2   : > { %v1302_v53 = vmax.f32 %v1238_v40, %v1246_v42  ;;  %v1328_v54 = vmax.f32 %v1240_v41, %v1248_v43  ;;  %v865_v55 = vadd.f32 %v864_v49, %v2504_v19  ;;  %v978_v56 = vadd.f32 %v977_v51, %v2507_v37  ;;  %v866_v57 = vpop.f32.mrb[13].mxu0  ;;  %v979_v58 = vpop.f32.mrb[13].mxu1 }
 0x2a3   : > { %v1315_v59 = vmax.f32 %v1239_v45, %v1247_v47  ;;  %v1341_v61 = vmax.f32 %v1241_v46, %v1249_v48  ;;  %v867_v62 = vadd.f32 %v866_v57, %v2510_v18  ;;  %v980_v63 = vadd.f32 %v979_v58, %v2513_v23 }
 0x2a4   : > { %v1254_v0 = vmax.f32 %v865_v55, 0.0  ;;  %v1256_v1 = vmax.f32 %v978_v56, 0.0 }
 0x2a5   : > { %v1255_v3 = vmax.f32 %v867_v62, 0.0  ;;  %v1257_v4 = vmax.f32 %v980_v63, 0.0  ;;  %v870_v6 = vpop.f32.mrb[14].mxu0  ;;  %v983_v7 = vpop.f32.mrb[14].mxu1 }
 0x2a6   : > { %v1303_v8 = vmax.f32 %v1302_v53, %v1254_v0  ;;  %v1329_v10 = vmax.f32 %v1328_v54, %v1256_v1  ;;  %v871_v12 = vadd.f32 %v870_v6, %v2504_v19  ;;  %v984_v13 = vadd.f32 %v983_v7, %v2507_v37  ;;  %v872_v14 = vpop.f32.mrb[15].mxu0  ;;  %v985_v15 = vpop.f32.mrb[15].mxu1 }
 0x2a7   : > { %v1316_v21 = vmax.f32 %v1315_v59, %v1255_v3  ;;  %v1342_v9 = vmax.f32 %v1341_v61, %v1257_v4  ;;  %v873_v16 = vadd.f32 %v872_v14, %v2510_v18  ;;  %v986_v17 = vadd.f32 %v985_v15, %v2513_v23 }
 0x2a8   : > { %v1262_v22 = vmax.f32 %v871_v12, 0.0  ;;  %v1264_v20 = vmax.f32 %v984_v13, 0.0  ;;  %v764_v12 = vsub.s32 4, %v2492_v34 }
 0x2a9   : > { %v1263_v44 = vmax.f32 %v873_v16, 0.0  ;;  %v1265_v50 = vmax.f32 %v986_v17, 0.0  ;;  %v876_v60 = vpop.f32.mrb[16].mxu0  ;;  %v989_v2 = vpop.f32.mrb[16].mxu1 }
 0x2aa   : > { %v1304_v5 = vmax.f32 %v1303_v8, %v1262_v22  ;;  %v1330_v11 = vmax.f32 %v1329_v10, %v1264_v20  ;;  %v877_v24 = vadd.f32 %v876_v60, %v2504_v19  ;;  %v990_v25 = vadd.f32 %v989_v2, %v2507_v37  ;;  %v878_v26 = vpop.f32.mrb[17].mxu0  ;;  %v991_v27 = vpop.f32.mrb[17].mxu1 }
 0x2ab   : > { %v1317_v28 = vmax.f32 %v1316_v21, %v1263_v44  ;;  %v1343_v29 = vmax.f32 %v1342_v9, %v1265_v50  ;;  %v879_v30 = vadd.f32 %v878_v26, %v2510_v18  ;;  %v992_v31 = vadd.f32 %v991_v27, %v2513_v23 }
 0x2ac   : > { %v1270_v32 = vmax.f32 %v877_v24, 0.0  ;;  %v1272_v33 = vmax.f32 %v990_v25, 0.0  ;;  %v768_v9 = vsub.s32 5, %v2492_v34  ;;  %v2550_v26 = vrot.slane %v2499_v52, %v764_v12 }
 0x2ad   : > { %v1271_v35 = vmax.f32 %v879_v30, 0.0  ;;  %v1273_v36 = vmax.f32 %v992_v31, 0.0  ;;  %v882_v38 = vpop.f32.mrb[18].mxu0  ;;  %v995_v39 = vpop.f32.mrb[18].mxu1 }
 0x2ae   : > { %v1305_v40 = vmax.f32 %v1304_v5, %v1270_v32  ;;  %v1331_v41 = vmax.f32 %v1330_v11, %v1272_v33  ;;  %v883_v42 = vadd.f32 %v882_v38, %v2504_v19  ;;  %v996_v43 = vadd.f32 %v995_v39, %v2507_v37  ;;  %v884_v45 = vpop.f32.mrb[19].mxu0  ;;  %v997_v46 = vpop.f32.mrb[19].mxu1 }
 0x2af   : > { %v1318_v47 = vmax.f32 %v1317_v28, %v1271_v35  ;;  %v1344_v48 = vmax.f32 %v1343_v29, %v1273_v36  ;;  %v885_v49 = vadd.f32 %v884_v45, %v2510_v18  ;;  %v998_v51 = vadd.f32 %v997_v46, %v2513_v23 }
 0x2b0   : > { %v1278_v53 = vmax.f32 %v883_v42, 0.0  ;;  %v1280_v54 = vmax.f32 %v996_v43, 0.0 }
 0x2b1   : > { %v1279_v55 = vmax.f32 %v885_v49, 0.0  ;;  %v1281_v56 = vmax.f32 %v998_v51, 0.0  ;;  %v888_v57 = vpop.f32.mrb[20].mxu0  ;;  %v1001_v58 = vpop.f32.mrb[20].mxu1 }
 0x2b2   : > { %v1306_v59 = vmax.f32 %v1305_v40, %v1278_v53  ;;  %v1332_v61 = vmax.f32 %v1331_v41, %v1280_v54  ;;  %v889_v62 = vadd.f32 %v888_v57, %v2504_v19  ;;  %v1002_v63 = vadd.f32 %v1001_v58, %v2507_v37  ;;  %v890_v0 = vpop.f32.mrb[21].mxu0  ;;  %v1003_v1 = vpop.f32.mrb[21].mxu1 }
 0x2b3   : > { %v1319_v3 = vmax.f32 %v1318_v47, %v1279_v55  ;;  %v1345_v4 = vmax.f32 %v1344_v48, %v1281_v56  ;;  %v891_v6 = vadd.f32 %v890_v0, %v2510_v18  ;;  %v1004_v7 = vadd.f32 %v1003_v1, %v2513_v23 }
 0x2b4   : > { %v1286_v8 = vmax.f32 %v889_v62, 0.0  ;;  %v1288_v10 = vmax.f32 %v1002_v63, 0.0  ;;  %v1848_v53 = vmov 1966171168  }
 0x2b5   : > { %v1287_v13 = vmax.f32 %v891_v6, 0.0  ;;  %v1289_v14 = vmax.f32 %v1004_v7, 0.0  ;;  %v894_v15 = vpop.f32.mrb[22].mxu0  ;;  %v1007_v21 = vpop.f32.mrb[22].mxu1  ;;  %v1425_v54 = vunpack.c.l.s4 %v1848_v53 }
 0x2b6   : > { %v1307_v16 = vmax.f32 %v1306_v59, %v1286_v8  ;;  %v1333_v17 = vmax.f32 %v1332_v61, %v1288_v10  ;;  %v895_v22 = vadd.f32 %v894_v15, %v2504_v19  ;;  %v1008_v20 = vadd.f32 %v1007_v21, %v2507_v37  ;;  %v896_v44 = vpop.f32.mrb[23].mxu0  ;;  %v1009_v50 = vpop.f32.mrb[23].mxu1 }
 0x2b7   : > { %v1320_v60 = vmax.f32 %v1319_v3, %v1287_v13  ;;  %v1346_v2 = vmax.f32 %v1345_v4, %v1289_v14  ;;  %v897_v5 = vadd.f32 %v896_v44, %v2510_v18  ;;  %v1010_v11 = vadd.f32 %v1009_v50, %v2513_v23 }
 0x2b8   : > { %v1294_v24 = vmax.f32 %v895_v22, 0.0  ;;  %v1296_v25 = vmax.f32 %v1008_v20, 0.0  ;;  %v2555_v19 = vrot.slane %v2499_v52, %v768_v9  ;;  %v1426_v15 = vunpack.c.0.s8 %v1425_v54 }
 0x2b9   : > { %v1295_v27 = vmax.f32 %v897_v5, 0.0  ;;  %v1297_v28 = vmax.f32 %v1010_v11, 0.0  ;;  %v1078_v29 = vpop.f32.mrb[24].mxu0  ;;  %v2552_v30 = vpop.f32.mrb[24].mxu1 }
 0x2ba   : > { %v1308_v37 = vmax.f32 %v1307_v16, %v1294_v24  ;;  %v1334_v31 = vmax.f32 %v1333_v17, %v1296_v25  ;;  %v1080_v32 = vpop.f32.mrb[25].mxu0  ;;  %v2557_v33 = vpop.f32.mrb[25].mxu1  ;;  %v1079_v38 = vadd.f32 %v1078_v29, %v2550_v26 }
 0x2bb   : > { %v1321_v18 = vmax.f32 %v1320_v60, %v1295_v27  ;;  %v1347_v23 = vmax.f32 %v1346_v2, %v1297_v28  ;;  %v1081_v41 = vadd.f32 %v1080_v32, %v2555_v19 }
 0x2bc   : > { %v1309_v35 = vrot.slane %v1308_v37, 4  ;;  %v1335_v36 = vrot.slane %v1334_v31, 4  ;;  %v1242_v59 = vmax.f32 %v1079_v38, 0.0 }
 0x2bd   : > { %v1322_v39 = vrot.slane %v1321_v18, 4  ;;  %v1348_v40 = vrot.slane %v1347_v23, 4  ;;  %v1084_v42 = vpop.f32.mrb[26].mxu0  ;;  %v2561_v43 = vpop.f32.mrb[26].mxu1  ;;  %v1243_v0 = vmax.f32 %v1081_v41, 0.0 }
 0x2be   : > { %v1310_v45 = vmax.f32 %v1308_v37, %v1309_v35  ;;  %v1336_v46 = vmax.f32 %v1334_v31, %v1335_v36  ;;  %v1085_v47 = vadd.f32 %v1084_v42, %v2550_v26  ;;  %v1086_v48 = vpop.f32.mrb[27].mxu0  ;;  %v2564_v49 = vpop.f32.mrb[27].mxu1  ;;  %v2578_v37 = vsub.s32 %v1426_v15, %v2492_v34 }
 0x2bf   : > { %v1323_v51 = vmax.f32 %v1321_v18, %v1322_v39  ;;  %v1349_v55 = vmax.f32 %v1347_v23, %v1348_v40  ;;  %v1087_v56 = vadd.f32 %v1086_v48, %v2555_v19 }
 0x2c0   : > { %v1311_v57 = vrot.slane %v1310_v45, 2  ;;  %v1337_v58 = vrot.slane %v1336_v46, 2  ;;  %v1250_v61 = vmax.f32 %v1085_v47, 0.0 }
 0x2c1   : > { %v1324_v62 = vrot.slane %v1323_v51, 2  ;;  %v1350_v63 = vrot.slane %v1349_v55, 2  ;;  %v1251_v1 = vmax.f32 %v1087_v56, 0.0  ;;  %v1090_v3 = vpop.f32.mrb[28].mxu0  ;;  %v2567_v4 = vpop.f32.mrb[28].mxu1 }
 0x2c2   : > { %v1312_v6 = vmax.f32 %v1310_v45, %v1311_v57  ;;  %v1338_v7 = vmax.f32 %v1336_v46, %v1337_v58  ;;  %v1354_v8 = vmax.f32 %v1242_v59, %v1250_v61  ;;  %v1091_v10 = vadd.f32 %v1090_v3, %v2550_v26  ;;  %v1092_v12 = vpop.f32.mrb[29].mxu0  ;;  %v2570_v13 = vpop.f32.mrb[29].mxu1 }
 0x2c3   : > { %v1325_v14 = vmax.f32 %v1323_v51, %v1324_v62  ;;  %v1351_v21 = vmax.f32 %v1349_v55, %v1350_v63  ;;  %v1367_v9 = vmax.f32 %v1243_v0, %v1251_v1  ;;  %v1093_v20 = vadd.f32 %v1092_v12, %v2555_v19 }
 0x2c4   : > { %v1313_v16 = vrot.slane %v1312_v6, 1  ;;  %v1339_v17 = vrot.slane %v1338_v7, 1  ;;  %v1258_v22 = vmax.f32 %v1091_v10, 0.0  ;;  %v772_v3 = vsub.s32 6, %v2492_v34 }
 0x2c5   : > { %v1326_v44 = vrot.slane %v1325_v14, 1  ;;  %v1352_v50 = vrot.slane %v1351_v21, 1  ;;  %v1096_v60 = vpop.f32.mrb[30].mxu0  ;;  %v2573_v2 = vpop.f32.mrb[30].mxu1  ;;  %v1259_v25 = vmax.f32 %v1093_v20, 0.0 }
 0x2c6   : > { %v1314_v5 = vmax.f32 %v1312_v6, %v1313_v16  ;;  %v1340_v11 = vmax.f32 %v1338_v7, %v1339_v17  ;;  %v1355_v24 = vmax.f32 %v1354_v8, %v1258_v22  ;;  %v1098_v27 = vpop.f32.mrb[31].mxu0  ;;  %v2575_v28 = vpop.f32.mrb[31].mxu1  ;;  %v1097_v32 = vadd.f32 %v1096_v60, %v2550_v26 }
 0x2c7   : > { %v1327_v29 = vmax.f32 %v1325_v14, %v1326_v44  ;;  %v1353_v31 = vmax.f32 %v1351_v21, %v1352_v50  ;;  %v1368_v18 = vmax.f32 %v1367_v9, %v1259_v25  ;;  %v1099_v23 = vadd.f32 %v1098_v27, %v2555_v19 }
 0x2c8   : > { %v1266_v38 = vmax.f32 %v1097_v32, 0.0  ;;  %v776_v8 = vsub.s32 7, %v2492_v34  ;;  %v773_v20 = vrot.slane %v2499_v52, %v772_v3 }
 0x2c9   : > { %v1420_v35 = vcombine.low %v1314_v5, %v1327_v29  ;;  %v1421_v36 = vcombine.low %v1340_v11, %v1353_v31  ;;  %v1102_v39 = vpop.f32.mrb[32].mxu0  ;;  %v2582_v40 = vpop.f32.mrb[32].mxu1  ;;  %v1267_v41 = vmax.f32 %v1099_v23, 0.0 }
 0x2ca   : > { %v1103_v42 = vadd.f32 %v1102_v39, %v2550_v26  ;;  %v1104_v45 = vpop.f32.mrb[33].mxu0  ;;  %v2585_v46 = vpop.f32.mrb[33].mxu1  ;;  %v1356_v51 = vmax.f32 %v1355_v24, %v1266_v38  ;;  %v777_v50 = vrot.slane %v2499_v52, %v776_v8  ;;  %v1198_v29 = vadd.f32 %v2552_v30, %v773_v20 }
 0x2cb   : > { %v2588_v47 = vrot.slane %v1420_v35, %v2578_v37  ;;  %v2591_v48 = vrot.slane %v1421_v36, %v2578_v37  ;;  %v1369_v53 = vmax.f32 %v1368_v18, %v1267_v41  ;;  %v1105_v55 = vadd.f32 %v1104_v45, %v2555_v19 }
 0x2cc   : > { %v1274_v54 = vmax.f32 %v1103_v42, 0.0  ;;  %v1200_v32 = vadd.f32 %v2557_v33, %v777_v50  ;;  %v1204_v35 = vadd.f32 %v2561_v43, %v773_v20  ;;  %v1206_v39 = vadd.f32 %v2564_v49, %v777_v50 }
 0x2cd   : > { %v1452_v56 = vcombine.low %v2588_v47, %v2591_v48  ;;  %v1108_v57 = vpop.f32.mrb[34].mxu0  ;;  %v2596_v58 = vpop.f32.mrb[34].mxu1  ;;  %v1275_v61 = vmax.f32 %v1105_v55, 0.0  ;;  %v1252_v42 = vmax.f32 %v1198_v29, 0.0  ;;  %v1210_v45 = vadd.f32 %v2567_v4, %v773_v20 }
 0x2ce   : > { %v1357_v59 = vmax.f32 %v1356_v51, %v1274_v54  ;;  %v1109_v62 = vadd.f32 %v1108_v57, %v2550_v26  ;;  %v1110_v63 = vpop.f32.mrb[35].mxu0  ;;  %v2599_v0 = vpop.f32.mrb[35].mxu1  ;;  %v1253_v30 = vmax.f32 %v1200_v32, 0.0  ;;  %v1260_v55 = vmax.f32 %v1204_v35, 0.0 }
 0x2cf   : > { %v1111_v1 = vadd.f32 %v1110_v63, %v2555_v19  ;;  %v1370_v6 = vmax.f32 %v1369_v53, %v1275_v61  ;;  %v1212_v53 = vadd.f32 %v2570_v13, %v777_v50  ;;  %v1216_v43 = vadd.f32 %v2573_v2, %v773_v20 }
 0x2d0   : > { %v1282_v7 = vmax.f32 %v1109_v62, 0.0  ;;  %v1261_v61 = vmax.f32 %v1206_v39, 0.0  ;;  %v1218_v49 = vadd.f32 %v2575_v28, %v777_v50  ;;  %v1222_v4 = vadd.f32 %v2582_v40, %v773_v20 }
 0x2d1   : > { %v1283_v10 = vmax.f32 %v1111_v1, 0.0  ;;  %v1114_v12 = vpop.f32.mrb[36].mxu0  ;;  %v1233_v14 = vpop.f32.mrb[36].mxu1  ;;  %v1268_v1 = vmax.f32 %v1210_v45, 0.0  ;;  %v1224_v13 = vadd.f32 %v2585_v46, %v777_v50  ;;  %v1228_v2 = vadd.f32 %v2596_v58, %v773_v20 }
 0x2d2   : > { %v1358_v15 = vmax.f32 %v1357_v59, %v1282_v7  ;;  %v1115_v21 = vadd.f32 %v1114_v12, %v2550_v26  ;;  %v1116_v9 = vpop.f32.mrb[37].mxu0  ;;  %v1235_v16 = vpop.f32.mrb[37].mxu1  ;;  %v1269_v7 = vmax.f32 %v1212_v53, 0.0  ;;  %v1276_v12 = vmax.f32 %v1216_v43, 0.0 }
 0x2d3   : > { %v1371_v17 = vmax.f32 %v1370_v6, %v1283_v10  ;;  %v1117_v22 = vadd.f32 %v1116_v9, %v2555_v19  ;;  %v1277_v9 = vmax.f32 %v1218_v49, 0.0  ;;  %v1230_v28 = vadd.f32 %v2599_v0, %v777_v50 }
 0x2d4   : > { %v1290_v44 = vmax.f32 %v1115_v21, 0.0  ;;  %v1460_v43 = vrot.slane %v1452_v56, %v2578_v37 }
 0x2d5   : > { %v1291_v60 = vmax.f32 %v1117_v22, 0.0  ;;  %v1120_v5 = vpop.f32.mrb[38].mxu0 }
 0x2d6   : > { %v1359_v11 = vmax.f32 %v1358_v15, %v1290_v44  ;;  %v1121_v34 = vadd.f32 %v1120_v5, %v2550_v26  ;;  %v1122_v24 = vpop.f32.mrb[39].mxu0  ;;  %v1284_v44 = vmax.f32 %v1222_v4, 0.0 }
 0x2d7   : > { %v1372_v25 = vmax.f32 %v1371_v17, %v1291_v60  ;;  %v1123_v27 = vadd.f32 %v1122_v24, %v2555_v19  ;;  %v1234_v60 = vadd.f32 %v1233_v14, %v773_v20 }
 0x2d8   : > { %v1298_v31 = vmax.f32 %v1121_v34, 0.0  ;;  %v1236_v34 = vadd.f32 %v1235_v16, %v777_v50 }
 0x2d9   : > { %v1299_v18 = vmax.f32 %v1123_v27, 0.0  ;;  %v1191_v23 = vpop.f32.mrb[40].mxu0 }
 0x2da   : > { %v1360_v36 = vmax.f32 %v1359_v11, %v1298_v31  ;;  %v1192_v52 = vadd.f32 %v1191_v23, %v773_v20  ;;  %v1193_v38 = vpop.f32.mrb[41].mxu0  ;;  %v1285_v11 = vmax.f32 %v1224_v13, 0.0  ;;  %v1293_v31 = vmax.f32 %v1230_v28, 0.0 }
 0x2db   : > { %v1373_v41 = vmax.f32 %v1372_v25, %v1299_v18  ;;  %v1194_v26 = vadd.f32 %v1193_v38, %v777_v50  ;;  %v1292_v25 = vmax.f32 %v1228_v2, 0.0  ;;  %v1300_v18 = vmax.f32 %v1234_v60, 0.0 }
 0x2dc   : > { %v1361_v19 = vrot.slane %v1360_v36, 4  ;;  %v1244_v51 = vmax.f32 %v1192_v52, 0.0  ;;  %v1301_v35 = vmax.f32 %v1236_v34, 0.0 }
 0x2dd   : > { %v1374_v33 = vrot.slane %v1373_v41, 4  ;;  %v1245_v54 = vmax.f32 %v1194_v26, 0.0 }
 0x2de   : > { %v1362_v57 = vmax.f32 %v1360_v36, %v1361_v19  ;;  %v1380_v59 = vmax.f32 %v1244_v51, %v1252_v42 }
 0x2df   : > { %v1375_v62 = vmax.f32 %v1373_v41, %v1374_v33  ;;  %v1393_v63 = vmax.f32 %v1245_v54, %v1253_v30 }
 0x2e0   : > { %v1363_v3 = vrot.slane %v1362_v57, 2  ;;  %v1381_v6 = vmax.f32 %v1380_v59, %v1260_v55 }
 0x2e1   : > { %v1376_v8 = vrot.slane %v1375_v62, 2  ;;  %v1394_v10 = vmax.f32 %v1393_v63, %v1261_v61 }
 0x2e2   : > { %v1364_v15 = vmax.f32 %v1362_v57, %v1363_v3  ;;  %v1382_v21 = vmax.f32 %v1381_v6, %v1268_v1 }
 0x2e3   : > { %v1377_v17 = vmax.f32 %v1375_v62, %v1376_v8  ;;  %v1395_v22 = vmax.f32 %v1394_v10, %v1269_v7 }
 0x2e4   : > { %v1365_v40 = vrot.slane %v1364_v15, 1  ;;  %v1383_v5 = vmax.f32 %v1382_v21, %v1276_v12 }
 0x2e5   : > { %v1378_v24 = vrot.slane %v1377_v17, 1  ;;  %v1396_v46 = vmax.f32 %v1395_v22, %v1277_v9 }
 0x2e6   : > { %v1366_v27 = vmax.f32 %v1364_v15, %v1365_v40  ;;  %v1384_v29 = vmax.f32 %v1383_v5, %v1284_v44 }
 0x2e7   : > { %v1379_v58 = vmax.f32 %v1377_v17, %v1378_v24  ;;  %v1397_v32 = vmax.f32 %v1396_v46, %v1285_v11 }
 0x2e8   : > { %v1385_v23 = vmax.f32 %v1384_v29, %v1292_v25 }
 0x2e9   : > { %v1422_v0 = vcombine.low %v1366_v27, %v1379_v58  ;;  %v1398_v36 = vmax.f32 %v1397_v32, %v1293_v31 }
 0x2ea   : > { %v1386_v52 = vmax.f32 %v1385_v23, %v1300_v18 }
 0x2eb   : > { %v1399_v38 = vmax.f32 %v1398_v36, %v1301_v35  ;;  %v1444_v33 = vrot.slane %v1422_v0, %v2578_v37 }
 0x2ec   : > { %v1387_v14 = vrot.slane %v1386_v52, 4 }
 0x2ed   : > { %v1400_v20 = vrot.slane %v1399_v38, 4 }
 0x2ee   : > { %v1388_v39 = vmax.f32 %v1386_v52, %v1387_v14 }
 0x2ef   : > { %v1401_v16 = vmax.f32 %v1399_v38, %v1400_v20 }
 0x2f0   : > { %v1389_v50 = vrot.slane %v1388_v39, 2 }
 0x2f1   : > { %v1402_v41 = vrot.slane %v1401_v16, 2 }
 0x2f2   : > { %v1390_v26 = vmax.f32 %v1388_v39, %v1389_v50 }
 0x2f3   : > { %v1403_v42 = vmax.f32 %v1401_v16, %v1402_v41 }
 0x2f4   : > { %v1391_v45 = vrot.slane %v1390_v26, 1 }
 0x2f5   : > { %v1404_v19 = vrot.slane %v1403_v42, 1 }
 0x2f6   : > { %v1392_v51 = vmax.f32 %v1390_v26, %v1391_v45 }
 0x2f7   : > { %v1405_v30 = vmax.f32 %v1403_v42, %v1404_v19 }
 0x2f9   : > { %v1423_v53 = vcombine.low %v1392_v51, %v1405_v30 }
 0x2fb   : > { %v1451_v54 = vrot.slane %v1423_v53, %v2578_v37 }
 0x2fd   : > { %v1453_v55 = vcombine.low %v1444_v33, %v1451_v54 }
 0x2ff   : > { %v1467_v57 = vrot.slane %v1453_v55, %v2578_v37 }
 0x301   : > { %v1468_v59 = vcombine.low %v1460_v43, %v1467_v57 }
 0x303   : > { %1471 = vst [vmem:[%s304_s30] sm:$0xff] %v1468_v59 }
 0x304 PF: > { %s17_s26 = sadd.s32 1, %s1845_s26   ;;  %s2650_s24 = smov %s1841_s25 }
 0x305   : > { %p14_p5 = scmp.ge.s32.totalorder %s17_s26, 4   ;;  %s2651_s25 = smov %s2653_s27 }
 0x307   :  { %16 = sbr.rel (!%p14_p5) target bundleno = 2 (0x2), region = 82 }

// kernel: point_estimation_forward.4
= control target key start
LH: loop header
LB: loop body
LE: loop exit
PB: predicated region body
PF: predicated region fallthrough
CT: control target
= control target key end

     0   :  { %s1855_s24 = smov 0   ;;  %s1857_s25 = smov 0   ;;  %s2597_s0 = inlined_call_operand.vmem [shape: f32[2,64,3], index: 0, kind: input, shape index: {}]   ;;  %s2598_s1 = inlined_call_operand.vmem [shape: f32[2,3,64], index: 1, kind: input, shape index: {}]   ;;  %s2599_s2 = inlined_call_operand.vmem [shape: f32[1,64], index: 2, kind: input, shape index: {}]   ;;  %s2600_s3 = inlined_call_operand.vmem [shape: f32[64,128], index: 3, kind: input, shape index: {}]   ;;  %s2601_s4 = inlined_call_operand.vmem [shape: f32[1,128], index: 4, kind: input, shape index: {}]   ;;  %s2602_s5 = inlined_call_operand.vmem [shape: f32[128,1024], index: 5, kind: input, shape index: {}]   ;;  %s2603_s6 = inlined_call_operand.vmem [shape: f32[1,1024], index: 6, kind: input, shape index: {}]   ;;  %s2604_s7 = inlined_call_operand.vmem [shape: f32[2,1,1024], index: 7, kind: output, shape index: {}]  }
   0x1   :  { %s1859_s26 = smov 0  }
   0x2 LB: > { %s29_s27 = sadd.s32 1, %s1807_s25  ;;  %p1508_p0 = scmp.ge.s32.totalorder %s1811_s26, 1  ;;  %s1811_s26 = sphi %s1859_s26, %s17_s26   ;;  %s1807_s25 = sphi %s1857_s25, %s2606_s25   ;;  %s1803_s24 = sphi %s1855_s24, %s2605_s24  }
   0x3   : > { %p31_p1 = scmp.ge.s32.totalorder %s29_s27, 2  ;;  %p265_p2 = scmp.lt.s32.totalorder %s1811_s26, 3 }
   0x5   : > { %s2608_s27 = smov (%p31_p1, %s29_s27), 0  ;;  %p266_p3 = pnand %p1508_p0, %p265_p2 }
   0x6   : > { %p305_p4 = scmp.lt.s32.totalorder (!%p266_p3), %s1803_s24, 1  ;;  %v480_v0 = vld [vmem:[%s2600_s3] sm:$0xff] (!%p266_p3)  ;;  %v481_v1 = vld [vmem:[%s2600_s3 + $0x8] sm:$0xff] (!%p266_p3)  ;;  %v482_v3 = vld [vmem:[%s2600_s3 + $0x10] sm:$0xff] (!%p266_p3)  ;;  %vm363_vm0 = vcmask (!%p266_p3), 1042432   ;;  %vm338_vm1 = vcmask (!%p266_p3), 23552  }
   0x7   : > { %269 = sbr.rel (%p266_p3) target bundleno = 771 (0x303), region = 48  ;;  %v1602_v2 = vpack.c.bf16 (!%p266_p3), %v481_v1, %v480_v0  ;;  %v483_v4 = vld [vmem:[%s2600_s3 + $0x18] sm:$0xff] (!%p266_p3)  ;;  %v484_v6 = vld [vmem:[%s2600_s3 + $0x20] sm:$0xff] (!%p266_p3)  ;;  %v485_v7 = vld [vmem:[%s2600_s3 + $0x28] sm:$0xff] (!%p266_p3)  ;;  %vm495_vm2 = vcmask (!%p266_p3), 523264  }
   0x8   : > { %v1606_v5 = vpack.c.bf16 (!%p266_p3), %v483_v4, %v482_v3  ;;  %v1610_v8 = vpack.c.bf16 (!%p266_p3), %v485_v7, %v484_v6  ;;  %v486_v18 = vld [vmem:[%s2600_s3 + $0x30] sm:$0xff] (!%p266_p3)  ;;  %v487_v19 = vld [vmem:[%s2600_s3 + $0x38] sm:$0xff] (!%p266_p3)  ;;  %v634_v21 = vld [vmem:[%s2602_s5 + $0x8] sm:$0xff] (!%p266_p3) }
   0x9   : > { %1603 = vmatprep.subr.bf16.mxu1 (!%p266_p3), %v1602_v2  ;;  %v1614_v20 = vpack.c.bf16 (!%p266_p3), %v487_v19, %v486_v18  ;;  %v642_v22 = vld [vmem:[%s2602_s5 + $0x48] sm:$0xff] (!%p266_p3)  ;;  %v633_v23 = vld [vmem:[%s2602_s5] sm:$0xff] (!%p266_p3)  ;;  %v636_v26 = vld [vmem:[%s2602_s5 + $0x18] sm:$0xff] (!%p266_p3) }
   0xa   : > { %1605 = vmatpush3.bf16.msra.mxu1 (!%p266_p3), %v1602_v2  ;;  %v1618_v24 = vpack.c.bf16 (!%p266_p3), %v642_v22, %v634_v21  ;;  %v641_v25 = vld [vmem:[%s2602_s5 + $0x40] sm:$0xff] (!%p266_p3)  ;;  %v644_v27 = vld [vmem:[%s2602_s5 + $0x58] sm:$0xff] (!%p266_p3)  ;;  %v650_v30 = vld [vmem:[%s2602_s5 + $0x88] sm:$0xff] (!%p266_p3) }
   0xb   : > { %1607 = vmatprep.subr.bf16.mxu1 (!%p266_p3), %v1606_v5  ;;  %v1620_v28 = vpack.c.bf16 (!%p266_p3), %v641_v25, %v633_v23  ;;  %v1650_v29 = vpack.c.bf16 (!%p266_p3), %v644_v27, %v636_v26  ;;  %v658_v31 = vld [vmem:[%s2602_s5 + $0xc8] sm:$0xff] (!%p266_p3)  ;;  %v649_v32 = vld [vmem:[%s2602_s5 + $0x80] sm:$0xff] (!%p266_p3)  ;;  %v635_v6 = vld [vmem:[%s2602_s5 + $0x10] sm:$0xff] (!%p266_p3) }
   0xc   : > { %v657_v33 = vld [vmem:[%s2602_s5 + $0xc0] sm:$0xff] (!%p266_p3)  ;;  %v1622_v34 = vpack.c.bf16 (!%p266_p3), %v658_v31, %v650_v30  ;;  %v666_v36 = vld [vmem:[%s2602_s5 + $0x108] sm:$0xff] (!%p266_p3)  ;;  %v643_v7 = vld [vmem:[%s2602_s5 + $0x50] sm:$0xff] (!%p266_p3) }
   0xd   : > { %v1624_v35 = vpack.c.bf16 (!%p266_p3), %v657_v33, %v649_v32  ;;  %v674_v37 = vld [vmem:[%s2602_s5 + $0x148] sm:$0xff] (!%p266_p3)  ;;  %v665_v39 = vld [vmem:[%s2602_s5 + $0x100] sm:$0xff] (!%p266_p3)  ;;  %v651_v18 = vld [vmem:[%s2602_s5 + $0x90] sm:$0xff] (!%p266_p3) }
   0xe   : > { %s2610_s24 = smov (!%p305_p4, %s1803_s24), 1  ;;  %1609 = vmatpush3.bf16.msra.mxu1 %v1606_v5  ;;  %v1626_v38 = vpack.c.bf16 %v674_v37, %v666_v36  ;;  %v673_v40 = vld [vmem:[%s2602_s5 + $0x140] sm:$0xff]  ;;  %v682_v42 = vld [vmem:[%s2602_s5 + $0x188] sm:$0xff]  ;;  %v659_v19 = vld [vmem:[%s2602_s5 + $0xd0] sm:$0xff] }
   0xf   : > { %s1534_s17 = sshll.u32 %s2610_s24, 6  ;;  %s1511_s18 = sshll.u32 %s2610_s24, 2  ;;  %1611 = vmatprep.subr.bf16.mxu1 %v1610_v8  ;;  %v1628_v41 = vpack.c.bf16 %v673_v40, %v665_v39  ;;  %v690_v43 = vld [vmem:[%s2602_s5 + $0x1c8] sm:$0xff]  ;;  %v681_v45 = vld [vmem:[%s2602_s5 + $0x180] sm:$0xff]  ;;  %v668_v21 = vld [vmem:[%s2602_s5 + $0x118] sm:$0xff]  ;;  %v1656_v26 = vpack.c.bf16 %v659_v19, %v651_v18  ;;  %v1813_v19 = vmov 0.0  }
  0x10   : > { %s312_s21 = scalar_lea.vmem %s2597_s0, %s1534_s17  ;;  %s317_s28 = scalar_lea.vmem %s2598_s1, %s1511_s18  ;;  %v1630_v44 = vpack.c.bf16 %v690_v43, %v682_v42  ;;  %v689_v46 = vld [vmem:[%s2602_s5 + $0x1c0] sm:$0xff]  ;;  %v698_v47 = vld [vmem:[%s2602_s5 + $0x208] sm:$0xff]  ;;  %v676_v22 = vld [vmem:[%s2602_s5 + $0x158] sm:$0xff] }
  0x11   : > { %v330_v9 = vld [vmem:[%s317_s28] sm:$0x7]  ;;  %v323_v11 = vld [vmem:[%s312_s21 + $0x8] sm:$0xff]  ;;  %v324_v12 = vld [vmem:[%s312_s21 + $0x10] sm:$0xff]  ;;  %v1632_v49 = vpack.c.bf16 %v689_v46, %v681_v45  ;;  %s1512_s29 = sshll.u32 %s2610_s24, 3 }
  0x12   : > { %v322_v10 = vld [vmem:[%s312_s21] sm:$0xff]  ;;  %1560 = vmatprep.subr.msk.mxu0 %vm363_vm0, %v330_v9  ;;  %v325_v13 = vld [vmem:[%s312_s21 + $0x18] sm:$0xff]  ;;  %1613 = vmatpush3.bf16.msra.mxu1 %v1610_v8  ;;  %v327_v15 = vld [vmem:[%s312_s21 + $0x28] sm:$0xff]  ;;  %s321_s9 = scalar_lea.vmem %s2604_s7, %s1512_s29 }
  0x13   : > { %1562 = vmatprep.mubr.msk.f32.mxu0 %vm338_vm1, %v322_v10  ;;  %1561 = vmatpush3.msk.msra.mxu0 %vm363_vm0, %v330_v9  ;;  %v326_v14 = vld [vmem:[%s312_s21 + $0x20] sm:$0xff]  ;;  %v328_v16 = vld [vmem:[%s312_s21 + $0x30] sm:$0xff]  ;;  %v329_v17 = vld [vmem:[%s312_s21 + $0x38] sm:$0xff] }
  0x14   : > { %1563 = vmatmul.mubr.msk.f32.vlgmr.msra.gmra.mrb[0].mxu0 %vm338_vm1, %v323_v11  ;;  %1615 = vmatprep.subr.bf16.mxu1 %v1614_v20  ;;  %v706_v48 = vld [vmem:[%s2602_s5 + $0x248] sm:$0xff]  ;;  %v697_v51 = vld [vmem:[%s2602_s5 + $0x200] sm:$0xff]  ;;  %v652_v9 = vld [vmem:[%s2602_s5 + $0x98] sm:$0xff] }
  0x15   : > { %1565 = vmatprep.mubr.msk.f32.mxu0 %vm338_vm1, %v324_v12  ;;  %1619 = vmatprep.subr.bf16.mxu0 %v1618_v24  ;;  %v1634_v50 = vpack.c.bf16 %v706_v48, %v698_v47  ;;  %v705_v52 = vld [vmem:[%s2602_s5 + $0x240] sm:$0xff]  ;;  %v714_v53 = vld [vmem:[%s2602_s5 + $0x288] sm:$0xff]  ;;  %v660_v10 = vld [vmem:[%s2602_s5 + $0xd8] sm:$0xff] }
  0x16   : > { %1617 = vmatpush3.bf16.msra.mxu1 %v1614_v20  ;;  %1621 = vmatpush1.bf16.msra.mxu0 %v1620_v28  ;;  %v722_v54 = vld [vmem:[%s2602_s5 + $0x2c8] sm:$0xff]  ;;  %v1636_v55 = vpack.c.bf16 %v705_v52, %v697_v51  ;;  %v713_v57 = vld [vmem:[%s2602_s5 + $0x280] sm:$0xff]  ;;  %v667_v30 = vld [vmem:[%s2602_s5 + $0x110] sm:$0xff] }
  0x17   : > { %1651 = vmatprep.subr.bf16.mxu1 %v1650_v29  ;;  %1623 = vmatprep.subr.bf16.mxu0 %v1622_v34  ;;  %v1638_v56 = vpack.c.bf16 %v722_v54, %v714_v53  ;;  %v721_v58 = vld [vmem:[%s2602_s5 + $0x2c0] sm:$0xff]  ;;  %v730_v59 = vld [vmem:[%s2602_s5 + $0x308] sm:$0xff]  ;;  %v1658_v29 = vpack.c.bf16 %v676_v22, %v668_v21  ;;  %v675_v31 = vld [vmem:[%s2602_s5 + $0x150] sm:$0xff] }
  0x18   : > { %1566 = vmatmul.mubr.msk.f32.gmra.mrb[2].mxu0 %vm338_vm1, %v325_v13  ;;  %v738_v60 = vld [vmem:[%s2602_s5 + $0x348] sm:$0xff]  ;;  %v1640_v61 = vpack.c.bf16 %v721_v58, %v713_v57  ;;  %v729_v63 = vld [vmem:[%s2602_s5 + $0x300] sm:$0xff]  ;;  %v1652_v13 = vpack.c.bf16 %v643_v7, %v635_v6  ;;  %v684_v33 = vld [vmem:[%s2602_s5 + $0x198] sm:$0xff] }
  0x19   : > { %1568 = vmatprep.mubr.msk.f32.mxu0 %vm338_vm1, %v326_v14  ;;  %v1642_v62 = vpack.c.bf16 %v738_v60, %v730_v59  ;;  %v737_v0 = vld [vmem:[%s2602_s5 + $0x340] sm:$0xff]  ;;  %v692_v34 = vld [vmem:[%s2602_s5 + $0x1d8] sm:$0xff]  ;;  %v683_v42 = vld [vmem:[%s2602_s5 + $0x190] sm:$0xff] }
  0x1a   : > { %1625 = vmatpush1.bf16.msra.mxu0 %v1624_v35  ;;  %v1644_v1 = vpack.c.bf16 %v737_v0, %v729_v63  ;;  %v1513_v2 = vld [vmem:[%s2599_s2] ss:$0 sm:$0xff]  ;;  %v691_v43 = vld [vmem:[%s2602_s5 + $0x1d0] sm:$0xff]  ;;  %v700_v45 = vld [vmem:[%s2602_s5 + $0x218] sm:$0xff] }
  0x1b   : > { %1627 = vmatprep.subr.bf16.mxu0 %v1626_v38  ;;  %v1660_v38 = vpack.c.bf16 %v675_v31, %v667_v30  ;;  %v708_v46 = vld [vmem:[%s2602_s5 + $0x258] sm:$0xff]  ;;  %v699_v51 = vld [vmem:[%s2602_s5 + $0x210] sm:$0xff]  ;;  %v745_v6 = vld [vmem:[%s2602_s5 + $0x380] sm:$0xff] }
  0x1c   : > { %1569 = vmatmul.mubr.msk.f32.gmra.mrb[4].mxu0 %vm338_vm1, %v327_v15  ;;  %v707_v52 = vld [vmem:[%s2602_s5 + $0x250] sm:$0xff]  ;;  %v716_v53 = vld [vmem:[%s2602_s5 + $0x298] sm:$0xff]  ;;  %v753_v7 = vld [vmem:[%s2602_s5 + $0x3c0] sm:$0xff] }
  0x1d   : > { %1571 = vmatprep.mubr.msk.f32.mxu0 %vm338_vm1, %v328_v16  ;;  %v724_v54 = vld [vmem:[%s2602_s5 + $0x2d8] sm:$0xff]  ;;  %v715_v57 = vld [vmem:[%s2602_s5 + $0x290] sm:$0xff]  ;;  %v2138_v21 = vld [vmem:[%s2601_s4] ss:$0 sm:$0xff] }
  0x1e   : > { %1629 = vmatpush1.bf16.msra.mxu0 %v1628_v41  ;;  %v1662_v41 = vpack.c.bf16 %v692_v34, %v684_v33  ;;  %v723_v58 = vld [vmem:[%s2602_s5 + $0x2d0] sm:$0xff]  ;;  %v732_v59 = vld [vmem:[%s2602_s5 + $0x318] sm:$0xff]  ;;  %v637_v22 = vld [vmem:[%s2602_s5 + $0x20] sm:$0xff] }
  0x1f   : > { %1631 = vmatprep.subr.bf16.mxu0 %v1630_v44  ;;  %v740_v60 = vld [vmem:[%s2602_s5 + $0x358] sm:$0xff]  ;;  %v731_v63 = vld [vmem:[%s2602_s5 + $0x310] sm:$0xff]  ;;  %v662_v30 = vld [vmem:[%s2602_s5 + $0xe8] sm:$0xff] }
  0x20   : > { %1572 = vmatmul.mubr.msk.f32.gmra.mrb[6].mxu0 %vm338_vm1, %v329_v17  ;;  %v1654_v17 = vpack.c.bf16 %v660_v10, %v652_v9  ;;  %v739_v0 = vld [vmem:[%s2602_s5 + $0x350] sm:$0xff]  ;;  %v756_v9 = vld [vmem:[%s2602_s5 + $0x3d8] sm:$0xff] }
  0x21   : > { %v747_v10 = vld [vmem:[%s2602_s5 + $0x390] sm:$0xff]  ;;  %v648_v18 = vld [vmem:[%s2602_s5 + $0x78] sm:$0xff]  ;;  %867 = vmatprep.mubr.f32.mxu0 %v1813_v19 }
  0x22   : > { %1633 = vmatpush1.bf16.msra.mxu0 %v1632_v49  ;;  %v1664_v49 = vpack.c.bf16 %v691_v43, %v683_v42  ;;  %v656_v31 = vld [vmem:[%s2602_s5 + $0xb8] sm:$0xff] }
  0x23   : > { %1635 = vmatprep.subr.bf16.mxu0 %v1634_v50  ;;  %v1666_v50 = vpack.c.bf16 %v708_v46, %v700_v45  ;;  %v670_v45 = vld [vmem:[%s2602_s5 + $0x128] sm:$0xff] }
  0x24   : > { %v678_v46 = vld [vmem:[%s2602_s5 + $0x168] sm:$0xff] }
  0x26   : > { %1637 = vmatpush1.bf16.msra.mxu0 %v1636_v55  ;;  %v1668_v55 = vpack.c.bf16 %v707_v52, %v699_v51  ;;  %v669_v51 = vld [vmem:[%s2602_s5 + $0x120] sm:$0xff] }
  0x27   : > { %1639 = vmatprep.subr.bf16.mxu0 %v1638_v56  ;;  %v1670_v56 = vpack.c.bf16 %v724_v54, %v716_v53 }
  0x2a   : > { %1641 = vmatpush1.bf16.msra.mxu0 %v1640_v61  ;;  %v1672_v61 = vpack.c.bf16 %v723_v58, %v715_v57  ;;  %v679_v57 = vld [vmem:[%s2602_s5 + $0x170] sm:$0xff]  ;;  %v1690_v58 = vpack.c.bf16 %v678_v46, %v670_v45 }
  0x2b   : > { %1643 = vmatprep.subr.bf16.mxu0 %v1642_v62  ;;  %v1674_v62 = vpack.c.bf16 %v740_v60, %v732_v59 }
  0x2e   : > { %1645 = vmatpush1.bf16.msra.mxu0 %v1644_v1  ;;  %v1676_v1 = vpack.c.bf16 %v739_v0, %v731_v63  ;;  %v688_v63 = vld [vmem:[%s2602_s5 + $0x1b8] sm:$0xff] }
  0x2f   : > { %v696_v0 = vld [vmem:[%s2602_s5 + $0x1f8] sm:$0xff] }
  0xe7   : > { %v1564_v3 = vpop.f32.mrb[0].mxu0 }
  0xe8   : > { %v439_v4 = vadd.f32 %v1564_v3, %v1513_v2  ;;  %v433_v5 = vpop.f32.mrb[1].mxu0  ;;  %v754_v3 = vld [vmem:[%s2602_s5 + $0x3c8] sm:$0xff] }
  0xe9   : > { %v434_v8 = vadd.f32 %v1513_v2, %v433_v5 }
  0xea   : > { %v473_v14 = vmax.f32 %v439_v4, 0.0  ;;  %v748_v4 = vld [vmem:[%s2602_s5 + $0x398] sm:$0xff] }
  0xeb   : > { %v472_v11 = vmax.f32 %v434_v8, 0.0  ;;  %v1567_v12 = vpop.f32.mrb[2].mxu0  ;;  %v1648_v8 = vpack.c.bf16 %v753_v7, %v745_v6  ;;  %v693_v6 = vld [vmem:[%s2602_s5 + $0x1e0] sm:$0xff]  ;;  %v687_v7 = vld [vmem:[%s2602_s5 + $0x1b0] sm:$0xff] }
  0xec   : > { %v449_v15 = vadd.f32 %v1567_v12, %v1513_v2  ;;  %v443_v16 = vpop.f32.mrb[3].mxu0  ;;  %v1678_v12 = vpack.c.bf16 %v756_v9, %v748_v4 }
  0xed   : > { %v444_v20 = vadd.f32 %v1513_v2, %v443_v16  ;;  %1590 = vmatprep.mubr.msk.f32.mxu1 %vm495_vm2, %v472_v11  ;;  %v755_v11 = vld [vmem:[%s2602_s5 + $0x3d0] sm:$0xff]  ;;  %v640_v16 = vld [vmem:[%s2602_s5 + $0x38] sm:$0xff] }
  0xee   : > { %v475_v23 = vmax.f32 %v449_v15, 0.0  ;;  %1591 = vmatmul.mubr.msk.f32.vlgmr.msra.gmra.mrb[0].mxu1 %vm495_vm2, %v473_v14  ;;  %v638_v14 = vld [vmem:[%s2602_s5 + $0x28] sm:$0xff] }
  0xef   : > { %v474_v24 = vmax.f32 %v444_v20, 0.0  ;;  %v1570_v25 = vpop.f32.mrb[4].mxu0  ;;  %1653 = vmatpush1.bf16.msra.mxu1 %v1652_v13  ;;  %v1680_v13 = vpack.c.bf16 %v755_v11, %v747_v10  ;;  %v646_v15 = vld [vmem:[%s2602_s5 + $0x68] sm:$0xff]  ;;  %v2131_v20 = vpack.c.bf16 %v648_v18, %v640_v16  ;;  %v2260_v11 = vpack.c.bf16 %v696_v0, %v688_v63  ;;  %v712_v16 = vld [vmem:[%s2602_s5 + $0x278] sm:$0xff] }
  0xf0   : > { %v459_v27 = vadd.f32 %v1570_v25, %v1513_v2  ;;  %v453_v28 = vpop.f32.mrb[5].mxu0  ;;  %1655 = vmatprep.subr.bf16.mxu1 %v1654_v17  ;;  %v1682_v17 = vpack.c.bf16 %v646_v15, %v638_v14  ;;  %v639_v25 = vld [vmem:[%s2602_s5 + $0x30] sm:$0xff]  ;;  %v710_v14 = vld [vmem:[%s2602_s5 + $0x268] sm:$0xff]  ;;  %v704_v15 = vld [vmem:[%s2602_s5 + $0x238] sm:$0xff] }
  0xf1   : > { %1593 = vmatprep.mubr.msk.f32.mxu1 %vm495_vm2, %v474_v24  ;;  %v454_v32 = vadd.f32 %v1513_v2, %v453_v28  ;;  %v645_v24 = vld [vmem:[%s2602_s5 + $0x60] sm:$0xff]  ;;  %v654_v28 = vld [vmem:[%s2602_s5 + $0xa8] sm:$0xff] }
  0xf2   : > { %1594 = vmatmul.mubr.msk.f32.gmra.mrb[2].mxu1 %vm495_vm2, %v475_v23  ;;  %v477_v35 = vmax.f32 %v459_v27, 0.0  ;;  %v1684_v33 = vpack.c.bf16 %v645_v24, %v637_v22  ;;  %v1686_v43 = vpack.c.bf16 %v662_v30, %v654_v28  ;;  %v701_v22 = vld [vmem:[%s2602_s5 + $0x220] sm:$0xff]  ;;  %v718_v30 = vld [vmem:[%s2602_s5 + $0x2a8] sm:$0xff] }
  0xf3   : > { %v476_v36 = vmax.f32 %v454_v32, 0.0  ;;  %v1573_v37 = vpop.f32.mrb[6].mxu0  ;;  %1657 = vmatpush1.bf16.msra.mxu1 %v1656_v26  ;;  %v647_v26 = vld [vmem:[%s2602_s5 + $0x70] sm:$0xff]  ;;  %v664_v32 = vld [vmem:[%s2602_s5 + $0xf8] sm:$0xff]  ;;  %v750_v0 = vld [vmem:[%s2602_s5 + $0x3a8] sm:$0xff] }
  0xf4   : > { %v469_v39 = vadd.f32 %v1573_v37, %v1513_v2  ;;  %v463_v40 = vpop.f32.mrb[7].mxu0  ;;  %1659 = vmatprep.subr.bf16.mxu1 %v1658_v29  ;;  %v2165_v34 = vpack.c.bf16 %v647_v26, %v639_v25  ;;  %v709_v25 = vld [vmem:[%s2602_s5 + $0x260] sm:$0xff]  ;;  %v703_v26 = vld [vmem:[%s2602_s5 + $0x230] sm:$0xff] }
  0xf5   : > { %1596 = vmatprep.mubr.msk.f32.mxu1 %vm495_vm2, %v476_v36  ;;  %v464_v44 = vadd.f32 %v1513_v2, %v463_v40  ;;  %v746_v2 = vld [vmem:[%s2602_s5 + $0x388] sm:$0xff]  ;;  %v655_v40 = vld [vmem:[%s2602_s5 + $0xb0] sm:$0xff] }
  0xf6   : > { %1597 = vmatmul.mubr.msk.f32.gmra.mrb[4].mxu1 %vm495_vm2, %v477_v35  ;;  %v479_v47 = vmax.f32 %v469_v39, 0.0  ;;  %v1646_v5 = vpack.c.bf16 %v754_v3, %v746_v2  ;;  %v653_v35 = vld [vmem:[%s2602_s5 + $0xa0] sm:$0xff] }
  0xf7   : > { %v478_v48 = vmax.f32 %v464_v44, 0.0  ;;  %1661 = vmatpush1.bf16.msra.mxu1 %v1660_v38  ;;  %v661_v39 = vld [vmem:[%s2602_s5 + $0xe0] sm:$0xff]  ;;  %v2182_v44 = vpack.c.bf16 %v664_v32, %v656_v31  ;;  %v726_v31 = vld [vmem:[%s2602_s5 + $0x2e8] sm:$0xff]  ;;  %v720_v32 = vld [vmem:[%s2602_s5 + $0x2b8] sm:$0xff] }
  0xf8   : > { %1663 = vmatprep.subr.bf16.mxu1 %v1662_v41  ;;  %1647 = vmatprep.subr.bf16.mxu0 %v1646_v5  ;;  %v663_v41 = vld [vmem:[%s2602_s5 + $0xf0] sm:$0xff]  ;;  %v685_v3 = vld [vmem:[%s2602_s5 + $0x1a0] sm:$0xff]  ;;  %v1702_v45 = vpack.c.bf16 %v726_v31, %v718_v30 }
  0xf9   : > { %1599 = vmatprep.mubr.msk.f32.mxu1 %vm495_vm2, %v478_v48  ;;  %1649 = vmatpush1.bf16.msra.mxu0 %v1648_v8  ;;  %v680_v48 = vld [vmem:[%s2602_s5 + $0x178] sm:$0xff]  ;;  %v695_v8 = vld [vmem:[%s2602_s5 + $0x1f0] sm:$0xff] }
  0xfa   : > { %1600 = vmatmul.mubr.msk.f32.gmra.mrb[6].mxu1 %vm495_vm2, %v479_v47  ;;  %1683 = vmatprep.subr.bf16.mxu0 %v1682_v17  ;;  %v672_v47 = vld [vmem:[%s2602_s5 + $0x138] sm:$0xff]  ;;  %v1696_v17 = vpack.c.bf16 %v693_v6, %v685_v3  ;;  %v2277_v18 = vpack.c.bf16 %v695_v8, %v687_v7  ;;  %v749_v8 = vld [vmem:[%s2602_s5 + $0x3a0] sm:$0xff] }
  0xfb   : > { %1665 = vmatpush1.bf16.msra.mxu1 %v1664_v49  ;;  %980 = vmatprep.mubr.f32.mxu1 %v1813_v19  ;;  %v1688_v49 = vpack.c.bf16 %v661_v39, %v653_v35  ;;  %v2221_v60 = vpack.c.bf16 %v680_v48, %v672_v47  ;;  %v1700_v35 = vpack.c.bf16 %v709_v25, %v701_v22  ;;  %v734_v47 = vld [vmem:[%s2602_s5 + $0x328] sm:$0xff]  ;;  %v752_v3 = vld [vmem:[%s2602_s5 + $0x3b8] sm:$0xff] }
  0xfc   : > { %1667 = vmatprep.subr.bf16.mxu1 %v1666_v50  ;;  %v2199_v50 = vpack.c.bf16 %v663_v41, %v655_v40  ;;  %v725_v41 = vld [vmem:[%s2602_s5 + $0x2e0] sm:$0xff]  ;;  %v742_v48 = vld [vmem:[%s2602_s5 + $0x368] sm:$0xff] }
  0xff   : > { %1669 = vmatpush1.bf16.msra.mxu1 %v1668_v55  ;;  %v677_v55 = vld [vmem:[%s2602_s5 + $0x160] sm:$0xff] }
 0x100   : > { %1671 = vmatprep.subr.bf16.mxu1 %v1670_v56  ;;  %v671_v56 = vld [vmem:[%s2602_s5 + $0x130] sm:$0xff] }
 0x101   : > { %v2238_v2 = vpack.c.bf16 %v679_v57, %v671_v56 }
 0x103   : > { %1673 = vmatpush1.bf16.msra.mxu1 %v1672_v61  ;;  %v686_v61 = vld [vmem:[%s2602_s5 + $0x1a8] sm:$0xff] }
 0x104   : > { %1675 = vmatprep.subr.bf16.mxu1 %v1674_v62  ;;  %v694_v62 = vld [vmem:[%s2602_s5 + $0x1e8] sm:$0xff] }
 0x105   : > { %v1694_v10 = vpack.c.bf16 %v694_v62, %v686_v61  ;;  %v743_v61 = vld [vmem:[%s2602_s5 + $0x370] sm:$0xff]  ;;  %v1706_v62 = vpack.c.bf16 %v742_v48, %v734_v47 }
 0x107   : > { %1677 = vmatpush1.bf16.msra.mxu1 %v1676_v1  ;;  %v1692_v1 = vpack.c.bf16 %v677_v55, %v669_v51  ;;  %v744_v51 = vld [vmem:[%s2602_s5 + $0x378] sm:$0xff]  ;;  %v733_v55 = vld [vmem:[%s2602_s5 + $0x320] sm:$0xff] }
 0x108   : > { %1679 = vmatprep.subr.bf16.mxu1 %v1678_v12  ;;  %v702_v12 = vld [vmem:[%s2602_s5 + $0x228] sm:$0xff] }
 0x109   : > { %v1698_v28 = vpack.c.bf16 %v710_v14, %v702_v12  ;;  %v751_v14 = vld [vmem:[%s2602_s5 + $0x3b0] sm:$0xff] }
 0x10b   : > { %1681 = vmatpush1.bf16.msra.mxu1 %v1680_v13 }
 0x10c   : > { %1746 = vmatprep.subr.bf16.mxu1 %v2131_v20 }
 0x1c1   : > { %v1592_v23 = vpop.f32.mrb[0].mxu1 }
 0x1c2   : > { %v586_v27 = vpop.f32.mrb[1].mxu1  ;;  %v592_v36 = vadd.f32 %v1592_v23, %v2138_v21 }
 0x1c3   : > { %v587_v29 = vadd.f32 %v2138_v21, %v586_v27  ;;  %v711_v27 = vld [vmem:[%s2602_s5 + $0x270] sm:$0xff] }
 0x1c4   : > { %v2204_v52 = vmax.f32 %v592_v36, 0.0  ;;  %v2314_v36 = vpack.c.bf16 %v711_v27, %v703_v26 }
 0x1c5   : > { %v2171_v37 = vmax.f32 %v587_v29, 0.0  ;;  %v1595_v38 = vpop.f32.mrb[2].mxu1  ;;  %v2297_v29 = vpack.c.bf16 %v712_v16, %v704_v15  ;;  %v759_v15 = vld [vmem:[%s2602_s5 + $0x3f0] sm:$0xff] }
 0x1c6   : > { %v596_v42 = vpop.f32.mrb[3].mxu1  ;;  %v602_v4 = vadd.f32 %v1595_v38, %v2138_v21  ;;  %v717_v38 = vld [vmem:[%s2602_s5 + $0x2a0] sm:$0xff] }
 0x1c7   : > { %868 = vmatmul.mubr.f32.vlgmr.msra.gmra.mrb[8].mxu0 %v2171_v37  ;;  %981 = vmatmul.mubr.f32.vlgmr.msra.gmra.mrb[8].mxu1 %v2171_v37  ;;  %v597_v53 = vadd.f32 %v2138_v21, %v596_v42  ;;  %v719_v42 = vld [vmem:[%s2602_s5 + $0x2b0] sm:$0xff] }
 0x1c8   : > { %1685 = vmatpush1.bf16.msra.mxu0 %v1684_v33  ;;  %1754 = vmatpush1.bf16.msra.mxu1 %v2165_v34  ;;  %v2282_v23 = vmax.f32 %v602_v4, 0.0  ;;  %v728_v33 = vld [vmem:[%s2602_s5 + $0x2f8] sm:$0xff] }
 0x1c9   : > { %873 = vmatprep.mubr.f32.mxu0 %v1813_v19  ;;  %986 = vmatprep.mubr.f32.mxu1 %v1813_v19  ;;  %v2209_v54 = vpop.f32.mrb[4].mxu1  ;;  %v2244_v5 = vmax.f32 %v597_v53, 0.0  ;;  %v2335_v46 = vpack.c.bf16 %v728_v33, %v720_v32  ;;  %v1704_v53 = vpack.c.bf16 %v725_v41, %v717_v38  ;;  %v760_v4 = vld [vmem:[%s2602_s5 + $0x3f8] sm:$0xff] }
 0x1ca   : > { %1687 = vmatprep.subr.bf16.mxu0 %v1686_v43  ;;  %1747 = vmatprep.subr.bf16.mxu1 %v2182_v44  ;;  %v606_v59 = vpop.f32.mrb[5].mxu1  ;;  %v612_v39 = vadd.f32 %v2209_v54, %v2138_v21  ;;  %v727_v43 = vld [vmem:[%s2602_s5 + $0x2f0] sm:$0xff] }
 0x1cb   : > { %874 = vmatmul.mubr.f32.gmra.mrb[10].mxu0 %v2204_v52  ;;  %987 = vmatmul.mubr.f32.gmra.mrb[10].mxu1 %v2204_v52  ;;  %v607_v24 = vadd.f32 %v2138_v21, %v606_v59  ;;  %v2352_v54 = vpack.c.bf16 %v727_v43, %v719_v42  ;;  %v735_v59 = vld [vmem:[%s2602_s5 + $0x330] sm:$0xff] }
 0x1cc   : > { %1689 = vmatpush1.bf16.msra.mxu0 %v1688_v49  ;;  %1755 = vmatpush1.bf16.msra.mxu1 %v2199_v50  ;;  %v736_v49 = vld [vmem:[%s2602_s5 + $0x338] sm:$0xff]  ;;  %v2357_v56 = vmax.f32 %v612_v39, 0.0  ;;  %v2389_v7 = vpack.c.bf16 %v743_v61, %v735_v59 }
 0x1cd   : > { %879 = vmatprep.mubr.f32.mxu0 %v1813_v19  ;;  %992 = vmatprep.mubr.f32.mxu1 %v1813_v19  ;;  %v2257_v9 = vpop.f32.mrb[6].mxu1  ;;  %v2321_v40 = vmax.f32 %v607_v24, 0.0  ;;  %v2372_v63 = vpack.c.bf16 %v744_v51, %v736_v49 }
 0x1ce   : > { %1691 = vmatprep.subr.bf16.mxu0 %v1690_v58  ;;  %1748 = vmatprep.subr.bf16.mxu1 %v2221_v60  ;;  %v616_v13 = vpop.f32.mrb[7].mxu1  ;;  %v741_v58 = vld [vmem:[%s2602_s5 + $0x360] sm:$0xff] }
 0x1cf   : > { %880 = vmatmul.mubr.f32.gmra.mrb[12].mxu0 %v2244_v5  ;;  %993 = vmatmul.mubr.f32.gmra.mrb[12].mxu1 %v2244_v5  ;;  %v617_v57 = vadd.f32 %v2138_v21, %v616_v13  ;;  %v1708_v6 = vpack.c.bf16 %v741_v58, %v733_v55  ;;  %v757_v13 = vld [vmem:[%s2602_s5 + $0x3e0] sm:$0xff] }
 0x1d0   : > { %1693 = vmatpush1.bf16.msra.mxu0 %v1692_v1  ;;  %1756 = vmatpush1.bf16.msra.mxu1 %v2238_v2  ;;  %v758_v1 = vld [vmem:[%s2602_s5 + $0x3e8] sm:$0xff]  ;;  %v1712_v16 = vpack.c.bf16 %v757_v13, %v749_v8 }
 0x1d1   : > { %885 = vmatprep.mubr.f32.mxu0 %v1813_v19  ;;  %998 = vmatprep.mubr.f32.mxu1 %v1813_v19  ;;  %v2396_v12 = vmax.f32 %v617_v57, 0.0 }
 0x1d2   : > { %1695 = vmatprep.subr.bf16.mxu0 %v1694_v10  ;;  %1749 = vmatprep.subr.bf16.mxu1 %v2260_v11  ;;  %v622_v10 = vadd.f32 %v2257_v9, %v2138_v21  ;;  %v1710_v21 = vpack.c.bf16 %v758_v1, %v750_v0  ;;  %v1742_v9 = vpack.c.bf16 %v760_v4, %v752_v3 }
 0x1d3   : > { %886 = vmatmul.mubr.f32.gmra.mrb[14].mxu0 %v2282_v23  ;;  %999 = vmatmul.mubr.f32.gmra.mrb[14].mxu1 %v2282_v23 }
 0x1d4   : > { %1697 = vmatpush1.bf16.msra.mxu0 %v1696_v17  ;;  %1757 = vmatpush1.bf16.msra.mxu1 %v2277_v18  ;;  %v1744_v17 = vpack.c.bf16 %v759_v15, %v751_v14  ;;  %v632_v22 = vmax.f32 %v622_v10, 0.0 }
 0x1d5   : > { %891 = vmatprep.mubr.f32.mxu0 %v1813_v19  ;;  %1004 = vmatprep.mubr.f32.mxu1 %v1813_v19 }
 0x1d6   : > { %1699 = vmatprep.subr.bf16.mxu0 %v1698_v28  ;;  %1750 = vmatprep.subr.bf16.mxu1 %v2297_v29 }
 0x1d7   : > { %892 = vmatmul.mubr.f32.gmra.mrb[16].mxu0 %v2321_v40  ;;  %1005 = vmatmul.mubr.f32.gmra.mrb[16].mxu1 %v2321_v40 }
 0x1d8   : > { %1701 = vmatpush1.bf16.msra.mxu0 %v1700_v35  ;;  %1758 = vmatpush1.bf16.msra.mxu1 %v2314_v36 }
 0x1d9   : > { %897 = vmatprep.mubr.f32.mxu0 %v1813_v19  ;;  %1010 = vmatprep.mubr.f32.mxu1 %v1813_v19 }
 0x1da   : > { %1703 = vmatprep.subr.bf16.mxu0 %v1702_v45  ;;  %1751 = vmatprep.subr.bf16.mxu1 %v2335_v46 }
 0x1db   : > { %898 = vmatmul.mubr.f32.gmra.mrb[18].mxu0 %v2357_v56  ;;  %1011 = vmatmul.mubr.f32.gmra.mrb[18].mxu1 %v2357_v56 }
 0x1dc   : > { %1705 = vmatpush1.bf16.msra.mxu0 %v1704_v53  ;;  %1759 = vmatpush1.bf16.msra.mxu1 %v2352_v54 }
 0x1dd   : > { %903 = vmatprep.mubr.f32.mxu0 %v1813_v19  ;;  %1016 = vmatprep.mubr.f32.mxu1 %v1813_v19 }
 0x1de   : > { %1707 = vmatprep.subr.bf16.mxu0 %v1706_v62  ;;  %1752 = vmatprep.subr.bf16.mxu1 %v2372_v63 }
 0x1df   : > { %904 = vmatmul.mubr.f32.gmra.mrb[20].mxu0 %v2396_v12  ;;  %1017 = vmatmul.mubr.f32.gmra.mrb[20].mxu1 %v2396_v12 }
 0x1e0   : > { %1709 = vmatpush1.bf16.msra.mxu0 %v1708_v6  ;;  %1760 = vmatpush1.bf16.msra.mxu1 %v2389_v7 }
 0x1e1   : > { %909 = vmatprep.mubr.f32.mxu0 %v1813_v19  ;;  %1022 = vmatprep.mubr.f32.mxu1 %v1813_v19 }
 0x1e2   : > { %1711 = vmatprep.subr.bf16.mxu0 %v1710_v21  ;;  %1753 = vmatprep.subr.bf16.mxu1 %v1742_v9 }
 0x1e3   : > { %910 = vmatmul.mubr.f32.gmra.mrb[22].mxu0 %v632_v22  ;;  %1023 = vmatmul.mubr.f32.gmra.mrb[22].mxu1 %v632_v22 }
 0x1e4   : > { %1713 = vmatpush1.bf16.msra.mxu0 %v1712_v16  ;;  %1761 = vmatpush1.bf16.msra.mxu1 %v1744_v17 }
 0x1e5   : > { %1093 = vmatprep.mubr.f32.mxu0 %v1813_v19  ;;  %1715 = vmatprep.subr.bf16.mxu0 %v2131_v20  ;;  %v763_v20 = vlaneseq }
 0x1e6   : > { %1212 = vmatprep.mubr.f32.mxu1 %v1813_v19 }
 0x1e7   : > { %1094 = vmatmul.mubr.f32.vlgmr.msra.gmra.mrb[24].mxu0 %v2171_v37  ;;  %1213 = vmatmul.mubr.f32.vlgmr.msra.gmra.mrb[24].mxu1 %v2204_v52 }
 0x1e8   : > { %1717 = vmatpush1.bf16.msra.mxu0 %v2165_v34  ;;  %1099 = vmatprep.mubr.f32.mxu0 %v1813_v19  ;;  %v2459_v34 = vshrl.u32 %v763_v20, 7 }
 0x1e9   : > { %1719 = vmatprep.subr.bf16.mxu0 %v2182_v44  ;;  %1218 = vmatprep.mubr.f32.mxu1 %v1813_v19 }
 0x1ea   : > { %v765_v44 = vsub.s32 0, %v2459_v34 }
 0x1eb   : > { %1100 = vmatmul.mubr.f32.gmra.mrb[26].mxu0 %v2204_v52  ;;  %1219 = vmatmul.mubr.f32.gmra.mrb[26].mxu1 %v2244_v5  ;;  %v2466_v52 = vld [vmem:[%s2603_s6] sm:$0xff] }
 0x1ec   : > { %1721 = vmatpush1.bf16.msra.mxu0 %v2199_v50  ;;  %1105 = vmatprep.mubr.f32.mxu0 %v1813_v19  ;;  %v773_v50 = vsub.s32 2, %v2459_v34 }
 0x1ed   : > { %1723 = vmatprep.subr.bf16.mxu0 %v2221_v60  ;;  %1224 = vmatprep.mubr.f32.mxu1 %v1813_v19  ;;  %v769_v60 = vsub.s32 1, %v2459_v34 }
 0x1ef   : > { %1106 = vmatmul.mubr.f32.gmra.mrb[28].mxu0 %v2244_v5  ;;  %1225 = vmatmul.mubr.f32.gmra.mrb[28].mxu1 %v2282_v23  ;;  %v2477_v24 = vrot.slane %v2466_v52, %v769_v60 }
 0x1f0   : > { %1725 = vmatpush1.bf16.msra.mxu0 %v2238_v2  ;;  %1111 = vmatprep.mubr.f32.mxu0 %v1813_v19  ;;  %v777_v2 = vsub.s32 3, %v2459_v34 }
 0x1f1   : > { %1727 = vmatprep.subr.bf16.mxu0 %v2260_v11  ;;  %1230 = vmatprep.mubr.f32.mxu1 %v1813_v19  ;;  %v2474_v11 = vrot.slane %v2466_v52, %v773_v50 }
 0x1f2   : > { %v2480_v25 = vrot.slane %v2466_v52, %v777_v2 }
 0x1f3   : > { %1112 = vmatmul.mubr.f32.gmra.mrb[30].mxu0 %v2282_v23  ;;  %1231 = vmatmul.mubr.f32.gmra.mrb[30].mxu1 %v2321_v40 }
 0x1f4   : > { %1729 = vmatpush1.bf16.msra.mxu0 %v2277_v18  ;;  %1117 = vmatprep.mubr.f32.mxu0 %v1813_v19 }
 0x1f5   : > { %1731 = vmatprep.subr.bf16.mxu0 %v2297_v29  ;;  %1236 = vmatprep.mubr.f32.mxu1 %v1813_v19 }
 0x1f7   : > { %1118 = vmatmul.mubr.f32.gmra.mrb[32].mxu0 %v2321_v40  ;;  %1237 = vmatmul.mubr.f32.gmra.mrb[32].mxu1 %v2357_v56 }
 0x1f8   : > { %1733 = vmatpush1.bf16.msra.mxu0 %v2314_v36  ;;  %1123 = vmatprep.mubr.f32.mxu0 %v1813_v19 }
 0x1f9   : > { %1735 = vmatprep.subr.bf16.mxu0 %v2335_v46  ;;  %1242 = vmatprep.mubr.f32.mxu1 %v1813_v19 }
 0x1fb   : > { %1124 = vmatmul.mubr.f32.gmra.mrb[34].mxu0 %v2357_v56  ;;  %1243 = vmatmul.mubr.f32.gmra.mrb[34].mxu1 %v2396_v12 }
 0x1fc   : > { %1737 = vmatpush1.bf16.msra.mxu0 %v2352_v54  ;;  %1129 = vmatprep.mubr.f32.mxu0 %v1813_v19 }
 0x1fd   : > { %1739 = vmatprep.subr.bf16.mxu0 %v2372_v63  ;;  %1248 = vmatprep.mubr.f32.mxu1 %v1813_v19 }
 0x1ff   : > { %1130 = vmatmul.mubr.f32.gmra.mrb[36].mxu0 %v2396_v12  ;;  %1249 = vmatmul.mubr.f32.gmra.mrb[36].mxu1 %v632_v22 }
 0x200   : > { %1741 = vmatpush1.bf16.msra.mxu0 %v2389_v7  ;;  %1135 = vmatprep.mubr.f32.mxu0 %v1813_v19 }
 0x201   : > { %1743 = vmatprep.subr.bf16.mxu0 %v1742_v9 }
 0x203   : > { %1136 = vmatmul.mubr.f32.gmra.mrb[38].mxu0 %v632_v22 }
 0x204   : > { %1745 = vmatpush1.bf16.msra.mxu0 %v1744_v17  ;;  %1206 = vmatprep.mubr.f32.mxu0 %v1813_v19 }
 0x207   : > { %1207 = vmatmul.mubr.f32.vlgmr.msra.gmra.mrb[40].mxu0 %v2171_v37  ;;  %v2471_v37 = vrot.slane %v2466_v52, %v765_v44 }
 0x29a   : > { %v869_v5 = vpop.f32.mrb[8].mxu0  ;;  %v982_v19 = vpop.f32.mrb[8].mxu1 }
 0x29b   : > { %v871_v18 = vpop.f32.mrb[9].mxu0  ;;  %v984_v23 = vpop.f32.mrb[9].mxu1  ;;  %v870_v28 = vadd.f32 %v869_v5, %v2471_v37  ;;  %v983_v29 = vadd.f32 %v982_v19, %v2474_v11 }
 0x29c   : > { %v872_v35 = vadd.f32 %v871_v18, %v2477_v24  ;;  %v985_v36 = vadd.f32 %v984_v23, %v2480_v25 }
 0x29e   : > { %v875_v26 = vpop.f32.mrb[10].mxu0  ;;  %v988_v27 = vpop.f32.mrb[10].mxu1 }
 0x29f   : > { %v876_v30 = vadd.f32 %v875_v26, %v2471_v37  ;;  %v989_v31 = vadd.f32 %v988_v27, %v2474_v11  ;;  %v877_v32 = vpop.f32.mrb[11].mxu0  ;;  %v990_v33 = vpop.f32.mrb[11].mxu1 }
 0x2a0   : > { %v878_v38 = vadd.f32 %v877_v32, %v2477_v24  ;;  %v991_v39 = vadd.f32 %v990_v33, %v2480_v25 }
 0x2a1   : > { %v1255_v40 = vmax.f32 %v870_v28, %v876_v30  ;;  %v1281_v41 = vmax.f32 %v983_v29, %v989_v31 }
 0x2a2   : > { %v1268_v42 = vmax.f32 %v872_v35, %v878_v38  ;;  %v1294_v43 = vmax.f32 %v985_v36, %v991_v39  ;;  %v881_v45 = vpop.f32.mrb[12].mxu0  ;;  %v994_v46 = vpop.f32.mrb[12].mxu1 }
 0x2a3   : > { %v882_v47 = vadd.f32 %v881_v45, %v2471_v37  ;;  %v995_v48 = vadd.f32 %v994_v46, %v2474_v11  ;;  %v883_v49 = vpop.f32.mrb[13].mxu0  ;;  %v996_v51 = vpop.f32.mrb[13].mxu1 }
 0x2a4   : > { %v884_v53 = vadd.f32 %v883_v49, %v2477_v24  ;;  %v997_v54 = vadd.f32 %v996_v51, %v2480_v25 }
 0x2a5   : > { %v1256_v55 = vmax.f32 %v1255_v40, %v882_v47  ;;  %v1282_v56 = vmax.f32 %v1281_v41, %v995_v48 }
 0x2a6   : > { %v1269_v57 = vmax.f32 %v1268_v42, %v884_v53  ;;  %v1295_v58 = vmax.f32 %v1294_v43, %v997_v54  ;;  %v887_v59 = vpop.f32.mrb[14].mxu0  ;;  %v1000_v61 = vpop.f32.mrb[14].mxu1 }
 0x2a7   : > { %v888_v62 = vadd.f32 %v887_v59, %v2471_v37  ;;  %v1001_v63 = vadd.f32 %v1000_v61, %v2474_v11  ;;  %v889_v0 = vpop.f32.mrb[15].mxu0  ;;  %v1002_v1 = vpop.f32.mrb[15].mxu1 }
 0x2a8   : > { %v890_v3 = vadd.f32 %v889_v0, %v2477_v24  ;;  %v1003_v4 = vadd.f32 %v1002_v1, %v2480_v25 }
 0x2a9   : > { %v1257_v6 = vmax.f32 %v1256_v55, %v888_v62  ;;  %v1283_v7 = vmax.f32 %v1282_v56, %v1001_v63  ;;  %v781_v55 = vsub.s32 4, %v2459_v34 }
 0x2aa   : > { %v1270_v8 = vmax.f32 %v1269_v57, %v890_v3  ;;  %v1296_v10 = vmax.f32 %v1295_v58, %v1003_v4  ;;  %v893_v12 = vpop.f32.mrb[16].mxu0  ;;  %v1006_v13 = vpop.f32.mrb[16].mxu1  ;;  %v785_v58 = vsub.s32 5, %v2459_v34 }
 0x2ab   : > { %v894_v14 = vadd.f32 %v893_v12, %v2471_v37  ;;  %v1007_v15 = vadd.f32 %v1006_v13, %v2474_v11  ;;  %v895_v21 = vpop.f32.mrb[17].mxu0  ;;  %v1008_v9 = vpop.f32.mrb[17].mxu1  ;;  %v1814_v13 = vmov 1966171168  }
 0x2ac   : > { %v896_v16 = vadd.f32 %v895_v21, %v2477_v24  ;;  %v1009_v17 = vadd.f32 %v1008_v9, %v2480_v25 }
 0x2ad   : > { %v1258_v22 = vmax.f32 %v1257_v6, %v894_v14  ;;  %v1284_v20 = vmax.f32 %v1283_v7, %v1007_v15  ;;  %v1378_v14 = vunpack.c.l.s4 %v1814_v13 }
 0x2ae   : > { %v1271_v44 = vmax.f32 %v1270_v8, %v896_v16  ;;  %v1297_v50 = vmax.f32 %v1296_v10, %v1009_v17  ;;  %v899_v60 = vpop.f32.mrb[18].mxu0  ;;  %v1012_v2 = vpop.f32.mrb[18].mxu1 }
 0x2af   : > { %v900_v5 = vadd.f32 %v899_v60, %v2471_v37  ;;  %v1013_v19 = vadd.f32 %v1012_v2, %v2474_v11  ;;  %v901_v18 = vpop.f32.mrb[19].mxu0  ;;  %v1014_v23 = vpop.f32.mrb[19].mxu1 }
 0x2b0   : > { %v902_v26 = vadd.f32 %v901_v18, %v2477_v24  ;;  %v1015_v27 = vadd.f32 %v1014_v23, %v2480_v25 }
 0x2b1   : > { %v1259_v28 = vmax.f32 %v1258_v22, %v900_v5  ;;  %v1285_v29 = vmax.f32 %v1284_v20, %v1013_v19 }
 0x2b2   : > { %v1272_v30 = vmax.f32 %v1271_v44, %v902_v26  ;;  %v1298_v31 = vmax.f32 %v1297_v50, %v1015_v27  ;;  %v905_v32 = vpop.f32.mrb[20].mxu0  ;;  %v1018_v33 = vpop.f32.mrb[20].mxu1 }
 0x2b3   : > { %v906_v35 = vadd.f32 %v905_v32, %v2471_v37  ;;  %v1019_v36 = vadd.f32 %v1018_v33, %v2474_v11  ;;  %v907_v38 = vpop.f32.mrb[21].mxu0  ;;  %v1020_v39 = vpop.f32.mrb[21].mxu1 }
 0x2b4   : > { %v908_v40 = vadd.f32 %v907_v38, %v2477_v24  ;;  %v1021_v41 = vadd.f32 %v1020_v39, %v2480_v25 }
 0x2b5   : > { %v1260_v42 = vmax.f32 %v1259_v28, %v906_v35  ;;  %v1286_v43 = vmax.f32 %v1285_v29, %v1019_v36  ;;  %v1379_v28 = vunpack.c.0.s8 %v1378_v14 }
 0x2b6   : > { %v1273_v45 = vmax.f32 %v1272_v30, %v908_v40  ;;  %v1299_v46 = vmax.f32 %v1298_v31, %v1021_v41  ;;  %v911_v47 = vpop.f32.mrb[22].mxu0  ;;  %v1024_v48 = vpop.f32.mrb[22].mxu1 }
 0x2b7   : > { %v912_v49 = vadd.f32 %v911_v47, %v2471_v37  ;;  %v1025_v51 = vadd.f32 %v1024_v48, %v2474_v11  ;;  %v913_v53 = vpop.f32.mrb[23].mxu0  ;;  %v1026_v54 = vpop.f32.mrb[23].mxu1  ;;  %v2519_v11 = vrot.slane %v2466_v52, %v781_v55  ;;  %v2541_v48 = vsub.s32 %v1379_v28, %v2459_v34 }
 0x2b8   : > { %v914_v56 = vadd.f32 %v913_v53, %v2477_v24  ;;  %v1027_v57 = vadd.f32 %v1026_v54, %v2480_v25  ;;  %v2524_v25 = vrot.slane %v2466_v52, %v785_v58 }
 0x2b9   : > { %v1261_v59 = vmax.f32 %v1260_v42, %v912_v49  ;;  %v1287_v61 = vmax.f32 %v1286_v43, %v1025_v51 }
 0x2ba   : > { %v1274_v62 = vmax.f32 %v1273_v45, %v914_v56  ;;  %v1300_v63 = vmax.f32 %v1299_v46, %v1027_v57  ;;  %v1095_v0 = vpop.f32.mrb[24].mxu0  ;;  %v2516_v1 = vpop.f32.mrb[24].mxu1 }
 0x2bb   : > { %v1262_v37 = vrot.slane %v1261_v59, 4  ;;  %v1288_v3 = vrot.slane %v1287_v61, 4  ;;  %v1097_v4 = vpop.f32.mrb[25].mxu0  ;;  %v2521_v6 = vpop.f32.mrb[25].mxu1  ;;  %v1096_v22 = vadd.f32 %v1095_v0, %v2519_v11 }
 0x2bc   : > { %v1275_v24 = vrot.slane %v1274_v62, 4  ;;  %v1301_v7 = vrot.slane %v1300_v63, 4  ;;  %v1098_v5 = vadd.f32 %v1097_v4, %v2524_v25 }
 0x2bd   : > { %v1263_v8 = vmax.f32 %v1261_v59, %v1262_v37  ;;  %v1289_v10 = vmax.f32 %v1287_v61, %v1288_v3 }
 0x2be   : > { %v1276_v12 = vmax.f32 %v1274_v62, %v1275_v24  ;;  %v1302_v15 = vmax.f32 %v1300_v63, %v1301_v7  ;;  %v1101_v21 = vpop.f32.mrb[26].mxu0  ;;  %v2526_v9 = vpop.f32.mrb[26].mxu1 }
 0x2bf   : > { %v1264_v16 = vrot.slane %v1263_v8, 2  ;;  %v1290_v17 = vrot.slane %v1289_v10, 2  ;;  %v1102_v20 = vadd.f32 %v1101_v21, %v2519_v11  ;;  %v1103_v44 = vpop.f32.mrb[27].mxu0  ;;  %v2530_v50 = vpop.f32.mrb[27].mxu1 }
 0x2c0   : > { %v1277_v60 = vrot.slane %v1276_v12, 2  ;;  %v1303_v2 = vrot.slane %v1302_v15, 2  ;;  %v1104_v19 = vadd.f32 %v1103_v44, %v2524_v25 }
 0x2c1   : > { %v1265_v18 = vmax.f32 %v1263_v8, %v1264_v16  ;;  %v1291_v23 = vmax.f32 %v1289_v10, %v1290_v17  ;;  %v1307_v26 = vmax.f32 %v1096_v22, %v1102_v20 }
 0x2c2   : > { %v1278_v27 = vmax.f32 %v1276_v12, %v1277_v60  ;;  %v1304_v29 = vmax.f32 %v1302_v15, %v1303_v2  ;;  %v1320_v30 = vmax.f32 %v1098_v5, %v1104_v19  ;;  %v1107_v31 = vpop.f32.mrb[28].mxu0  ;;  %v2534_v32 = vpop.f32.mrb[28].mxu1  ;;  %v789_v19 = vsub.s32 6, %v2459_v34 }
 0x2c3   : > { %v1266_v33 = vrot.slane %v1265_v18, 1  ;;  %v1292_v35 = vrot.slane %v1291_v23, 1  ;;  %v1108_v36 = vadd.f32 %v1107_v31, %v2519_v11  ;;  %v1109_v38 = vpop.f32.mrb[29].mxu0  ;;  %v2537_v39 = vpop.f32.mrb[29].mxu1 }
 0x2c4   : > { %v1279_v40 = vrot.slane %v1278_v27, 1  ;;  %v1305_v41 = vrot.slane %v1304_v29, 1  ;;  %v1110_v42 = vadd.f32 %v1109_v38, %v2524_v25 }
 0x2c5   : > { %v1267_v43 = vmax.f32 %v1265_v18, %v1266_v33  ;;  %v1293_v45 = vmax.f32 %v1291_v23, %v1292_v35  ;;  %v1308_v46 = vmax.f32 %v1307_v26, %v1108_v36  ;;  %v790_v33 = vrot.slane %v2466_v52, %v789_v19 }
 0x2c6   : > { %v1280_v47 = vmax.f32 %v1278_v27, %v1279_v40  ;;  %v1306_v49 = vmax.f32 %v1304_v29, %v1305_v41  ;;  %v1321_v51 = vmax.f32 %v1320_v30, %v1110_v42  ;;  %v1113_v53 = vpop.f32.mrb[30].mxu0  ;;  %v2543_v54 = vpop.f32.mrb[30].mxu1  ;;  %v793_v27 = vsub.s32 7, %v2459_v34 }
 0x2c7   : > { %v1114_v55 = vadd.f32 %v1113_v53, %v2519_v11  ;;  %v1115_v56 = vpop.f32.mrb[31].mxu0  ;;  %v2546_v57 = vpop.f32.mrb[31].mxu1 }
 0x2c8   : > { %v1373_v58 = vcombine.low %v1267_v43, %v1280_v47  ;;  %v1374_v59 = vcombine.low %v1293_v45, %v1306_v49  ;;  %v1116_v61 = vadd.f32 %v1115_v56, %v2524_v25  ;;  %v794_v38 = vrot.slane %v2466_v52, %v793_v27 }
 0x2c9   : > { %v1309_v62 = vmax.f32 %v1308_v46, %v1114_v55  ;;  %v1215_v45 = vadd.f32 %v2516_v1, %v790_v33  ;;  %v1221_v55 = vadd.f32 %v2526_v9, %v790_v33 }
 0x2ca   : > { %v2550_v63 = vrot.slane %v1373_v58, %v2541_v48  ;;  %v2553_v0 = vrot.slane %v1374_v59, %v2541_v48  ;;  %v1322_v37 = vmax.f32 %v1321_v51, %v1116_v61  ;;  %v1119_v3 = vpop.f32.mrb[32].mxu0  ;;  %v1238_v4 = vpop.f32.mrb[32].mxu1  ;;  %v1217_v49 = vadd.f32 %v2521_v6, %v794_v38 }
 0x2cb   : > { %v1120_v24 = vadd.f32 %v1119_v3, %v2519_v11  ;;  %v1121_v7 = vpop.f32.mrb[33].mxu0  ;;  %v1240_v8 = vpop.f32.mrb[33].mxu1  ;;  %v1223_v52 = vadd.f32 %v2530_v50, %v794_v38  ;;  %v1227_v59 = vadd.f32 %v2534_v32, %v790_v33  ;;  %v1229_v1 = vadd.f32 %v2537_v39, %v794_v38 }
 0x2cc   : > { %v1405_v10 = vcombine.low %v2550_v63, %v2553_v0  ;;  %v1122_v12 = vadd.f32 %v1121_v7, %v2524_v25  ;;  %v1233_v6 = vadd.f32 %v2543_v54, %v790_v33  ;;  %v1235_v9 = vadd.f32 %v2546_v57, %v794_v38 }
 0x2cd   : > { %v1310_v13 = vmax.f32 %v1309_v62, %v1120_v24 }
 0x2ce   : > { %v1323_v14 = vmax.f32 %v1322_v37, %v1122_v12  ;;  %v1125_v15 = vpop.f32.mrb[34].mxu0  ;;  %v1244_v21 = vpop.f32.mrb[34].mxu1 }
 0x2cf   : > { %v1126_v16 = vadd.f32 %v1125_v15, %v2519_v11  ;;  %v1127_v17 = vpop.f32.mrb[35].mxu0  ;;  %v1246_v22 = vpop.f32.mrb[35].mxu1 }
 0x2d0   : > { %v1128_v20 = vadd.f32 %v1127_v17, %v2524_v25  ;;  %v1247_v39 = vadd.f32 %v1246_v22, %v794_v38 }
 0x2d1   : > { %v1311_v44 = vmax.f32 %v1310_v13, %v1126_v16  ;;  %v1241_v16 = vadd.f32 %v1240_v8, %v794_v38 }
 0x2d2   : > { %v1324_v60 = vmax.f32 %v1323_v14, %v1128_v20  ;;  %v1131_v2 = vpop.f32.mrb[36].mxu0  ;;  %v1250_v5 = vpop.f32.mrb[36].mxu1  ;;  %v1239_v14 = vadd.f32 %v1238_v4, %v790_v33  ;;  %v1245_v20 = vadd.f32 %v1244_v21, %v790_v33 }
 0x2d3   : > { %v1132_v18 = vadd.f32 %v1131_v2, %v2519_v11  ;;  %v1133_v23 = vpop.f32.mrb[37].mxu0  ;;  %v1252_v26 = vpop.f32.mrb[37].mxu1 }
 0x2d4   : > { %v1134_v28 = vadd.f32 %v1133_v23, %v2524_v25  ;;  %v1253_v23 = vadd.f32 %v1252_v26, %v794_v38 }
 0x2d5   : > { %v1312_v29 = vmax.f32 %v1311_v44, %v1132_v18  ;;  %v1251_v18 = vadd.f32 %v1250_v5, %v790_v33 }
 0x2d6   : > { %v1325_v30 = vmax.f32 %v1324_v60, %v1134_v28  ;;  %v1137_v31 = vpop.f32.mrb[38].mxu0 }
 0x2d7   : > { %v1138_v35 = vadd.f32 %v1137_v31, %v2519_v11  ;;  %v1139_v36 = vpop.f32.mrb[39].mxu0 }
 0x2d8   : > { %v1140_v40 = vadd.f32 %v1139_v36, %v2524_v25 }
 0x2d9   : > { %v1313_v41 = vmax.f32 %v1312_v29, %v1138_v35 }
 0x2da   : > { %v1326_v42 = vmax.f32 %v1325_v30, %v1140_v40  ;;  %v1208_v43 = vpop.f32.mrb[40].mxu0 }
 0x2db   : > { %v1314_v34 = vrot.slane %v1313_v41, 4  ;;  %v1209_v46 = vadd.f32 %v1208_v43, %v790_v33  ;;  %v1210_v47 = vpop.f32.mrb[41].mxu0 }
 0x2dc   : > { %v1327_v51 = vrot.slane %v1326_v42, 4  ;;  %v1211_v53 = vadd.f32 %v1210_v47, %v794_v38 }
 0x2dd   : > { %v1315_v11 = vmax.f32 %v1313_v41, %v1314_v34  ;;  %v1333_v56 = vmax.f32 %v1209_v46, %v1215_v45  ;;  %v1413_v45 = vrot.slane %v1405_v10, %v2541_v48 }
 0x2de   : > { %v1328_v58 = vmax.f32 %v1326_v42, %v1327_v51  ;;  %v1346_v25 = vmax.f32 %v1211_v53, %v1217_v49 }
 0x2df   : > { %v1316_v61 = vrot.slane %v1315_v11, 2  ;;  %v1334_v62 = vmax.f32 %v1333_v56, %v1221_v55 }
 0x2e0   : > { %v1329_v37 = vrot.slane %v1328_v58, 2  ;;  %v1347_v3 = vmax.f32 %v1346_v25, %v1223_v52 }
 0x2e1   : > { %v1317_v24 = vmax.f32 %v1315_v11, %v1316_v61  ;;  %v1335_v7 = vmax.f32 %v1334_v62, %v1227_v59 }
 0x2e2   : > { %v1330_v12 = vmax.f32 %v1328_v58, %v1329_v37  ;;  %v1348_v13 = vmax.f32 %v1347_v3, %v1229_v1 }
 0x2e3   : > { %v1318_v50 = vrot.slane %v1317_v24, 1  ;;  %v1336_v15 = vmax.f32 %v1335_v7, %v1233_v6 }
 0x2e4   : > { %v1331_v17 = vrot.slane %v1330_v12, 1  ;;  %v1349_v32 = vmax.f32 %v1348_v13, %v1235_v9 }
 0x2e5   : > { %v1319_v44 = vmax.f32 %v1317_v24, %v1318_v50  ;;  %v1337_v60 = vmax.f32 %v1336_v15, %v1239_v14 }
 0x2e6   : > { %v1332_v2 = vmax.f32 %v1330_v12, %v1331_v17  ;;  %v1350_v19 = vmax.f32 %v1349_v32, %v1241_v16 }
 0x2e7   : > { %v1338_v54 = vmax.f32 %v1337_v60, %v1245_v20 }
 0x2e8   : > { %v1375_v27 = vcombine.low %v1319_v44, %v1332_v2  ;;  %v1351_v28 = vmax.f32 %v1350_v19, %v1247_v39 }
 0x2e9   : > { %v1339_v57 = vmax.f32 %v1338_v54, %v1251_v18 }
 0x2ea   : > { %v1352_v29 = vmax.f32 %v1351_v28, %v1253_v23  ;;  %v1397_v26 = vrot.slane %v1375_v27, %v2541_v48 }
 0x2eb   : > { %v1340_v30 = vrot.slane %v1339_v57, 4 }
 0x2ec   : > { %v1353_v4 = vrot.slane %v1352_v29, 4 }
 0x2ed   : > { %v1341_v31 = vmax.f32 %v1339_v57, %v1340_v30 }
 0x2ee   : > { %v1354_v8 = vmax.f32 %v1352_v29, %v1353_v4 }
 0x2ef   : > { %v1342_v35 = vrot.slane %v1341_v31, 2 }
 0x2f0   : > { %v1355_v36 = vrot.slane %v1354_v8, 2 }
 0x2f1   : > { %v1343_v21 = vmax.f32 %v1341_v31, %v1342_v35 }
 0x2f2   : > { %v1356_v40 = vmax.f32 %v1354_v8, %v1355_v36 }
 0x2f3   : > { %v1344_v41 = vrot.slane %v1343_v21, 1 }
 0x2f4   : > { %v1357_v22 = vrot.slane %v1356_v40, 1 }
 0x2f5   : > { %v1345_v42 = vmax.f32 %v1343_v21, %v1344_v41 }
 0x2f6   : > { %v1358_v43 = vmax.f32 %v1356_v40, %v1357_v22 }
 0x2f8   : > { %v1376_v5 = vcombine.low %v1345_v42, %v1358_v43 }
 0x2fa   : > { %v1404_v33 = vrot.slane %v1376_v5, %v2541_v48 }
 0x2fc   : > { %v1406_v38 = vcombine.low %v1397_v26, %v1404_v33 }
 0x2fe   : > { %v1420_v34 = vrot.slane %v1406_v38, %v2541_v48 }
 0x300   : > { %v1421_v46 = vcombine.low %v1413_v45, %v1420_v34 }
 0x302   : > { %1424 = vst [vmem:[%s321_s9] sm:$0xff] %v1421_v46 }
 0x303 PF: > { %s17_s26 = sadd.s32 1, %s1811_s26   ;;  %s2605_s24 = smov %s1807_s25 }
 0x304   : > { %p14_p5 = scmp.ge.s32.totalorder %s17_s26, 4   ;;  %s2606_s25 = smov %s2608_s27 }
 0x306   :  { %16 = sbr.rel (!%p14_p5) target bundleno = 2 (0x2), region = 85 }

// kernel: point_estimation_forward.5
= control target key start
LH: loop header
LB: loop body
LE: loop exit
PB: predicated region body
PF: predicated region fallthrough
CT: control target
= control target key end

     0   :  { %s2007_s30 = smov 0   ;;  %s2009_s10 = smov 0   ;;  %s2795_s0 = inlined_call_operand.vmem [shape: f32[2,64,3], index: 0, kind: input, shape index: {}]   ;;  %s2796_s1 = inlined_call_operand.vmem [shape: f32[2,3,64], index: 1, kind: input, shape index: {}]   ;;  %s2797_s2 = inlined_call_operand.vmem [shape: f32[1,64], index: 2, kind: input, shape index: {}]   ;;  %s2798_s3 = inlined_call_operand.vmem [shape: f32[2,1,512], index: 3, kind: input, shape index: {}]   ;;  %s2799_s4 = inlined_call_operand.vmem [shape: f32[64,512], index: 4, kind: input, shape index: {}]   ;;  %s2800_s5 = inlined_call_operand.vmem [shape: f32[512,256], index: 5, kind: input, shape index: {}]   ;;  %s2801_s6 = inlined_call_operand.vmem [shape: f32[1,256], index: 6, kind: input, shape index: {}]   ;;  %s2802_s7 = inlined_call_operand.vmem [shape: f32[256,128], index: 7, kind: input, shape index: {}]   ;;  %s2803_s8 = inlined_call_operand.vmem [shape: f32[1,128], index: 8, kind: input, shape index: {}]   ;;  %s2804_s9 = inlined_call_operand.vmem [shape: f32[2,64,128], index: 9, kind: output, shape index: {}]  }
   0x1   :  { %s2011_s11 = smov 0  }
   0x2 LB: > { %s31_s12 = sadd.s32 1, %s1950_s10  ;;  %p1550_p0 = scmp.ge.s32.totalorder %s1954_s11, 1  ;;  %s1954_s11 = sphi %s2011_s11, %s19_s11   ;;  %s1950_s10 = sphi %s2009_s10, %s2806_s10   ;;  %s1946_s30 = sphi %s2007_s30, %s2805_s30  }
   0x3   : > { %p33_p1 = scmp.ge.s32.totalorder %s31_s12, 2  ;;  %p326_p2 = scmp.lt.s32.totalorder %s1954_s11, 3 }
   0x5   : > { %s2808_s12 = smov (%p33_p1, %s31_s12), 0  ;;  %p327_p3 = pnand %p1550_p0, %p326_p2 }
   0x6   : > { %p379_p4 = scmp.lt.s32.totalorder (!%p327_p3), %s1946_s30, 1  ;;  %v565_v0 = vld [vmem:[%s2799_s4 + $0x8] sm:$0xff] (!%p327_p3)  ;;  %v567_v2 = vld [vmem:[%s2799_s4 + $0x18] sm:$0xff] (!%p327_p3)  ;;  %v564_v5 = vld [vmem:[%s2799_s4] sm:$0xff] (!%p327_p3)  ;;  %vm447_vm0 = vcmask (!%p327_p3), 1042432   ;;  %vm422_vm1 = vcmask (!%p327_p3), 23552  }
   0x7   : > { %330 = sbr.rel (%p327_p3) target bundleno = 921 (0x399), region = 56  ;;  %v569_v1 = vld [vmem:[%s2799_s4 + $0x28] sm:$0xff] (!%p327_p3)  ;;  %v571_v4 = vld [vmem:[%s2799_s4 + $0x38] sm:$0xff] (!%p327_p3)  ;;  %v568_v6 = vld [vmem:[%s2799_s4 + $0x20] sm:$0xff] (!%p327_p3)  ;;  %v1956_v57 = vmov (!%p327_p3), 0.0   ;;  %vm618_vm2 = vcmask (!%p327_p3), 523264  }
   0x8   : > { %v1667_v3 = vpack.c.bf16 (!%p327_p3), %v569_v1, %v565_v0  ;;  %v1669_v7 = vpack.c.bf16 (!%p327_p3), %v568_v6, %v564_v5  ;;  %v566_v8 = vld [vmem:[%s2799_s4 + $0x10] sm:$0xff] (!%p327_p3)  ;;  %v573_v10 = vld [vmem:[%s2799_s4 + $0x48] sm:$0xff] (!%p327_p3)  ;;  %v1683_v12 = vpack.c.bf16 (!%p327_p3), %v571_v4, %v567_v2  ;;  %v575_v13 = vld [vmem:[%s2799_s4 + $0x58] sm:$0xff] (!%p327_p3)  ;;  %707 = vmatprep.mubr.f32.mxu1 (!%p327_p3), %v1956_v57 }
   0x9   : > { %v570_v9 = vld [vmem:[%s2799_s4 + $0x30] sm:$0xff] (!%p327_p3)  ;;  %v577_v11 = vld [vmem:[%s2799_s4 + $0x68] sm:$0xff] (!%p327_p3)  ;;  %v579_v14 = vld [vmem:[%s2799_s4 + $0x78] sm:$0xff] (!%p327_p3) }
   0xa   : > { %1668 = vmatprep.subr.bf16.mxu1 (!%p327_p3), %v1667_v3  ;;  %v1685_v18 = vpack.c.bf16 (!%p327_p3), %v570_v9, %v566_v8  ;;  %v1671_v20 = vpack.c.bf16 (!%p327_p3), %v577_v11, %v573_v10  ;;  %v1687_v21 = vpack.c.bf16 (!%p327_p3), %v579_v14, %v575_v13  ;;  %v572_v22 = vld [vmem:[%s2799_s4 + $0x40] sm:$0xff] (!%p327_p3)  ;;  %v574_v26 = vld [vmem:[%s2799_s4 + $0x50] sm:$0xff] (!%p327_p3)  ;;  %v581_v29 = vld [vmem:[%s2799_s4 + $0x88] sm:$0xff] (!%p327_p3) }
   0xb   : > { %1670 = vmatpush1.bf16.msra.mxu1 (!%p327_p3), %v1669_v7  ;;  %v576_v25 = vld [vmem:[%s2799_s4 + $0x60] sm:$0xff] (!%p327_p3)  ;;  %v578_v28 = vld [vmem:[%s2799_s4 + $0x70] sm:$0xff] (!%p327_p3)  ;;  %v585_v30 = vld [vmem:[%s2799_s4 + $0xa8] sm:$0xff] (!%p327_p3) }
   0xc   : > { %v1673_v27 = vpack.c.bf16 (!%p327_p3), %v576_v25, %v572_v22  ;;  %1672 = vmatprep.subr.bf16.mxu1 (!%p327_p3), %v1671_v20  ;;  %v1689_v31 = vpack.c.bf16 (!%p327_p3), %v578_v28, %v574_v26  ;;  %v1675_v32 = vpack.c.bf16 (!%p327_p3), %v585_v30, %v581_v29  ;;  %v583_v33 = vld [vmem:[%s2799_s4 + $0x98] sm:$0xff] (!%p327_p3)  ;;  %v580_v35 = vld [vmem:[%s2799_s4 + $0x80] sm:$0xff] (!%p327_p3)  ;;  %v582_v38 = vld [vmem:[%s2799_s4 + $0x90] sm:$0xff] (!%p327_p3) }
   0xd   : > { %v587_v34 = vld [vmem:[%s2799_s4 + $0xb8] sm:$0xff] (!%p327_p3)  ;;  %v584_v37 = vld [vmem:[%s2799_s4 + $0xa0] sm:$0xff] (!%p327_p3)  ;;  %v586_v39 = vld [vmem:[%s2799_s4 + $0xb0] sm:$0xff] (!%p327_p3) }
   0xe   : > { %s2810_s30 = smov (!%p379_p4, %s1946_s30), 1  ;;  %v1691_v36 = vpack.c.bf16 %v587_v34, %v583_v33  ;;  %v1677_v40 = vpack.c.bf16 %v584_v37, %v580_v35  ;;  %v1693_v42 = vpack.c.bf16 %v586_v39, %v582_v38  ;;  %v589_v45 = vld [vmem:[%s2799_s4 + $0xc8] sm:$0xff]  ;;  %v591_v47 = vld [vmem:[%s2799_s4 + $0xd8] sm:$0xff]  ;;  %v588_v50 = vld [vmem:[%s2799_s4 + $0xc0] sm:$0xff] }
   0xf   : > { %s1586_s29 = sshll.u32 %s2810_s30, 6  ;;  %s1553_s13 = sshll.u32 %s2810_s30, 2  ;;  %1674 = vmatpush1.bf16.msra.mxu1 %v1673_v27  ;;  %v593_v46 = vld [vmem:[%s2799_s4 + $0xe8] sm:$0xff]  ;;  %v595_v49 = vld [vmem:[%s2799_s4 + $0xf8] sm:$0xff]  ;;  %v592_v52 = vld [vmem:[%s2799_s4 + $0xe0] sm:$0xff] }
  0x10   : > { %s2064_s20 = scalar_lea.vmem %s2795_s0, %s1586_s29  ;;  %s391_s23 = scalar_lea.vmem %s2796_s1, %s1553_s13  ;;  %1676 = vmatprep.subr.bf16.mxu1 %v1675_v32  ;;  %v1679_v48 = vpack.c.bf16 %v593_v46, %v589_v45  ;;  %v1695_v51 = vpack.c.bf16 %v595_v49, %v591_v47  ;;  %v590_v53 = vld [vmem:[%s2799_s4 + $0xd0] sm:$0xff]  ;;  %v1681_v55 = vpack.c.bf16 %v592_v52, %v588_v50  ;;  %v902_v58 = vld [vmem:[%s2800_s5 + $0x8] sm:$0xff]  ;;  %v904_v59 = vld [vmem:[%s2800_s5 + $0x18] sm:$0xff] }
  0x11   : > { %v414_v15 = vld [vmem:[%s391_s23] sm:$0x7]  ;;  %v407_v17 = vld [vmem:[%s2064_s20 + $0x8] sm:$0xff]  ;;  %v408_v19 = vld [vmem:[%s2064_s20 + $0x10] sm:$0xff]  ;;  %v1699_v61 = vpack.c.bf16 %v904_v59, %v902_v58  ;;  %s395_s18 = scalar_lea.vmem %s2798_s3, %s1553_s13  ;;  %s2776_s21 = scalar_lea.vmem %s2804_s9, %s1586_s29 }
  0x12   : > { %v406_v16 = vld [vmem:[%s2064_s20] sm:$0xff]  ;;  %1653 = vmatprep.subr.msk.mxu0 %vm447_vm0, %v414_v15  ;;  %v409_v23 = vld [vmem:[%s2064_s20 + $0x18] sm:$0xff]  ;;  %v411_v41 = vld [vmem:[%s2064_s20 + $0x28] sm:$0xff] }
  0x13   : > { %1655 = vmatprep.mubr.msk.f32.mxu0 %vm422_vm1, %v406_v16  ;;  %1654 = vmatpush3.msk.msra.mxu0 %vm447_vm0, %v414_v15  ;;  %v410_v24 = vld [vmem:[%s2064_s20 + $0x20] sm:$0xff]  ;;  %v412_v43 = vld [vmem:[%s2064_s20 + $0x30] sm:$0xff]  ;;  %v413_v44 = vld [vmem:[%s2064_s20 + $0x38] sm:$0xff] }
  0x14   : > { %1656 = vmatmul.mubr.msk.f32.vlgmr.msra.gmra.mrb[0].mxu0 %vm422_vm1, %v407_v17  ;;  %1684 = vmatprep.subr.bf16.mxu0 %v1683_v12  ;;  %v594_v54 = vld [vmem:[%s2799_s4 + $0xf0] sm:$0xff]  ;;  %v966_v60 = vld [vmem:[%s2800_s5 + $0x208] sm:$0xff]  ;;  %v968_v62 = vld [vmem:[%s2800_s5 + $0x218] sm:$0xff] }
  0x15   : > { %1658 = vmatprep.mubr.msk.f32.mxu0 %vm422_vm1, %v408_v19  ;;  %1686 = vmatpush1.bf16.msra.mxu0 %v1685_v18  ;;  %v1697_v56 = vpack.c.bf16 %v594_v54, %v590_v53  ;;  %v1763_v63 = vpack.c.bf16 %v968_v62, %v966_v60  ;;  %v2172_v0 = vld [vmem:[%s2797_s2] ss:$0 sm:$0xff]  ;;  %v903_v3 = vld [vmem:[%s2800_s5 + $0x10] sm:$0xff]  ;;  %v906_v7 = vld [vmem:[%s2800_s5 + $0x28] sm:$0xff] }
  0x16   : > { %1688 = vmatprep.subr.bf16.mxu0 %v1687_v21  ;;  %1678 = vmatpush1.bf16.msra.mxu1 %v1677_v40  ;;  %v901_v2 = vld [vmem:[%s2800_s5] sm:$0xff]  ;;  %v967_v6 = vld [vmem:[%s2800_s5 + $0x210] sm:$0xff]  ;;  %v908_v9 = vld [vmem:[%s2800_s5 + $0x38] sm:$0xff] }
  0x17   : > { %1680 = vmatprep.subr.bf16.mxu1 %v1679_v48  ;;  %v965_v5 = vld [vmem:[%s2800_s5 + $0x200] sm:$0xff]  ;;  %v970_v10 = vld [vmem:[%s2800_s5 + $0x228] sm:$0xff]  ;;  %v972_v11 = vld [vmem:[%s2800_s5 + $0x238] sm:$0xff]  ;;  %v1701_v15 = vpack.c.bf16 %v903_v3, %v901_v2  ;;  %v1703_v20 = vpack.c.bf16 %v908_v9, %v906_v7 }
  0x18   : > { %1659 = vmatmul.mubr.msk.f32.gmra.mrb[2].mxu0 %vm422_vm1, %v409_v23  ;;  %v1765_v16 = vpack.c.bf16 %v967_v6, %v965_v5  ;;  %v905_v17 = vld [vmem:[%s2800_s5 + $0x20] sm:$0xff]  ;;  %v907_v18 = vld [vmem:[%s2800_s5 + $0x30] sm:$0xff]  ;;  %v1767_v21 = vpack.c.bf16 %v972_v11, %v970_v10  ;;  %v912_v26 = vld [vmem:[%s2800_s5 + $0x58] sm:$0xff] }
  0x19   : > { %1661 = vmatprep.mubr.msk.f32.mxu0 %vm422_vm1, %v410_v24  ;;  %1690 = vmatpush1.bf16.msra.mxu0 %v1689_v31  ;;  %v969_v22 = vld [vmem:[%s2800_s5 + $0x220] sm:$0xff]  ;;  %v971_v23 = vld [vmem:[%s2800_s5 + $0x230] sm:$0xff]  ;;  %v910_v24 = vld [vmem:[%s2800_s5 + $0x48] sm:$0xff]  ;;  %v1705_v31 = vpack.c.bf16 %v907_v18, %v905_v17 }
  0x1a   : > { %1692 = vmatprep.subr.bf16.mxu0 %v1691_v36  ;;  %1682 = vmatpush1.bf16.msra.mxu1 %v1681_v55  ;;  %v974_v27 = vld [vmem:[%s2800_s5 + $0x248] sm:$0xff]  ;;  %v976_v28 = vld [vmem:[%s2800_s5 + $0x258] sm:$0xff]  ;;  %v1769_v32 = vpack.c.bf16 %v971_v23, %v969_v22  ;;  %v909_v33 = vld [vmem:[%s2800_s5 + $0x40] sm:$0xff]  ;;  %v1707_v36 = vpack.c.bf16 %v912_v26, %v910_v24 }
  0x1b   : > { %1764 = vmatprep.subr.bf16.mxu1 %v1763_v63  ;;  %v911_v34 = vld [vmem:[%s2800_s5 + $0x50] sm:$0xff]  ;;  %v1771_v37 = vpack.c.bf16 %v976_v28, %v974_v27  ;;  %v973_v38 = vld [vmem:[%s2800_s5 + $0x240] sm:$0xff]  ;;  %v914_v40 = vld [vmem:[%s2800_s5 + $0x68] sm:$0xff] }
  0x1c   : > { %1662 = vmatmul.mubr.msk.f32.gmra.mrb[4].mxu0 %vm422_vm1, %v411_v41  ;;  %v975_v39 = vld [vmem:[%s2800_s5 + $0x250] sm:$0xff]  ;;  %v1709_v47 = vpack.c.bf16 %v911_v34, %v909_v33  ;;  %v913_v49 = vld [vmem:[%s2800_s5 + $0x60] sm:$0xff]  ;;  %v920_v59 = vld [vmem:[%s2800_s5 + $0x98] sm:$0xff] }
  0x1d   : > { %1664 = vmatprep.mubr.msk.f32.mxu0 %vm422_vm1, %v412_v43  ;;  %1694 = vmatpush1.bf16.msra.mxu0 %v1693_v42  ;;  %v916_v42 = vld [vmem:[%s2800_s5 + $0x78] sm:$0xff]  ;;  %v978_v43 = vld [vmem:[%s2800_s5 + $0x268] sm:$0xff]  ;;  %v1773_v48 = vpack.c.bf16 %v975_v39, %v973_v38  ;;  %v915_v50 = vld [vmem:[%s2800_s5 + $0x70] sm:$0xff] }
  0x1e   : > { %1696 = vmatprep.subr.bf16.mxu0 %v1695_v51  ;;  %v1711_v52 = vpack.c.bf16 %v916_v42, %v914_v40  ;;  %v977_v54 = vld [vmem:[%s2800_s5 + $0x260] sm:$0xff]  ;;  %v979_v55 = vld [vmem:[%s2800_s5 + $0x270] sm:$0xff]  ;;  %v982_v60 = vld [vmem:[%s2800_s5 + $0x288] sm:$0xff]  ;;  %v1713_v63 = vpack.c.bf16 %v915_v50, %v913_v49 }
  0x1f   : > { %v917_v2 = vld [vmem:[%s2800_s5 + $0x80] sm:$0xff]  ;;  %v919_v3 = vld [vmem:[%s2800_s5 + $0x90] sm:$0xff]  ;;  %v924_v10 = vld [vmem:[%s2800_s5 + $0xb8] sm:$0xff] }
  0x20   : > { %1665 = vmatmul.mubr.msk.f32.gmra.mrb[6].mxu0 %vm422_vm1, %v413_v44  ;;  %v980_v44 = vld [vmem:[%s2800_s5 + $0x278] sm:$0xff]  ;;  %v981_v6 = vld [vmem:[%s2800_s5 + $0x280] sm:$0xff]  ;;  %v983_v7 = vld [vmem:[%s2800_s5 + $0x290] sm:$0xff] }
  0x21   : > { %1698 = vmatpush1.bf16.msra.mxu0 %v1697_v56  ;;  %820 = vmatprep.mubr.f32.mxu0 %v1956_v57  ;;  %v1775_v53 = vpack.c.bf16 %v980_v44, %v978_v43  ;;  %v918_v56 = vld [vmem:[%s2800_s5 + $0x88] sm:$0xff]  ;;  %v923_v17 = vld [vmem:[%s2800_s5 + $0xb0] sm:$0xff]  ;;  %v928_v24 = vld [vmem:[%s2800_s5 + $0xd8] sm:$0xff] }
  0x22   : > { %1700 = vmatprep.subr.bf16.mxu0 %v1699_v61  ;;  %v984_v61 = vld [vmem:[%s2800_s5 + $0x298] sm:$0xff]  ;;  %v986_v11 = vld [vmem:[%s2800_s5 + $0x2a8] sm:$0xff]  ;;  %v989_v34 = vld [vmem:[%s2800_s5 + $0x2c0] sm:$0xff] }
  0x23   : > { %v1779_v5 = vpack.c.bf16 %v984_v61, %v982_v60  ;;  %v926_v22 = vld [vmem:[%s2800_s5 + $0xc8] sm:$0xff]  ;;  %v992_v26 = vld [vmem:[%s2800_s5 + $0x2d8] sm:$0xff]  ;;  %v929_v44 = vld [vmem:[%s2800_s5 + $0xe0] sm:$0xff] }
  0x24   : > { %v932_v38 = vld [vmem:[%s2800_s5 + $0xf8] sm:$0xff]  ;;  %v994_v39 = vld [vmem:[%s2800_s5 + $0x2e8] sm:$0xff]  ;;  %v999_v61 = vld [vmem:[%s2800_s5 + $0x310] sm:$0xff] }
  0x25   : > { %v996_v40 = vld [vmem:[%s2800_s5 + $0x2f8] sm:$0xff]  ;;  %v934_v49 = vld [vmem:[%s2800_s5 + $0x108] sm:$0xff] }
  0x26   : > { %v936_v50 = vld [vmem:[%s2800_s5 + $0x118] sm:$0xff] }
  0xe7   : > { %v1657_v1 = vpop.f32.mrb[0].mxu0 }
  0xe8   : > { %v517_v4 = vpop.f32.mrb[1].mxu0  ;;  %v523_v12 = vadd.f32 %v1657_v1, %v2172_v0  ;;  %v1777_v1 = vpack.c.bf16 %v979_v55, %v977_v54 }
  0xe9   : > { %v518_v8 = vadd.f32 %v2172_v0, %v517_v4  ;;  %v1715_v4 = vpack.c.bf16 %v920_v59, %v918_v56  ;;  %v933_v56 = vld [vmem:[%s2800_s5 + $0x100] sm:$0xff]  ;;  %v1731_v59 = vpack.c.bf16 %v936_v50, %v934_v49  ;;  %v1020_v49 = vld [vmem:[%s2800_s5 + $0x3b8] sm:$0xff] }
  0xea   : > { %v557_v29 = vmax.f32 %v523_v12, 0.0  ;;  %v988_v12 = vld [vmem:[%s2800_s5 + $0x2b8] sm:$0xff] }
  0xeb   : > { %v556_v13 = vmax.f32 %v518_v8, 0.0  ;;  %v1660_v14 = vpop.f32.mrb[2].mxu0  ;;  %v922_v8 = vld [vmem:[%s2800_s5 + $0xa8] sm:$0xff] }
  0xec   : > { %v527_v19 = vpop.f32.mrb[3].mxu0  ;;  %v533_v45 = vadd.f32 %v1660_v14, %v2172_v0  ;;  %v1717_v14 = vpack.c.bf16 %v919_v3, %v917_v2  ;;  %v1719_v18 = vpack.c.bf16 %v924_v10, %v922_v8  ;;  %v1004_v2 = vld [vmem:[%s2800_s5 + $0x338] sm:$0xff]  ;;  %v1003_v10 = vld [vmem:[%s2800_s5 + $0x330] sm:$0xff] }
  0xed   : > { %1567 = vmatmul.mubr.msk.f32.vlgmr.msra.gmra.mrb[0].mxu1 %vm618_vm2, %v556_v13  ;;  %1575 = vmatmul.mubr.msk.f32.vlgmr.msra.gmra.mrb[8].mxu0 %vm618_vm2, %v556_v13  ;;  %v528_v25 = vadd.f32 %v2172_v0, %v527_v19  ;;  %v1783_v19 = vpack.c.bf16 %v988_v12, %v986_v11  ;;  %v942_v11 = vld [vmem:[%s2800_s5 + $0x148] sm:$0xff]  ;;  %v944_v12 = vld [vmem:[%s2800_s5 + $0x158] sm:$0xff] }
  0xee   : > { %713 = vmatprep.mubr.f32.mxu1 %v1956_v57  ;;  %826 = vmatprep.mubr.f32.mxu0 %v1956_v57  ;;  %v559_v62 = vmax.f32 %v533_v45, 0.0  ;;  %v931_v45 = vld [vmem:[%s2800_s5 + $0xf0] sm:$0xff] }
  0xef   : > { %v2229_v30 = vpop.f32.mrb[4].mxu0  ;;  %1702 = vmatpush1.bf16.msra.mxu0 %v1701_v15  ;;  %1766 = vmatpush1.bf16.msra.mxu1 %v1765_v16  ;;  %v558_v41 = vmax.f32 %v528_v25, 0.0  ;;  %v1781_v15 = vpack.c.bf16 %v983_v7, %v981_v6  ;;  %v921_v16 = vld [vmem:[%s2800_s5 + $0xa0] sm:$0xff]  ;;  %v990_v25 = vld [vmem:[%s2800_s5 + $0x2c8] sm:$0xff]  ;;  %v1729_v54 = vpack.c.bf16 %v931_v45, %v929_v44  ;;  %v939_v6 = vld [vmem:[%s2800_s5 + $0x130] sm:$0xff] }
  0xf0   : > { %v537_v35 = vpop.f32.mrb[5].mxu0  ;;  %1704 = vmatprep.subr.bf16.mxu0 %v1703_v20  ;;  %1768 = vmatprep.subr.bf16.mxu1 %v1767_v21  ;;  %v543_v13 = vadd.f32 %v2229_v30, %v2172_v0  ;;  %v985_v20 = vld [vmem:[%s2800_s5 + $0x2a0] sm:$0xff]  ;;  %v987_v21 = vld [vmem:[%s2800_s5 + $0x2b0] sm:$0xff]  ;;  %v1721_v28 = vpack.c.bf16 %v923_v17, %v921_v16  ;;  %v1787_v33 = vpack.c.bf16 %v992_v26, %v990_v25  ;;  %v1010_v25 = vld [vmem:[%s2800_s5 + $0x368] sm:$0xff] }
  0xf1   : > { %1568 = vmatmul.mubr.msk.f32.gmra.mrb[2].mxu1 %vm618_vm2, %v557_v29  ;;  %1576 = vmatmul.mubr.msk.f32.gmra.mrb[10].mxu0 %vm618_vm2, %v557_v29  ;;  %v538_v58 = vadd.f32 %v2172_v0, %v537_v35  ;;  %v1785_v29 = vpack.c.bf16 %v987_v21, %v985_v20  ;;  %v925_v30 = vld [vmem:[%s2800_s5 + $0xc0] sm:$0xff]  ;;  %v991_v35 = vld [vmem:[%s2800_s5 + $0x2d0] sm:$0xff]  ;;  %v1012_v26 = vld [vmem:[%s2800_s5 + $0x378] sm:$0xff] }
  0xf2   : > { %719 = vmatprep.mubr.f32.mxu1 %v1956_v57  ;;  %832 = vmatprep.mubr.f32.mxu0 %v1956_v57  ;;  %v561_v27 = vmax.f32 %v543_v13, 0.0  ;;  %v1789_v43 = vpack.c.bf16 %v991_v35, %v989_v34  ;;  %v1006_v13 = vld [vmem:[%s2800_s5 + $0x348] sm:$0xff]  ;;  %v941_v17 = vld [vmem:[%s2800_s5 + $0x140] sm:$0xff]  ;;  %v1011_v34 = vld [vmem:[%s2800_s5 + $0x370] sm:$0xff] }
  0xf3   : > { %v2260_v46 = vpop.f32.mrb[6].mxu0  ;;  %1706 = vmatpush1.bf16.msra.mxu0 %v1705_v31  ;;  %1770 = vmatpush1.bf16.msra.mxu1 %v1769_v32  ;;  %v560_v9 = vmax.f32 %v538_v58, 0.0  ;;  %v927_v31 = vld [vmem:[%s2800_s5 + $0xd0] sm:$0xff]  ;;  %v1723_v32 = vpack.c.bf16 %v928_v24, %v926_v22  ;;  %v1005_v21 = vld [vmem:[%s2800_s5 + $0x340] sm:$0xff]  ;;  %v948_v24 = vld [vmem:[%s2800_s5 + $0x178] sm:$0xff] }
  0xf4   : > { %v547_v51 = vpop.f32.mrb[7].mxu0  ;;  %1708 = vmatprep.subr.bf16.mxu0 %v1707_v36  ;;  %1772 = vmatprep.subr.bf16.mxu1 %v1771_v37  ;;  %v930_v36 = vld [vmem:[%s2800_s5 + $0xe8] sm:$0xff]  ;;  %v1725_v42 = vpack.c.bf16 %v927_v31, %v925_v30  ;;  %v935_v58 = vld [vmem:[%s2800_s5 + $0x110] sm:$0xff]  ;;  %v1013_v45 = vld [vmem:[%s2800_s5 + $0x380] sm:$0xff] }
  0xf5   : > { %1569 = vmatmul.mubr.msk.f32.gmra.mrb[4].mxu1 %vm618_vm2, %v558_v41  ;;  %1577 = vmatmul.mubr.msk.f32.gmra.mrb[12].mxu0 %vm618_vm2, %v558_v41  ;;  %v548_v23 = vadd.f32 %v2172_v0, %v547_v51  ;;  %v553_v41 = vadd.f32 %v2260_v46, %v2172_v0  ;;  %v993_v0 = vld [vmem:[%s2800_s5 + $0x2e0] sm:$0xff]  ;;  %v995_v46 = vld [vmem:[%s2800_s5 + $0x2f0] sm:$0xff]  ;;  %v998_v51 = vld [vmem:[%s2800_s5 + $0x308] sm:$0xff]  ;;  %v1733_v3 = vpack.c.bf16 %v935_v58, %v933_v56 }
  0xf6   : > { %725 = vmatprep.mubr.f32.mxu1 %v1956_v57  ;;  %838 = vmatprep.mubr.f32.mxu0 %v1956_v57  ;;  %v1793_v55 = vpack.c.bf16 %v995_v46, %v993_v0  ;;  %v1007_v22 = vld [vmem:[%s2800_s5 + $0x350] sm:$0xff]  ;;  %v950_v35 = vld [vmem:[%s2800_s5 + $0x188] sm:$0xff]  ;;  %v956_v0 = vld [vmem:[%s2800_s5 + $0x1b8] sm:$0xff] }
  0xf7   : > { %1710 = vmatpush1.bf16.msra.mxu0 %v1709_v47  ;;  %1774 = vmatpush1.bf16.msra.mxu1 %v1773_v48  ;;  %v562_v37 = vmax.f32 %v548_v23, 0.0  ;;  %v1727_v47 = vpack.c.bf16 %v932_v38, %v930_v36  ;;  %v1791_v48 = vpack.c.bf16 %v996_v40, %v994_v39  ;;  %v946_v23 = vld [vmem:[%s2800_s5 + $0x168] sm:$0xff]  ;;  %v947_v30 = vld [vmem:[%s2800_s5 + $0x170] sm:$0xff]  ;;  %v952_v36 = vld [vmem:[%s2800_s5 + $0x198] sm:$0xff] }
  0xf8   : > { %1712 = vmatprep.subr.bf16.mxu0 %v1711_v52  ;;  %1776 = vmatprep.subr.bf16.mxu1 %v1775_v53  ;;  %v1000_v52 = vld [vmem:[%s2800_s5 + $0x318] sm:$0xff]  ;;  %v563_v53 = vmax.f32 %v553_v41, 0.0  ;;  %v1743_v31 = vpack.c.bf16 %v948_v24, %v946_v23  ;;  %v949_v41 = vld [vmem:[%s2800_s5 + $0x180] sm:$0xff]  ;;  %v1018_v46 = vld [vmem:[%s2800_s5 + $0x3a8] sm:$0xff]  ;;  %v598_v24 = vlaneseq }
  0xf9   : > { %1570 = vmatmul.mubr.msk.f32.gmra.mrb[6].mxu1 %vm618_vm2, %v559_v62  ;;  %1578 = vmatmul.mubr.msk.f32.gmra.mrb[14].mxu0 %vm618_vm2, %v559_v62  ;;  %v1795_v60 = vpack.c.bf16 %v1000_v52, %v998_v51  ;;  %v938_v62 = vld [vmem:[%s2800_s5 + $0x128] sm:$0xff]  ;;  %v1016_v38 = vld [vmem:[%s2800_s5 + $0x398] sm:$0xff]  ;;  %v953_v52 = vld [vmem:[%s2800_s5 + $0x1a0] sm:$0xff] }
  0xfa   : > { %731 = vmatprep.mubr.f32.mxu1 %v1956_v57  ;;  %844 = vmatprep.mubr.f32.mxu0 %v1956_v57  ;;  %v1017_v56 = vld [vmem:[%s2800_s5 + $0x3a0] sm:$0xff]  ;;  %v1019_v58 = vld [vmem:[%s2800_s5 + $0x3b0] sm:$0xff] }
  0xfb   : > { %1714 = vmatpush1.bf16.msra.mxu0 %v1713_v63  ;;  %1778 = vmatpush1.bf16.msra.mxu1 %v1777_v1  ;;  %v940_v63 = vld [vmem:[%s2800_s5 + $0x138] sm:$0xff]  ;;  %v1002_v1 = vld [vmem:[%s2800_s5 + $0x328] sm:$0xff] }
  0xfc   : > { %1716 = vmatprep.subr.bf16.mxu0 %v1715_v4  ;;  %1780 = vmatprep.subr.bf16.mxu1 %v1779_v5  ;;  %v937_v5 = vld [vmem:[%s2800_s5 + $0x120] sm:$0xff]  ;;  %v1735_v7 = vpack.c.bf16 %v940_v63, %v938_v62  ;;  %v1799_v8 = vpack.c.bf16 %v1004_v2, %v1002_v1  ;;  %v1817_v63 = vpack.c.bf16 %v1019_v58, %v1017_v56 }
  0xfd   : > { %1571 = vmatmul.mubr.msk.f32.gmra.mrb[8].mxu1 %vm618_vm2, %v560_v9  ;;  %1579 = vmatmul.mubr.msk.f32.gmra.mrb[16].mxu0 %vm618_vm2, %v560_v9  ;;  %v1001_v9 = vld [vmem:[%s2800_s5 + $0x320] sm:$0xff] }
  0xfe   : > { %737 = vmatprep.mubr.f32.mxu1 %v1956_v57  ;;  %850 = vmatprep.mubr.f32.mxu0 %v1956_v57  ;;  %v1801_v16 = vpack.c.bf16 %v1003_v10, %v1001_v9  ;;  %v962_v9 = vld [vmem:[%s2800_s5 + $0x1e8] sm:$0xff]  ;;  %v964_v10 = vld [vmem:[%s2800_s5 + $0x1f8] sm:$0xff] }
  0xff   : > { %1718 = vmatpush1.bf16.msra.mxu0 %v1717_v14  ;;  %1782 = vmatpush1.bf16.msra.mxu1 %v1781_v15  ;;  %v1008_v14 = vld [vmem:[%s2800_s5 + $0x358] sm:$0xff]  ;;  %v1737_v15 = vpack.c.bf16 %v939_v6, %v937_v5  ;;  %v1021_v5 = vld [vmem:[%s2800_s5 + $0x3c0] sm:$0xff] }
 0x100   : > { %1720 = vmatprep.subr.bf16.mxu0 %v1719_v18  ;;  %1784 = vmatprep.subr.bf16.mxu1 %v1783_v19  ;;  %v943_v18 = vld [vmem:[%s2800_s5 + $0x150] sm:$0xff]  ;;  %v1739_v19 = vpack.c.bf16 %v944_v12, %v942_v11  ;;  %v1803_v20 = vpack.c.bf16 %v1008_v14, %v1006_v13  ;;  %v1026_v11 = vld [vmem:[%s2800_s5 + $0x3e8] sm:$0xff]  ;;  %v1759_v12 = vpack.c.bf16 %v964_v10, %v962_v9  ;;  %v1028_v13 = vld [vmem:[%s2800_s5 + $0x3f8] sm:$0xff] }
 0x101   : > { %1572 = vmatmul.mubr.msk.f32.gmra.mrb[10].mxu1 %vm618_vm2, %v561_v27  ;;  %1580 = vmatmul.mubr.msk.f32.gmra.mrb[18].mxu0 %vm618_vm2, %v561_v27  ;;  %v1741_v27 = vpack.c.bf16 %v943_v18, %v941_v17  ;;  %v961_v14 = vld [vmem:[%s2800_s5 + $0x1e0] sm:$0xff] }
 0x102   : > { %743 = vmatprep.mubr.f32.mxu1 %v1956_v57  ;;  %856 = vmatprep.mubr.f32.mxu0 %v1956_v57  ;;  %v1025_v18 = vld [vmem:[%s2800_s5 + $0x3e0] sm:$0xff] }
 0x103   : > { %1722 = vmatpush1.bf16.msra.mxu0 %v1721_v28  ;;  %1786 = vmatpush1.bf16.msra.mxu1 %v1785_v29  ;;  %v1805_v28 = vpack.c.bf16 %v1007_v22, %v1005_v21  ;;  %v945_v29 = vld [vmem:[%s2800_s5 + $0x160] sm:$0xff]  ;;  %v1300_v22 = vld [vmem:[%s2802_s7 + $0x88] sm:$0xff] }
 0x104   : > { %1724 = vmatprep.subr.bf16.mxu0 %v1723_v32  ;;  %1788 = vmatprep.subr.bf16.mxu1 %v1787_v33  ;;  %v1807_v32 = vpack.c.bf16 %v1012_v26, %v1010_v25  ;;  %v1009_v33 = vld [vmem:[%s2800_s5 + $0x360] sm:$0xff]  ;;  %v1745_v39 = vpack.c.bf16 %v947_v30, %v945_v29  ;;  %v2596_v25 = vshrl.u32 %v598_v24, 7 }
 0x105   : > { %1573 = vmatmul.mubr.msk.f32.gmra.mrb[12].mxu1 %vm618_vm2, %v562_v37  ;;  %1581 = vmatmul.mubr.msk.f32.gmra.mrb[20].mxu0 %vm618_vm2, %v562_v37  ;;  %v1014_v37 = vld [vmem:[%s2800_s5 + $0x388] sm:$0xff]  ;;  %v1809_v40 = vpack.c.bf16 %v1011_v34, %v1009_v33  ;;  %v1299_v21 = vld [vmem:[%s2802_s7 + $0x80] sm:$0xff] }
 0x106   : > { %749 = vmatprep.mubr.f32.mxu1 %v1956_v57  ;;  %862 = vmatprep.mubr.f32.mxu0 %v1956_v57  ;;  %v997_v57 = vld [vmem:[%s2800_s5 + $0x300] sm:$0xff]  ;;  %v1811_v44 = vpack.c.bf16 %v1016_v38, %v1014_v37  ;;  %v1827_v23 = vpack.c.bf16 %v1300_v22, %v1299_v21  ;;  %v600_v26 = vsub.s32 0, %v2596_v25  ;;  %v604_v29 = vsub.s32 1, %v2596_v25 }
 0x107   : > { %1726 = vmatpush1.bf16.msra.mxu0 %v1725_v42  ;;  %1790 = vmatpush1.bf16.msra.mxu1 %v1789_v43  ;;  %v1797_v4 = vpack.c.bf16 %v999_v61, %v997_v57  ;;  %v951_v42 = vld [vmem:[%s2800_s5 + $0x190] sm:$0xff]  ;;  %v1747_v43 = vpack.c.bf16 %v952_v36, %v950_v35  ;;  %v1022_v57 = vld [vmem:[%s2800_s5 + $0x3c8] sm:$0xff]  ;;  %v1024_v61 = vld [vmem:[%s2800_s5 + $0x3d8] sm:$0xff]  ;;  %v612_v30 = vsub.s32 3, %v2596_v25 }
 0x108   : > { %1728 = vmatprep.subr.bf16.mxu0 %v1727_v47  ;;  %1792 = vmatprep.subr.bf16.mxu1 %v1791_v48  ;;  %v1015_v47 = vld [vmem:[%s2800_s5 + $0x390] sm:$0xff]  ;;  %v954_v48 = vld [vmem:[%s2800_s5 + $0x1a8] sm:$0xff]  ;;  %v1749_v50 = vpack.c.bf16 %v951_v42, %v949_v41  ;;  %v1819_v2 = vpack.c.bf16 %v1024_v61, %v1022_v57  ;;  %v1283_v37 = vld [vmem:[%s2802_s7] sm:$0xff] }
 0x109   : > { %1574 = vmatmul.mubr.msk.f32.gmra.mrb[14].mxu1 %vm618_vm2, %v563_v53  ;;  %1582 = vmatmul.mubr.msk.f32.gmra.mrb[22].mxu0 %vm618_vm2, %v563_v53  ;;  %v1813_v51 = vpack.c.bf16 %v1015_v47, %v1013_v45  ;;  %v955_v53 = vld [vmem:[%s2800_s5 + $0x1b0] sm:$0xff]  ;;  %v1284_v42 = vld [vmem:[%s2802_s7 + $0x8] sm:$0xff]  ;;  %v1303_v57 = vld [vmem:[%s2802_s7 + $0xa0] sm:$0xff] }
 0x10a   : > { %v1753_v62 = vpack.c.bf16 %v955_v53, %v953_v52  ;;  %v1285_v52 = vld [vmem:[%s2802_s7 + $0x10] sm:$0xff]  ;;  %v1286_v53 = vld [vmem:[%s2802_s7 + $0x18] sm:$0xff]  ;;  %v1304_v61 = vld [vmem:[%s2802_s7 + $0xa8] sm:$0xff] }
 0x10b   : > { %1730 = vmatpush1.bf16.msra.mxu0 %v1729_v54  ;;  %1794 = vmatpush1.bf16.msra.mxu1 %v1793_v55  ;;  %v1751_v54 = vpack.c.bf16 %v956_v0, %v954_v48  ;;  %v1815_v55 = vpack.c.bf16 %v1020_v49, %v1018_v46 }
 0x10c   : > { %1732 = vmatprep.subr.bf16.mxu0 %v1731_v59  ;;  %1796 = vmatprep.subr.bf16.mxu1 %v1795_v60  ;;  %v958_v59 = vld [vmem:[%s2800_s5 + $0x1c8] sm:$0xff]  ;;  %v960_v60 = vld [vmem:[%s2800_s5 + $0x1d8] sm:$0xff] }
 0x10d   : > { %v1755_v1 = vpack.c.bf16 %v960_v60, %v958_v59 }
 0x10f   : > { %1734 = vmatpush1.bf16.msra.mxu0 %v1733_v3  ;;  %1798 = vmatpush1.bf16.msra.mxu1 %v1797_v4  ;;  %v957_v3 = vld [vmem:[%s2800_s5 + $0x1c0] sm:$0xff]  ;;  %v959_v4 = vld [vmem:[%s2800_s5 + $0x1d0] sm:$0xff] }
 0x110   : > { %1736 = vmatprep.subr.bf16.mxu0 %v1735_v7  ;;  %1800 = vmatprep.subr.bf16.mxu1 %v1799_v8  ;;  %v1757_v6 = vpack.c.bf16 %v959_v4, %v957_v3  ;;  %v1023_v7 = vld [vmem:[%s2800_s5 + $0x3d0] sm:$0xff] }
 0x111   : > { %v1821_v8 = vpack.c.bf16 %v1023_v7, %v1021_v5  ;;  %v1833_v5 = vpack.c.bf16 %v1286_v53, %v1285_v52  ;;  %v1287_v7 = vld [vmem:[%s2802_s7 + $0x20] sm:$0xff] }
 0x113   : > { %1738 = vmatpush1.bf16.msra.mxu0 %v1737_v15  ;;  %1802 = vmatpush1.bf16.msra.mxu1 %v1801_v16  ;;  %v963_v15 = vld [vmem:[%s2800_s5 + $0x1f0] sm:$0xff]  ;;  %v1823_v16 = vpack.c.bf16 %v1028_v13, %v1026_v11 }
 0x114   : > { %1740 = vmatprep.subr.bf16.mxu0 %v1739_v19  ;;  %1804 = vmatprep.subr.bf16.mxu1 %v1803_v20  ;;  %v1761_v17 = vpack.c.bf16 %v963_v15, %v961_v14  ;;  %v1027_v19 = vld [vmem:[%s2800_s5 + $0x3f0] sm:$0xff] }
 0x115   : > { %v1825_v20 = vpack.c.bf16 %v1027_v19, %v1025_v18  ;;  %v1305_v15 = vld [vmem:[%s2802_s7 + $0xb0] sm:$0xff] }
 0x117   : > { %1742 = vmatpush1.bf16.msra.mxu0 %v1741_v27  ;;  %1806 = vmatpush1.bf16.msra.mxu1 %v1805_v28  ;;  %v608_v27 = vsub.s32 2, %v2596_v25  ;;  %v596_v28 = vld [vmem:[%s395_s18] sm:$0xf] }
 0x118   : > { %1744 = vmatprep.subr.bf16.mxu0 %v1743_v31  ;;  %1808 = vmatprep.subr.bf16.mxu1 %v1807_v32  ;;  %v2609_v31 = vrot.slane %v596_v28, %v600_v26  ;;  %v2615_v33 = vrot.slane %v596_v28, %v604_v29  ;;  %v2617_v34 = vrot.slane %v596_v28, %v612_v30 }
 0x119   : > { %v2611_v32 = vrot.slane %v596_v28, %v608_v27  ;;  %v1289_v27 = vld [vmem:[%s2802_s7 + $0x30] sm:$0xff]  ;;  %v1290_v28 = vld [vmem:[%s2802_s7 + $0x38] sm:$0xff] }
 0x11b   : > { %1746 = vmatpush1.bf16.msra.mxu0 %v1745_v39  ;;  %1810 = vmatpush1.bf16.msra.mxu1 %v1809_v40 }
 0x11c   : > { %1748 = vmatprep.subr.bf16.mxu0 %v1747_v43  ;;  %1812 = vmatprep.subr.bf16.mxu1 %v1811_v44  ;;  %v1301_v43 = vld [vmem:[%s2802_s7 + $0x90] sm:$0xff]  ;;  %v1302_v44 = vld [vmem:[%s2802_s7 + $0x98] sm:$0xff] }
 0x11f   : > { %1750 = vmatpush1.bf16.msra.mxu0 %v1749_v50  ;;  %1814 = vmatpush1.bf16.msra.mxu1 %v1813_v51  ;;  %v1829_v50 = vpack.c.bf16 %v1284_v42, %v1283_v37  ;;  %v1831_v51 = vpack.c.bf16 %v1302_v44, %v1301_v43 }
 0x120   : > { %1752 = vmatprep.subr.bf16.mxu0 %v1751_v54  ;;  %1816 = vmatprep.subr.bf16.mxu1 %v1815_v55 }
 0x123   : > { %1754 = vmatpush1.bf16.msra.mxu0 %v1753_v62  ;;  %1818 = vmatpush1.bf16.msra.mxu1 %v1817_v63 }
 0x124   : > { %1756 = vmatprep.subr.bf16.mxu0 %v1755_v1  ;;  %1820 = vmatprep.subr.bf16.mxu1 %v1819_v2 }
 0x127   : > { %1758 = vmatpush1.bf16.msra.mxu0 %v1757_v6  ;;  %1822 = vmatpush1.bf16.msra.mxu1 %v1821_v8  ;;  %v1835_v6 = vpack.c.bf16 %v1304_v61, %v1303_v57  ;;  %v1288_v8 = vld [vmem:[%s2802_s7 + $0x28] sm:$0xff] }
 0x128   : > { %1760 = vmatprep.subr.bf16.mxu0 %v1759_v12  ;;  %1824 = vmatprep.subr.bf16.mxu1 %v1823_v16  ;;  %v1306_v16 = vld [vmem:[%s2802_s7 + $0xb8] sm:$0xff] }
 0x129   : > { %v1839_v24 = vpack.c.bf16 %v1306_v16, %v1305_v15 }
 0x12b   : > { %1762 = vmatpush1.bf16.msra.mxu0 %v1761_v17  ;;  %1826 = vmatpush1.bf16.msra.mxu1 %v1825_v20 }
 0x12c   : > { %1828 = vmatprep.subr.bf16.mxu0 %v1827_v23  ;;  %1859 = vmatprep.subr.bf16.mxu1 %v1827_v23  ;;  %v1837_v23 = vpack.c.bf16 %v1288_v8, %v1287_v7 }
 0x1c0   : > { %v709_v35 = vpop.f32.mrb[0].mxu1  ;;  %v822_v36 = vpop.f32.mrb[8].mxu0 }
 0x1c1   : > { %v710_v38 = vadd.f32 %v709_v35, %v2609_v31  ;;  %v823_v39 = vadd.f32 %v822_v36, %v2611_v32  ;;  %v711_v40 = vpop.f32.mrb[1].mxu1  ;;  %v824_v41 = vpop.f32.mrb[9].mxu0 }
 0x1c2   : > { %v712_v45 = vadd.f32 %v711_v40, %v2615_v33  ;;  %v825_v47 = vadd.f32 %v824_v41, %v2617_v34  ;;  %v1307_v40 = vld [vmem:[%s2802_s7 + $0xc0] sm:$0xff]  ;;  %v1308_v41 = vld [vmem:[%s2802_s7 + $0xc8] sm:$0xff] }
 0x1c3   : > { %v869_v54 = vmax.f32 %v710_v38, 0.0  ;;  %v871_v55 = vmax.f32 %v823_v39, 0.0 }
 0x1c4   : > { %v870_v48 = vmax.f32 %v712_v45, 0.0  ;;  %v872_v0 = vmax.f32 %v825_v47, 0.0  ;;  %v715_v46 = vpop.f32.mrb[2].mxu1  ;;  %v828_v49 = vpop.f32.mrb[10].mxu0 }
 0x1c5   : > { %v716_v56 = vadd.f32 %v715_v46, %v2609_v31  ;;  %v829_v58 = vadd.f32 %v828_v49, %v2611_v32  ;;  %v717_v59 = vpop.f32.mrb[3].mxu1  ;;  %v830_v60 = vpop.f32.mrb[11].mxu0  ;;  %v1843_v46 = vpack.c.bf16 %v1308_v41, %v1307_v40  ;;  %v1291_v49 = vld [vmem:[%s2802_s7 + $0x40] sm:$0xff] }
 0x1c6   : > { %v718_v62 = vadd.f32 %v717_v59, %v2615_v33  ;;  %v831_v63 = vadd.f32 %v830_v60, %v2617_v34  ;;  %1105 = vmatprep.mubr.f32.mxu0 %v870_v48  ;;  %1218 = vmatprep.mubr.f32.mxu1 %v872_v0  ;;  %v1841_v0 = vpack.c.bf16 %v1290_v28, %v1289_v27  ;;  %v1310_v59 = vld [vmem:[%s2802_s7 + $0xd8] sm:$0xff] }
 0x1c7   : > { %1106 = vmatmul.mubr.f32.vlgmr.msra.gmra.mrb[24].mxu0 %v869_v54  ;;  %1219 = vmatmul.mubr.f32.vlgmr.msra.gmra.mrb[16].mxu1 %v871_v55  ;;  %v873_v9 = vmax.f32 %v716_v56, 0.0  ;;  %v875_v10 = vmax.f32 %v829_v58, 0.0  ;;  %v1309_v58 = vld [vmem:[%s2802_s7 + $0xd0] sm:$0xff] }
 0x1c8   : > { %v874_v1 = vmax.f32 %v718_v62, 0.0  ;;  %v876_v2 = vmax.f32 %v831_v63, 0.0  ;;  %v721_v3 = vpop.f32.mrb[4].mxu1  ;;  %v834_v4 = vpop.f32.mrb[12].mxu0  ;;  %1830 = vmatpush3.bf16.msra.mxu0 %v1829_v50  ;;  %1867 = vmatpush3.bf16.msra.mxu1 %v1829_v50  ;;  %v1292_v50 = vld [vmem:[%s2802_s7 + $0x48] sm:$0xff] }
 0x1c9   : > { %v722_v11 = vadd.f32 %v721_v3, %v2609_v31  ;;  %v835_v12 = vadd.f32 %v834_v4, %v2611_v32  ;;  %v723_v13 = vpop.f32.mrb[5].mxu1  ;;  %v836_v14 = vpop.f32.mrb[13].mxu0  ;;  %1832 = vmatprep.subr.bf16.mxu0 %v1831_v51  ;;  %1860 = vmatprep.subr.bf16.mxu1 %v1831_v51  ;;  %v1847_v3 = vpack.c.bf16 %v1310_v59, %v1309_v58  ;;  %v1029_v58 = vld [vmem:[%s2801_s6] sm:$0x3] }
 0x1ca   : > { %v724_v17 = vadd.f32 %v723_v13, %v2615_v33  ;;  %v837_v18 = vadd.f32 %v836_v14, %v2617_v34  ;;  %1111 = vmatprep.mubr.f32.mxu0 %v874_v1  ;;  %1224 = vmatprep.mubr.f32.mxu1 %v876_v2  ;;  %v1845_v2 = vpack.c.bf16 %v1292_v50, %v1291_v49  ;;  %v1296_v49 = vld [vmem:[%s2802_s7 + $0x68] sm:$0xff] }
 0x1cb   : > { %1112 = vmatmul.mubr.f32.gmra.mrb[26].mxu0 %v873_v9  ;;  %1225 = vmatmul.mubr.f32.gmra.mrb[18].mxu1 %v875_v10  ;;  %v877_v30 = vmax.f32 %v722_v11, 0.0  ;;  %v879_v35 = vmax.f32 %v835_v12, 0.0  ;;  %v1293_v10 = vld [vmem:[%s2802_s7 + $0x50] sm:$0xff]  ;;  %v1294_v11 = vld [vmem:[%s2802_s7 + $0x58] sm:$0xff]  ;;  %v2746_v59 = vrot.slane %v1029_v58, %v600_v26 }
 0x1cc   : > { %v878_v19 = vmax.f32 %v724_v17, 0.0  ;;  %v880_v20 = vmax.f32 %v837_v18, 0.0  ;;  %v727_v21 = vpop.f32.mrb[6].mxu1  ;;  %v840_v22 = vpop.f32.mrb[14].mxu0  ;;  %1834 = vmatpush3.bf16.msra.mxu0 %v1833_v5  ;;  %1868 = vmatpush3.bf16.msra.mxu1 %v1833_v5  ;;  %v1849_v18 = vpack.c.bf16 %v1294_v11, %v1293_v10 }
 0x1cd   : > { %v728_v36 = vadd.f32 %v727_v21, %v2609_v31  ;;  %v841_v37 = vadd.f32 %v840_v22, %v2611_v32  ;;  %v729_v38 = vpop.f32.mrb[7].mxu1  ;;  %v842_v39 = vpop.f32.mrb[15].mxu0  ;;  %1836 = vmatprep.subr.bf16.mxu0 %v1835_v6  ;;  %1861 = vmatprep.subr.bf16.mxu1 %v1835_v6 }
 0x1ce   : > { %v730_v42 = vadd.f32 %v729_v38, %v2615_v33  ;;  %v843_v43 = vadd.f32 %v842_v39, %v2617_v34  ;;  %1117 = vmatprep.mubr.f32.mxu0 %v878_v19  ;;  %1230 = vmatprep.mubr.f32.mxu1 %v880_v20 }
 0x1cf   : > { %1118 = vmatmul.mubr.f32.gmra.mrb[28].mxu0 %v877_v30  ;;  %1231 = vmatmul.mubr.f32.gmra.mrb[20].mxu1 %v879_v35  ;;  %v881_v51 = vmax.f32 %v728_v36, 0.0  ;;  %v883_v52 = vmax.f32 %v841_v37, 0.0 }
 0x1d0   : > { %v882_v44 = vmax.f32 %v730_v42, 0.0  ;;  %v884_v45 = vmax.f32 %v843_v43, 0.0  ;;  %v733_v47 = vpop.f32.mrb[8].mxu1  ;;  %v846_v48 = vpop.f32.mrb[16].mxu0  ;;  %1838 = vmatpush3.bf16.msra.mxu0 %v1837_v23  ;;  %1869 = vmatpush3.bf16.msra.mxu1 %v1837_v23 }
 0x1d1   : > { %v734_v53 = vadd.f32 %v733_v47, %v2609_v31  ;;  %v847_v54 = vadd.f32 %v846_v48, %v2611_v32  ;;  %v735_v55 = vpop.f32.mrb[9].mxu1  ;;  %v848_v56 = vpop.f32.mrb[17].mxu0  ;;  %1840 = vmatprep.subr.bf16.mxu0 %v1839_v24  ;;  %1862 = vmatprep.subr.bf16.mxu1 %v1839_v24 }
 0x1d2   : > { %v736_v60 = vadd.f32 %v735_v55, %v2615_v33  ;;  %v849_v57 = vadd.f32 %v848_v56, %v2617_v34  ;;  %1123 = vmatprep.mubr.f32.mxu0 %v882_v44  ;;  %1236 = vmatprep.mubr.f32.mxu1 %v884_v45  ;;  %v1298_v55 = vld [vmem:[%s2802_s7 + $0x78] sm:$0xff] }
 0x1d3   : > { %1124 = vmatmul.mubr.f32.gmra.mrb[30].mxu0 %v881_v51  ;;  %1237 = vmatmul.mubr.f32.gmra.mrb[22].mxu1 %v883_v52  ;;  %v885_v4 = vmax.f32 %v734_v53, 0.0  ;;  %v887_v5 = vmax.f32 %v847_v54, 0.0  ;;  %v1313_v51 = vld [vmem:[%s2802_s7 + $0xf0] sm:$0xff]  ;;  %v1314_v52 = vld [vmem:[%s2802_s7 + $0xf8] sm:$0xff] }
 0x1d4   : > { %v886_v61 = vmax.f32 %v736_v60, 0.0  ;;  %v888_v62 = vmax.f32 %v849_v57, 0.0  ;;  %v739_v63 = vpop.f32.mrb[10].mxu1  ;;  %v852_v1 = vpop.f32.mrb[18].mxu0  ;;  %1842 = vmatpush3.bf16.msra.mxu0 %v1841_v0  ;;  %1870 = vmatpush3.bf16.msra.mxu1 %v1841_v0  ;;  %v1855_v53 = vpack.c.bf16 %v1314_v52, %v1313_v51  ;;  %v1297_v54 = vld [vmem:[%s2802_s7 + $0x70] sm:$0xff]  ;;  %v2750_v60 = vrot.slane %v1029_v58, %v604_v29 }
 0x1d5   : > { %v740_v6 = vadd.f32 %v739_v63, %v2609_v31  ;;  %v853_v7 = vadd.f32 %v852_v1, %v2611_v32  ;;  %v741_v8 = vpop.f32.mrb[11].mxu1  ;;  %v854_v9 = vpop.f32.mrb[19].mxu0  ;;  %1844 = vmatprep.subr.bf16.mxu0 %v1843_v46  ;;  %1863 = vmatprep.subr.bf16.mxu1 %v1843_v46  ;;  %v1857_v56 = vpack.c.bf16 %v1298_v55, %v1297_v54 }
 0x1d6   : > { %v742_v12 = vadd.f32 %v741_v8, %v2615_v33  ;;  %v855_v13 = vadd.f32 %v854_v9, %v2617_v34  ;;  %1129 = vmatprep.mubr.f32.mxu0 %v886_v61  ;;  %1242 = vmatprep.mubr.f32.mxu1 %v888_v62 }
 0x1d7   : > { %1130 = vmatmul.mubr.f32.gmra.mrb[32].mxu0 %v885_v4  ;;  %1243 = vmatmul.mubr.f32.gmra.mrb[24].mxu1 %v887_v5  ;;  %v889_v19 = vmax.f32 %v740_v6, 0.0  ;;  %v891_v20 = vmax.f32 %v853_v7, 0.0 }
 0x1d8   : > { %v890_v14 = vmax.f32 %v742_v12, 0.0  ;;  %v892_v15 = vmax.f32 %v855_v13, 0.0  ;;  %v745_v16 = vpop.f32.mrb[12].mxu1  ;;  %v858_v17 = vpop.f32.mrb[20].mxu0  ;;  %1846 = vmatpush3.bf16.msra.mxu0 %v1845_v2  ;;  %1871 = vmatpush3.bf16.msra.mxu1 %v1845_v2 }
 0x1d9   : > { %v746_v21 = vadd.f32 %v745_v16, %v2609_v31  ;;  %v859_v22 = vadd.f32 %v858_v17, %v2611_v32  ;;  %v747_v23 = vpop.f32.mrb[13].mxu1  ;;  %v860_v24 = vpop.f32.mrb[21].mxu0  ;;  %1848 = vmatprep.subr.bf16.mxu0 %v1847_v3  ;;  %1864 = vmatprep.subr.bf16.mxu1 %v1847_v3 }
 0x1da   : > { %v748_v27 = vadd.f32 %v747_v23, %v2615_v33  ;;  %v861_v28 = vadd.f32 %v860_v24, %v2617_v34  ;;  %1135 = vmatprep.mubr.f32.mxu0 %v890_v14  ;;  %1248 = vmatprep.mubr.f32.mxu1 %v892_v15 }
 0x1db   : > { %1136 = vmatmul.mubr.f32.gmra.mrb[34].mxu0 %v889_v19  ;;  %1249 = vmatmul.mubr.f32.gmra.mrb[26].mxu1 %v891_v20  ;;  %v893_v38 = vmax.f32 %v746_v21, 0.0  ;;  %v895_v39 = vmax.f32 %v859_v22, 0.0 }
 0x1dc   : > { %v894_v30 = vmax.f32 %v748_v27, 0.0  ;;  %v896_v35 = vmax.f32 %v861_v28, 0.0  ;;  %v751_v36 = vpop.f32.mrb[14].mxu1  ;;  %v864_v37 = vpop.f32.mrb[22].mxu0  ;;  %1850 = vmatpush3.bf16.msra.mxu0 %v1849_v18  ;;  %1872 = vmatpush3.bf16.msra.mxu1 %v1849_v18 }
 0x1dd   : > { %v752_v40 = vadd.f32 %v751_v36, %v2609_v31  ;;  %v865_v41 = vadd.f32 %v864_v37, %v2611_v32  ;;  %v753_v42 = vpop.f32.mrb[15].mxu1  ;;  %v866_v43 = vpop.f32.mrb[23].mxu0  ;;  %v1311_v31 = vld [vmem:[%s2802_s7 + $0xe0] sm:$0xff]  ;;  %v1312_v32 = vld [vmem:[%s2802_s7 + $0xe8] sm:$0xff] }
 0x1de   : > { %v754_v44 = vadd.f32 %v753_v42, %v2615_v33  ;;  %v867_v45 = vadd.f32 %v866_v43, %v2617_v34  ;;  %1141 = vmatprep.mubr.f32.mxu0 %v894_v30  ;;  %1254 = vmatprep.mubr.f32.mxu1 %v896_v35  ;;  %v1851_v33 = vpack.c.bf16 %v1312_v32, %v1311_v31  ;;  %v1295_v34 = vld [vmem:[%s2802_s7 + $0x60] sm:$0xff] }
 0x1df   : > { %1142 = vmatmul.mubr.f32.gmra.mrb[36].mxu0 %v893_v38  ;;  %1255 = vmatmul.mubr.f32.gmra.mrb[28].mxu1 %v895_v39  ;;  %v897_v0 = vmax.f32 %v752_v40, 0.0  ;;  %v899_v46 = vmax.f32 %v865_v41, 0.0  ;;  %v1853_v50 = vpack.c.bf16 %v1296_v49, %v1295_v34 }
 0x1e0   : > { %v898_v47 = vmax.f32 %v754_v44, 0.0  ;;  %v900_v48 = vmax.f32 %v867_v45, 0.0  ;;  %1852 = vmatprep.subr.bf16.mxu0 %v1851_v33  ;;  %1865 = vmatprep.subr.bf16.mxu1 %v1851_v33 }
 0x1e1   : > { %1854 = vmatpush3.bf16.msra.mxu0 %v1853_v50  ;;  %1873 = vmatpush3.bf16.msra.mxu1 %v1853_v50 }
 0x1e2   : > { %1147 = vmatprep.mubr.f32.mxu0 %v898_v47  ;;  %1260 = vmatprep.mubr.f32.mxu1 %v900_v48 }
 0x1e3   : > { %1148 = vmatmul.mubr.f32.gmra.mrb[38].mxu0 %v897_v0  ;;  %1261 = vmatmul.mubr.f32.gmra.mrb[30].mxu1 %v899_v46 }
 0x1e4   : > { %1856 = vmatprep.subr.bf16.mxu0 %v1855_v53  ;;  %1866 = vmatprep.subr.bf16.mxu1 %v1855_v53 }
 0x1e5   : > { %1858 = vmatpush3.bf16.msra.mxu0 %v1857_v56  ;;  %1874 = vmatpush3.bf16.msra.mxu1 %v1857_v56 }
 0x29a   : > { %v1107_v57 = vpop.f32.mrb[24].mxu0  ;;  %v1220_v61 = vpop.f32.mrb[16].mxu1 }
 0x29b   : > { %v1108_v62 = vadd.f32 %v1107_v57, %v2746_v59  ;;  %v1109_v63 = vpop.f32.mrb[25].mxu0  ;;  %v1222_v1 = vpop.f32.mrb[17].mxu1 }
 0x29c   : > { %v1110_v2 = vadd.f32 %v1109_v63, %v2750_v60 }
 0x29d   : > { %v1221_v3 = vadd.f32 %v1220_v61, %v1108_v62 }
 0x29e   : > { %v1223_v4 = vadd.f32 %v1222_v1, %v1110_v2  ;;  %v1113_v5 = vpop.f32.mrb[26].mxu0  ;;  %v1226_v6 = vpop.f32.mrb[18].mxu1 }
 0x29f   : > { %v1114_v7 = vadd.f32 %v1113_v5, %v2746_v59  ;;  %v1115_v26 = vpop.f32.mrb[27].mxu0  ;;  %v1228_v8 = vpop.f32.mrb[19].mxu1  ;;  %v1267_v29 = vmax.f32 %v1221_v3, 0.0 }
 0x2a0   : > { %v1268_v9 = vmax.f32 %v1223_v4, 0.0  ;;  %v1116_v25 = vadd.f32 %v1115_v26, %v2750_v60 }
 0x2a1   : > { %v1227_v10 = vadd.f32 %v1226_v6, %v1114_v7 }
 0x2a2   : > { %v1229_v11 = vadd.f32 %v1228_v8, %v1116_v25  ;;  %v1119_v12 = vpop.f32.mrb[28].mxu0  ;;  %v1232_v13 = vpop.f32.mrb[20].mxu1  ;;  %1386 = vmatprep.mubr.f32.mxu0 %v1268_v9 }
 0x2a3   : > { %v1120_v14 = vadd.f32 %v1119_v12, %v2746_v59  ;;  %v1121_v15 = vpop.f32.mrb[29].mxu0  ;;  %v1234_v16 = vpop.f32.mrb[21].mxu1  ;;  %1387 = vmatmul.mubr.f32.vlgmr.msra.gmra.mrb[40].mxu0 %v1267_v29  ;;  %v1269_v19 = vmax.f32 %v1227_v10, 0.0 }
 0x2a4   : > { %v1270_v17 = vmax.f32 %v1229_v11, 0.0  ;;  %v1122_v18 = vadd.f32 %v1121_v15, %v2750_v60 }
 0x2a5   : > { %v1233_v20 = vadd.f32 %v1232_v13, %v1120_v14 }
 0x2a6   : > { %v1235_v21 = vadd.f32 %v1234_v16, %v1122_v18  ;;  %v1125_v22 = vpop.f32.mrb[30].mxu0  ;;  %v1238_v23 = vpop.f32.mrb[22].mxu1  ;;  %1391 = vmatprep.mubr.f32.mxu0 %v1270_v17 }
 0x2a7   : > { %v1126_v24 = vadd.f32 %v1125_v22, %v2746_v59  ;;  %v1127_v27 = vpop.f32.mrb[31].mxu0  ;;  %v1240_v28 = vpop.f32.mrb[23].mxu1  ;;  %1392 = vmatmul.mubr.f32.gmra.mrb[42].mxu0 %v1269_v19  ;;  %v1271_v36 = vmax.f32 %v1233_v20, 0.0 }
 0x2a8   : > { %v1272_v30 = vmax.f32 %v1235_v21, 0.0  ;;  %v1128_v35 = vadd.f32 %v1127_v27, %v2750_v60 }
 0x2a9   : > { %v1239_v37 = vadd.f32 %v1238_v23, %v1126_v24 }
 0x2aa   : > { %v1241_v38 = vadd.f32 %v1240_v28, %v1128_v35  ;;  %v1131_v39 = vpop.f32.mrb[32].mxu0  ;;  %v1244_v40 = vpop.f32.mrb[24].mxu1  ;;  %1396 = vmatprep.mubr.f32.mxu0 %v1272_v30 }
 0x2ab   : > { %v1132_v41 = vadd.f32 %v1131_v39, %v2746_v59  ;;  %v1133_v42 = vpop.f32.mrb[33].mxu0  ;;  %v1246_v43 = vpop.f32.mrb[25].mxu1  ;;  %1397 = vmatmul.mubr.f32.gmra.mrb[44].mxu0 %v1271_v36  ;;  %v1273_v47 = vmax.f32 %v1239_v37, 0.0 }
 0x2ac   : > { %v1274_v44 = vmax.f32 %v1241_v38, 0.0  ;;  %v1134_v45 = vadd.f32 %v1133_v42, %v2750_v60 }
 0x2ad   : > { %v1245_v48 = vadd.f32 %v1244_v40, %v1132_v41 }
 0x2ae   : > { %v1247_v0 = vadd.f32 %v1246_v43, %v1134_v45  ;;  %v1137_v46 = vpop.f32.mrb[34].mxu0  ;;  %v1250_v31 = vpop.f32.mrb[26].mxu1  ;;  %1401 = vmatprep.mubr.f32.mxu0 %v1274_v44 }
 0x2af   : > { %v1138_v32 = vadd.f32 %v1137_v46, %v2746_v59  ;;  %v1139_v33 = vpop.f32.mrb[35].mxu0  ;;  %v1252_v34 = vpop.f32.mrb[27].mxu1  ;;  %1402 = vmatmul.mubr.f32.gmra.mrb[46].mxu0 %v1273_v47  ;;  %v1275_v51 = vmax.f32 %v1245_v48, 0.0 }
 0x2b0   : > { %v1276_v49 = vmax.f32 %v1247_v0, 0.0  ;;  %v1140_v50 = vadd.f32 %v1139_v33, %v2750_v60 }
 0x2b1   : > { %v1251_v52 = vadd.f32 %v1250_v31, %v1138_v32 }
 0x2b2   : > { %v1253_v53 = vadd.f32 %v1252_v34, %v1140_v50  ;;  %v1143_v54 = vpop.f32.mrb[36].mxu0  ;;  %v1256_v55 = vpop.f32.mrb[28].mxu1  ;;  %1406 = vmatprep.mubr.f32.mxu1 %v1276_v49 }
 0x2b3   : > { %v1144_v56 = vadd.f32 %v1143_v54, %v2746_v59  ;;  %v1145_v58 = vpop.f32.mrb[37].mxu0  ;;  %v1258_v57 = vpop.f32.mrb[29].mxu1  ;;  %1407 = vmatmul.mubr.f32.vlgmr.msra.gmra.mrb[32].mxu1 %v1275_v51  ;;  %v1277_v63 = vmax.f32 %v1251_v52, 0.0 }
 0x2b4   : > { %v1278_v61 = vmax.f32 %v1253_v53, 0.0  ;;  %v1146_v62 = vadd.f32 %v1145_v58, %v2750_v60 }
 0x2b5   : > { %v1257_v1 = vadd.f32 %v1256_v55, %v1144_v56 }
 0x2b6   : > { %v1259_v2 = vadd.f32 %v1258_v57, %v1146_v62  ;;  %v1149_v3 = vpop.f32.mrb[38].mxu0  ;;  %v1262_v4 = vpop.f32.mrb[30].mxu1  ;;  %1411 = vmatprep.mubr.f32.mxu1 %v1278_v61 }
 0x2b7   : > { %v1150_v5 = vadd.f32 %v1149_v3, %v2746_v59  ;;  %v1151_v6 = vpop.f32.mrb[39].mxu0  ;;  %v1264_v7 = vpop.f32.mrb[31].mxu1  ;;  %1412 = vmatmul.mubr.f32.gmra.mrb[34].mxu1 %v1277_v63  ;;  %v1279_v9 = vmax.f32 %v1257_v1, 0.0  ;;  %v1583_v59 = vld [vmem:[%s2803_s8] ss:$0 sm:$0xff] }
 0x2b8   : > { %v1280_v26 = vmax.f32 %v1259_v2, 0.0  ;;  %v1152_v8 = vadd.f32 %v1151_v6, %v2750_v60 }
 0x2b9   : > { %v1263_v25 = vadd.f32 %v1262_v4, %v1150_v5 }
 0x2ba   : > { %v1265_v29 = vadd.f32 %v1264_v7, %v1152_v8  ;;  %1416 = vmatprep.mubr.f32.mxu1 %v1280_v26 }
 0x2bb   : > { %1417 = vmatmul.mubr.f32.gmra.mrb[36].mxu1 %v1279_v9  ;;  %v1281_v11 = vmax.f32 %v1263_v25, 0.0 }
 0x2bc   : > { %v1282_v10 = vmax.f32 %v1265_v29, 0.0 }
 0x2be   : > { %1421 = vmatprep.mubr.f32.mxu1 %v1282_v10 }
 0x2bf   : > { %1422 = vmatmul.mubr.f32.gmra.mrb[38].mxu1 %v1281_v11 }
 0x376   : > { %v1629_v12 = vpop.f32.mrb[40].mxu0 }
 0x377   : > { %v1630_v13 = vpop.f32.mrb[41].mxu0 }
 0x378   : > { %v1631_v14 = vadd.f32 %v1630_v13, %v1629_v12 }
 0x37a   : > { %v1389_v60 = vadd.f32 %v1631_v14, %v1583_v59  ;;  %v1632_v15 = vpop.f32.mrb[42].mxu0 }
 0x37b   : > { %v1633_v16 = vpop.f32.mrb[43].mxu0 }
 0x37c   : > { %1427 = vst [vmem:[%s2776_s21] sm:$0xff] %v1389_v60  ;;  %v1634_v17 = vadd.f32 %v1633_v16, %v1632_v15 }
 0x37e   : > { %v1394_v18 = vadd.f32 %v1634_v17, %v1583_v59  ;;  %v1635_v19 = vpop.f32.mrb[44].mxu0 }
 0x37f   : > { %v1636_v20 = vpop.f32.mrb[45].mxu0 }
 0x380   : > { %1428 = vst [vmem:[%s2776_s21 + $0x8] sm:$0xff] %v1394_v18  ;;  %v1637_v21 = vadd.f32 %v1636_v20, %v1635_v19 }
 0x382   : > { %v1399_v22 = vadd.f32 %v1637_v21, %v1583_v59  ;;  %v1638_v23 = vpop.f32.mrb[46].mxu0 }
 0x383   : > { %v1639_v24 = vpop.f32.mrb[47].mxu0 }
 0x384   : > { %1429 = vst [vmem:[%s2776_s21 + $0x10] sm:$0xff] %v1399_v22  ;;  %v1640_v27 = vadd.f32 %v1639_v24, %v1638_v23 }
 0x386   : > { %v1404_v28 = vadd.f32 %v1640_v27, %v1583_v59  ;;  %v1641_v30 = vpop.f32.mrb[32].mxu1 }
 0x387   : > { %v1642_v35 = vpop.f32.mrb[33].mxu1 }
 0x388   : > { %1430 = vst [vmem:[%s2776_s21 + $0x18] sm:$0xff] %v1404_v28  ;;  %v1643_v36 = vadd.f32 %v1642_v35, %v1641_v30 }
 0x38a   : > { %v1409_v37 = vadd.f32 %v1643_v36, %v1583_v59  ;;  %v1644_v38 = vpop.f32.mrb[34].mxu1 }
 0x38b   : > { %v1645_v39 = vpop.f32.mrb[35].mxu1 }
 0x38c   : > { %1431 = vst [vmem:[%s2776_s21 + $0x20] sm:$0xff] %v1409_v37  ;;  %v1646_v40 = vadd.f32 %v1645_v39, %v1644_v38 }
 0x38e   : > { %v1414_v41 = vadd.f32 %v1646_v40, %v1583_v59  ;;  %v1647_v42 = vpop.f32.mrb[36].mxu1 }
 0x38f   : > { %v1648_v43 = vpop.f32.mrb[37].mxu1 }
 0x390   : > { %1432 = vst [vmem:[%s2776_s21 + $0x28] sm:$0xff] %v1414_v41  ;;  %v1649_v44 = vadd.f32 %v1648_v43, %v1647_v42 }
 0x392   : > { %v1419_v45 = vadd.f32 %v1649_v44, %v1583_v59  ;;  %v1650_v47 = vpop.f32.mrb[38].mxu1 }
 0x393   : > { %v1651_v48 = vpop.f32.mrb[39].mxu1 }
 0x394   : > { %1433 = vst [vmem:[%s2776_s21 + $0x30] sm:$0xff] %v1419_v45  ;;  %v1652_v0 = vadd.f32 %v1651_v48, %v1650_v47 }
 0x396   : > { %v1424_v46 = vadd.f32 %v1652_v0, %v1583_v59 }
 0x398   : > { %1434 = vst [vmem:[%s2776_s21 + $0x38] sm:$0xff] %v1424_v46 }
 0x399 PF: > { %s19_s11 = sadd.s32 1, %s1954_s11   ;;  %s2805_s30 = smov %s1950_s10 }
 0x39a   : > { %p16_p5 = scmp.ge.s32.totalorder %s19_s11, 4   ;;  %s2806_s10 = smov %s2808_s12 }
 0x39c   :  { %18 = sbr.rel (!%p16_p5) target bundleno = 2 (0x2), region = 92 }

</bundles_post_ra>
